<compile_context>
chip_gen: v6e
topology: v6e:2x2x1
jax: 0.10.0
libtpu: 0.0.40
codegen_flags: <defaults>
</compile_context>

<pallas_src>
import functools

import numpy as np
import jax
import jax.numpy as jnp
from jax.experimental import pallas as pl
from jax.experimental.pallas import tpu as pltpu


def _compute_freqs(freq_size, grid_size):
    """Matches PhasorSample.compute_freq with freq_log=[False, False]."""
    Nfx, Nfy = freq_size
    Nx, Ny = grid_size
    pfx = np.arange(0, (Nfx + 1) // 2) / Nx
    nfx = np.arange(-(Nfx - 1) // 2, 0) / Nx
    fx = np.concatenate([pfx, nfx]).astype(np.float32)     # full spectrum along x
    pfy = (np.arange(Nfy) / Ny).astype(np.float32)          # positive half along y
    return fx, pfy


def phasor_sample_kernel(xy_ref, wx_ref, wy_ref, w_ref, out_ref, basis_ref, *,
                         bf16_recombine):
    # xy_ref:    (2, tN) grid-unit coords (x row 0, y row 1), f32
    # wx_ref:    (Nfx, 1) angular freqs 2*pi*fx ; wy_ref: (Nfy, 1) = 2*pi*fy
    # w_ref:     (D, 2F) bf16 = [ Re(kspace)*g*h | -Im(kspace)*g*h ]  (kx-major, ky-minor)
    # out_ref:   (D, tN) f32 (lane-dense store)
    # basis_ref: (2F, tN) bf16 VMEM scratch -> rows 0..F-1 = cos(phase)^T,
    #            rows F..2F-1 = sin(phase)^T
    tn = xy_ref.shape[1]
    nfx = wx_ref.shape[0]
    nfy = wy_ref.shape[0]
    f = nfx * nfy

    # bf16 recombination is a v6e/v7x-only micro-opt (native bf16 VALU);
    # keep f32 on v5e (no bf16 VALU) and whenever tolerance headroom matters.
    rdt = jnp.bfloat16 if bf16_recombine else jnp.float32

    x = xy_ref[0:1, :]                                   # (1, tN)
    y = xy_ref[1:2, :]                                   # (1, tN)

    # Per-axis phases (2*pi folded host-side).  Phases stay f32 on purpose;
    # trig runs on full (Nf, tN) blocks so every EUP vreg is fully occupied.
    # Only 2*(Nfx+Nfy)*tN transcendentals per tile.
    px = wx_ref[...] * x                                 # (Nfx, tN) f32
    py = wy_ref[...] * y                                 # (Nfy, tN) f32
    cx_all = jnp.cos(px).astype(rdt)
    sx_all = jnp.sin(px).astype(rdt)
    cy = jnp.cos(py).astype(rdt)
    sy = jnp.sin(py).astype(rdt)

    # Per-kx recombination: fully static, unrolled loop.  Each iteration's
    # working set is ~4 (Nfy, tN) temporaries; results are written straight
    # into the bf16 scratch, so no (Nfx, Nfy, tN) f32 array ever materializes
    # and the vector-store slot no longer saturates.
    for kx in range(nfx):
        # Hoisted sublane broadcasts (each reused for two products).
        cxk = jnp.broadcast_to(cx_all[kx:kx + 1, :], (nfy, tn))
        sxk = jnp.broadcast_to(sx_all[kx:kx + 1, :], (nfy, tn))
        c_rows = cxk * cy - sxk * sy                     # cos(px+py), ky-minor
        s_rows = sxk * cy + cxk * sy                     # sin(px+py)
        basis_ref[kx * nfy:(kx + 1) * nfy, :] = c_rows.astype(jnp.bfloat16)
        basis_ref[f + kx * nfy:f + (kx + 1) * nfy, :] = s_rows.astype(jnp.bfloat16)

    # One fused MXU dot (K = 2F): out = [Wr | -Wi] @ [cos; sin], f32 accumulation.
    out_ref[...] = jnp.dot(w_ref[...], basis_ref[...],
                           preferred_element_type=jnp.float32)


def phasor_sample_forward(coord, params_r, params_i, *, freq_size, grid_size,
                          gaussian_var, tile_n=512, bf16_recombine=False):
    """coord: (..., 2) in [-1, 1]; params_{r,i}: (1, D, Nfx, Nfy) f32 (complex split).

    Returns feat: (N, D) f32 with N = prod(coord.shape[:-1]).
    tile_n is a tuning knob (multiple of 128; keep n_tiles >= 2 on v7x).
    """
    assert tile_n % 128 == 0, "tile_n must be a multiple of 128 (lane width)"
    coord = coord.reshape(-1, 2).astype(jnp.float32)
    N = coord.shape[0]
    D = params_r.shape[1]
    Nfx, Nfy = freq_size
    Nx, Ny = grid_size
    F = Nfx * Nfy

    fx, pfy = _compute_freqs(freq_size, grid_size)

    # compute_gaussian: exp(sum_{last} -2*(pi*f)^2 * var) on ktraj = meshgrid(fx, pfy)
    gauss = np.exp(-2.0 * (np.pi ** 2) * float(gaussian_var)
                   * (fx[:, None] ** 2 + pfy[None, :] ** 2)).astype(np.float32)
    # Hermitian weights for the half spectrum along y: DC once, the rest twice.
    wyh = np.ones((Nfy,), np.float32)
    wyh[1:] = 2.0
    if 2 * (Nfy - 1) == Ny:          # true Nyquist bin (fy == 0.5) counted once
        wyh[-1] = 1.0
    scale = jnp.asarray(gauss * wyh[None, :])                  # (Nfx, Nfy)

    # kspace = params * gauss (module property); Gaussian + Hermitian weights
    # folded into the weight matrix; Ki pre-negated; the two halves are fused
    # into a single (D, 2F) bf16 matrix so the kernel runs ONE MXU dot.
    kr = (params_r[0] * scale[None]).reshape(D, F)
    ki = (params_i[0] * scale[None]).reshape(D, F)
    w = jnp.concatenate([kr, -ki], axis=1).astype(jnp.bfloat16)    # (D, 2F)

    # Per-axis angular frequencies with 2*pi folded in (column vectors for the
    # sublane-direction outer product inside the kernel).
    wx = jnp.asarray(2.0 * np.pi * fx, jnp.float32)[:, None]   # (Nfx, 1)
    wy = jnp.asarray(2.0 * np.pi * pfy, jnp.float32)[:, None]  # (Nfy, 1)

    # TODO(synk): irdft2d's body isn't part of the provided module; we use the
    # standard PREF-style convention coord in [-1,1] mapped to grid units.
    coord_g = (coord + 1.0) * 0.5 * jnp.asarray([Nx, Ny], jnp.float32)
    xy = coord_g.T                                             # (2, N) lane-dense

    n_tiles = pl.cdiv(N, tile_n)
    n_pad = n_tiles * tile_n
    if n_pad != N:
        xy = jnp.pad(xy, ((0, 0), (0, n_pad - N)))

    kernel = functools.partial(phasor_sample_kernel,
                               bf16_recombine=bf16_recombine)

    out_t = pl.pallas_call(
        kernel,
        out_shape=jax.ShapeDtypeStruct((D, n_pad), jnp.float32),
        grid_spec=pltpu.PrefetchScalarGridSpec(
            num_scalar_prefetch=0,
            grid=(n_tiles,),
            in_specs=[
                pl.BlockSpec((2, tile_n), lambda i: (0, i)),   # coords tile (2, tN)
                pl.BlockSpec((Nfx, 1), lambda i: (0, 0)),      # 2*pi*fx
                pl.BlockSpec((Nfy, 1), lambda i: (0, 0)),      # 2*pi*fy
                pl.BlockSpec((D, 2 * F), lambda i: (0, 0)),    # fused [Wr | -Wi] bf16
            ],
            out_specs=pl.BlockSpec((D, tile_n), lambda i: (0, i)),
            scratch_shapes=[pltpu.VMEM((2 * F, tile_n), jnp.bfloat16)],
        ),
        compiler_params=pltpu.CompilerParams(
            dimension_semantics=("parallel",)),
    )(xy, wx, wy, w)

    # One cheap XLA transpose back to the module's (N, D) feature layout.
    return out_t.T[:N]


if __name__ == "__main__":
    key = jax.random.PRNGKey(0)
    dim_feat = 8
    freq_size = (16, 16)
    grid_size = (32, 32)
    gaussian_var = 0.001

    k1, k2, k3 = jax.random.split(key, 3)
    # Parameter shape from init_(): (1, dim_feat, *freqSize), complex64 -> real/imag.
    # (Module zero-inits; deterministic random init so the test is non-trivial.)
    params_r = 0.1 * jax.random.normal(k1, (1, dim_feat, *freq_size), jnp.float32)
    params_i = 0.1 * jax.random.normal(k2, (1, dim_feat, *freq_size), jnp.float32)
    # coord: batch of sample coordinates in [-1, 1]; N = 1024 -> 2 tiles at
    # tile_n=512 (keeps both v7x TensorCores busy via the "parallel" grid axis).
    coord = jax.random.uniform(k3, (2, 512, 2), jnp.float32, minval=-1.0, maxval=1.0)

    feat = phasor_sample_forward(
        coord, params_r, params_i,
        freq_size=freq_size, grid_size=grid_size, gaussian_var=gaussian_var,
        tile_n=512, bf16_recombine=False)
    feat = jax.block_until_ready(feat)

    # Pure-JAX reference of the same math: dense phase, f32 trig, matmul operands
    # rounded to bf16 (matching the kernel's MXU precision), f32 accumulation.
    Nfx, Nfy = freq_size
    Nx, Ny = grid_size
    fx, pfy = _compute_freqs(freq_size, grid_size)
    gauss = np.exp(-2.0 * (np.pi ** 2) * gaussian_var
                   * (fx[:, None] ** 2 + pfy[None, :] ** 2)).astype(np.float32)
    wyh = np.ones((Nfy,), np.float32); wyh[1:] = 2.0
    if 2 * (Nfy - 1) == Ny:
        wyh[-1] = 1.0
    scale = jnp.asarray(gauss * wyh[None, :])
    kr = (params_r[0] * scale[None]).reshape(dim_feat, Nfx * Nfy)
    ki = (params_i[0] * scale[None]).reshape(dim_feat, Nfx * Nfy)
    fxf = jnp.broadcast_to(jnp.asarray(fx)[:, None], (Nfx, Nfy)).reshape(1, -1)
    fyf = jnp.broadcast_to(jnp.asarray(pfy)[None, :], (Nfx, Nfy)).reshape(1, -1)
    coord_g = (coord.reshape(-1, 2) + 1.0) * 0.5 * jnp.asarray(grid_size, jnp.float32)
    phase = 2.0 * np.pi * (coord_g[:, 0:1] * fxf + coord_g[:, 1:2] * fyf)

    def _bf(v):  # bf16 rounding, back to f32 for an exact-product reference matmul
        return v.astype(jnp.bfloat16).astype(jnp.float32)

    ref = _bf(jnp.cos(phase)) @ _bf(kr).T - _bf(jnp.sin(phase)) @ _bf(ki).T

    N = coord.reshape(-1, 2).shape[0]
    assert feat.shape == (N, dim_feat)
    err = float(jnp.max(jnp.abs(feat - ref)))
    assert jnp.allclose(feat, ref, atol=2e-2, rtol=2e-2), err
    print("KERNEL_OK")
</pallas_src>

<mosaic_0001>
module attributes {stable_mosaic.version = 11 : i64} {
  func.func @phasor_sample_kernel(%arg0: i32, %arg1: memref<2x512xf32, #tpu.memory_space<vmem>>, %arg2: memref<16x1xf32, #tpu.memory_space<vmem>>, %arg3: memref<16x1xf32, #tpu.memory_space<vmem>>, %arg4: memref<8x512xbf16, #tpu.memory_space<vmem>>, %arg5: memref<8x512xf32, #tpu.memory_space<vmem>>, %arg6: memref<512x512xbf16, #tpu.memory_space<vmem>>) attributes {dimension_semantics = [#tpu.dimension_semantics<parallel>], iteration_bounds = array<i64: 2>, scalar_prefetch = 0 : i64, scratch_operands = 1 : i64, tpu.core_type = #tpu.core_type<tc>, window_params = [{transform_indices = @transform_0, window_bounds = array<i64: 2, 512>}, {pipeline_mode = #tpu.pipeline_mode<synchronous>, transform_indices = @transform_1, window_bounds = array<i64: 16, 1>}, {pipeline_mode = #tpu.pipeline_mode<synchronous>, transform_indices = @transform_2, window_bounds = array<i64: 16, 1>}, {pipeline_mode = #tpu.pipeline_mode<synchronous>, transform_indices = @transform_3, window_bounds = array<i64: 8, 512>}, {transform_indices = @transform_4, window_bounds = array<i64: 8, 512>}]} {
    %c0 = arith.constant 0 : index
    %c0_0 = arith.constant 0 : index
    %0 = vector.load %arg1[%c0, %c0_0] : memref<2x512xf32, #tpu.memory_space<vmem>>, vector<1x512xf32>
    %c1 = arith.constant 1 : index
    %c0_1 = arith.constant 0 : index
    %1 = vector.load %arg1[%c1, %c0_1] : memref<2x512xf32, #tpu.memory_space<vmem>>, vector<1x512xf32>
    %c0_2 = arith.constant 0 : index
    %c0_3 = arith.constant 0 : index
    %2 = vector.load %arg2[%c0_2, %c0_3] : memref<16x1xf32, #tpu.memory_space<vmem>>, vector<16x1xf32>
    %3 = vector.broadcast %2 : vector<16x1xf32> to vector<16x512xf32>
    %4 = vector.broadcast %0 : vector<1x512xf32> to vector<16x512xf32>
    %5 = arith.mulf %3, %4 : vector<16x512xf32>
    %c0_4 = arith.constant 0 : index
    %c0_5 = arith.constant 0 : index
    %6 = vector.load %arg3[%c0_4, %c0_5] : memref<16x1xf32, #tpu.memory_space<vmem>>, vector<16x1xf32>
    %7 = vector.broadcast %6 : vector<16x1xf32> to vector<16x512xf32>
    %8 = vector.broadcast %1 : vector<1x512xf32> to vector<16x512xf32>
    %9 = arith.mulf %7, %8 : vector<16x512xf32>
    %10 = math.cos %5 : vector<16x512xf32>
    %11 = math.sin %5 : vector<16x512xf32>
    %12 = math.cos %9 : vector<16x512xf32>
    %13 = math.sin %9 : vector<16x512xf32>
    %14 = vector.extract_strided_slice %10 {offsets = [0, 0], sizes = [1, 512], strides = [1, 1]} : vector<16x512xf32> to vector<1x512xf32>
    %15 = vector.shape_cast %14 : vector<1x512xf32> to vector<1x512xf32>
    %16 = vector.broadcast %15 : vector<1x512xf32> to vector<16x512xf32>
    %17 = vector.extract_strided_slice %11 {offsets = [0, 0], sizes = [1, 512], strides = [1, 1]} : vector<16x512xf32> to vector<1x512xf32>
    %18 = vector.shape_cast %17 : vector<1x512xf32> to vector<1x512xf32>
    %19 = vector.broadcast %18 : vector<1x512xf32> to vector<16x512xf32>
    %20 = arith.mulf %16, %12 : vector<16x512xf32>
    %21 = arith.mulf %19, %13 : vector<16x512xf32>
    %22 = arith.subf %20, %21 : vector<16x512xf32>
    %23 = arith.mulf %19, %12 : vector<16x512xf32>
    %24 = arith.mulf %16, %13 : vector<16x512xf32>
    %25 = arith.addf %23, %24 : vector<16x512xf32>
    %26 = arith.truncf %22 : vector<16x512xf32> to vector<16x512xbf16>
    %c0_6 = arith.constant 0 : index
    %c0_7 = arith.constant 0 : index
    %27 = vector.load %arg6[%c0_6, %c0_7] : memref<512x512xbf16, #tpu.memory_space<vmem>>, vector<16x512xbf16>
    tpu.vector_store %arg6[%c0_6, %c0_7], %26 {strides = array<i32>} : memref<512x512xbf16, #tpu.memory_space<vmem>>, vector<16x512xbf16>,
    %28 = arith.truncf %25 : vector<16x512xf32> to vector<16x512xbf16>
    %c256 = arith.constant 256 : index
    %c0_8 = arith.constant 0 : index
    %29 = vector.load %arg6[%c256, %c0_8] : memref<512x512xbf16, #tpu.memory_space<vmem>>, vector<16x512xbf16>
    tpu.vector_store %arg6[%c256, %c0_8], %28 {strides = array<i32>} : memref<512x512xbf16, #tpu.memory_space<vmem>>, vector<16x512xbf16>,
    %30 = vector.extract_strided_slice %10 {offsets = [1, 0], sizes = [1, 512], strides = [1, 1]} : vector<16x512xf32> to vector<1x512xf32>
    %31 = vector.shape_cast %30 : vector<1x512xf32> to vector<1x512xf32>
    %32 = vector.broadcast %31 : vector<1x512xf32> to vector<16x512xf32>
    %33 = vector.extract_strided_slice %11 {offsets = [1, 0], sizes = [1, 512], strides = [1, 1]} : vector<16x512xf32> to vector<1x512xf32>
    %34 = vector.shape_cast %33 : vector<1x512xf32> to vector<1x512xf32>
    %35 = vector.broadcast %34 : vector<1x512xf32> to vector<16x512xf32>
    %36 = arith.mulf %32, %12 : vector<16x512xf32>
    %37 = arith.mulf %35, %13 : vector<16x512xf32>
    %38 = arith.subf %36, %37 : vector<16x512xf32>
    %39 = arith.mulf %35, %12 : vector<16x512xf32>
    %40 = arith.mulf %32, %13 : vector<16x512xf32>
    %41 = arith.addf %39, %40 : vector<16x512xf32>
    %42 = arith.truncf %38 : vector<16x512xf32> to vector<16x512xbf16>
    %c16 = arith.constant 16 : index
    %c0_9 = arith.constant 0 : index
    %43 = vector.load %arg6[%c16, %c0_9] : memref<512x512xbf16, #tpu.memory_space<vmem>>, vector<16x512xbf16>
    tpu.vector_store %arg6[%c16, %c0_9], %42 {strides = array<i32>} : memref<512x512xbf16, #tpu.memory_space<vmem>>, vector<16x512xbf16>,
    %44 = arith.truncf %41 : vector<16x512xf32> to vector<16x512xbf16>
    %c272 = arith.constant 272 : index
    %c0_10 = arith.constant 0 : index
    %45 = vector.load %arg6[%c272, %c0_10] : memref<512x512xbf16, #tpu.memory_space<vmem>>, vector<16x512xbf16>
    tpu.vector_store %arg6[%c272, %c0_10], %44 {strides = array<i32>} : memref<512x512xbf16, #tpu.memory_space<vmem>>, vector<16x512xbf16>,
    %46 = vector.extract_strided_slice %10 {offsets = [2, 0], sizes = [1, 512], strides = [1, 1]} : vector<16x512xf32> to vector<1x512xf32>
    %47 = vector.shape_cast %46 : vector<1x512xf32> to vector<1x512xf32>
    %48 = vector.broadcast %47 : vector<1x512xf32> to vector<16x512xf32>
    %49 = vector.extract_strided_slice %11 {offsets = [2, 0], sizes = [1, 512], strides = [1, 1]} : vector<16x512xf32> to vector<1x512xf32>
    %50 = vector.shape_cast %49 : vector<1x512xf32> to vector<1x512xf32>
    %51 = vector.broadcast %50 : vector<1x512xf32> to vector<16x512xf32>
    %52 = arith.mulf %48, %12 : vector<16x512xf32>
    %53 = arith.mulf %51, %13 : vector<16x512xf32>
    %54 = arith.subf %52, %53 : vector<16x512xf32>
    %55 = arith.mulf %51, %12 : vector<16x512xf32>
    %56 = arith.mulf %48, %13 : vector<16x512xf32>
    %57 = arith.addf %55, %56 : vector<16x512xf32>
    %58 = arith.truncf %54 : vector<16x512xf32> to vector<16x512xbf16>
    %c32 = arith.constant 32 : index
    %c0_11 = arith.constant 0 : index
    %59 = vector.load %arg6[%c32, %c0_11] : memref<512x512xbf16, #tpu.memory_space<vmem>>, vector<16x512xbf16>
    tpu.vector_store %arg6[%c32, %c0_11], %58 {strides = array<i32>} : memref<512x512xbf16, #tpu.memory_space<vmem>>, vector<16x512xbf16>,
    %60 = arith.truncf %57 : vector<16x512xf32> to vector<16x512xbf16>
    %c288 = arith.constant 288 : index
    %c0_12 = arith.constant 0 : index
    %61 = vector.load %arg6[%c288, %c0_12] : memref<512x512xbf16, #tpu.memory_space<vmem>>, vector<16x512xbf16>
    tpu.vector_store %arg6[%c288, %c0_12], %60 {strides = array<i32>} : memref<512x512xbf16, #tpu.memory_space<vmem>>, vector<16x512xbf16>,
    %62 = vector.extract_strided_slice %10 {offsets = [3, 0], sizes = [1, 512], strides = [1, 1]} : vector<16x512xf32> to vector<1x512xf32>
    %63 = vector.shape_cast %62 : vector<1x512xf32> to vector<1x512xf32>
    %64 = vector.broadcast %63 : vector<1x512xf32> to vector<16x512xf32>
    %65 = vector.extract_strided_slice %11 {offsets = [3, 0], sizes = [1, 512], strides = [1, 1]} : vector<16x512xf32> to vector<1x512xf32>
    %66 = vector.shape_cast %65 : vector<1x512xf32> to vector<1x512xf32>
    %67 = vector.broadcast %66 : vector<1x512xf32> to vector<16x512xf32>
    %68 = arith.mulf %64, %12 : vector<16x512xf32>
    %69 = arith.mulf %67, %13 : vector<16x512xf32>
    %70 = arith.subf %68, %69 : vector<16x512xf32>
    %71 = arith.mulf %67, %12 : vector<16x512xf32>
    %72 = arith.mulf %64, %13 : vector<16x512xf32>
    %73 = arith.addf %71, %72 : vector<16x512xf32>
    %74 = arith.truncf %70 : vector<16x512xf32> to vector<16x512xbf16>
    %c48 = arith.constant 48 : index
    %c0_13 = arith.constant 0 : index
    %75 = vector.load %arg6[%c48, %c0_13] : memref<512x512xbf16, #tpu.memory_space<vmem>>, vector<16x512xbf16>
    tpu.vector_store %arg6[%c48, %c0_13], %74 {strides = array<i32>} : memref<512x512xbf16, #tpu.memory_space<vmem>>, vector<16x512xbf16>,
    %76 = arith.truncf %73 : vector<16x512xf32> to vector<16x512xbf16>
    %c304 = arith.constant 304 : index
    %c0_14 = arith.constant 0 : index
    %77 = vector.load %arg6[%c304, %c0_14] : memref<512x512xbf16, #tpu.memory_space<vmem>>, vector<16x512xbf16>
    tpu.vector_store %arg6[%c304, %c0_14], %76 {strides = array<i32>} : memref<512x512xbf16, #tpu.memory_space<vmem>>, vector<16x512xbf16>,
    %78 = vector.extract_strided_slice %10 {offsets = [4, 0], sizes = [1, 512], strides = [1, 1]} : vector<16x512xf32> to vector<1x512xf32>
    %79 = vector.shape_cast %78 : vector<1x512xf32> to vector<1x512xf32>
    %80 = vector.broadcast %79 : vector<1x512xf32> to vector<16x512xf32>
    %81 = vector.extract_strided_slice %11 {offsets = [4, 0], sizes = [1, 512], strides = [1, 1]} : vector<16x512xf32> to vector<1x512xf32>
    %82 = vector.shape_cast %81 : vector<1x512xf32> to vector<1x512xf32>
    %83 = vector.broadcast %82 : vector<1x512xf32> to vector<16x512xf32>
    %84 = arith.mulf %80, %12 : vector<16x512xf32>
    %85 = arith.mulf %83, %13 : vector<16x512xf32>
    %86 = arith.subf %84, %85 : vector<16x512xf32>
    %87 = arith.mulf %83, %12 : vector<16x512xf32>
    %88 = arith.mulf %80, %13 : vector<16x512xf32>
    %89 = arith.addf %87, %88 : vector<16x512xf32>
    %90 = arith.truncf %86 : vector<16x512xf32> to vector<16x512xbf16>
    %c64 = arith.constant 64 : index
    %c0_15 = arith.constant 0 : index
    %91 = vector.load %arg6[%c64, %c0_15] : memref<512x512xbf16, #tpu.memory_space<vmem>>, vector<16x512xbf16>
    tpu.vector_store %arg6[%c64, %c0_15], %90 {strides = array<i32>} : memref<512x512xbf16, #tpu.memory_space<vmem>>, vector<16x512xbf16>,
    %92 = arith.truncf %89 : vector<16x512xf32> to vector<16x512xbf16>
    %c320 = arith.constant 320 : index
    %c0_16 = arith.constant 0 : index
    %93 = vector.load %arg6[%c320, %c0_16] : memref<512x512xbf16, #tpu.memory_space<vmem>>, vector<16x512xbf16>
    tpu.vector_store %arg6[%c320, %c0_16], %92 {strides = array<i32>} : memref<512x512xbf16, #tpu.memory_space<vmem>>, vector<16x512xbf16>,
    %94 = vector.extract_strided_slice %10 {offsets = [5, 0], sizes = [1, 512], strides = [1, 1]} : vector<16x512xf32> to vector<1x512xf32>
    %95 = vector.shape_cast %94 : vector<1x512xf32> to vector<1x512xf32>
    %96 = vector.broadcast %95 : vector<1x512xf32> to vector<16x512xf32>
    %97 = vector.extract_strided_slice %11 {offsets = [5, 0], sizes = [1, 512], strides = [1, 1]} : vector<16x512xf32> to vector<1x512xf32>
    %98 = vector.shape_cast %97 : vector<1x512xf32> to vector<1x512xf32>
    %99 = vector.broadcast %98 : vector<1x512xf32> to vector<16x512xf32>
    %100 = arith.mulf %96, %12 : vector<16x512xf32>
    %101 = arith.mulf %99, %13 : vector<16x512xf32>
    %102 = arith.subf %100, %101 : vector<16x512xf32>
    %103 = arith.mulf %99, %12 : vector<16x512xf32>
    %104 = arith.mulf %96, %13 : vector<16x512xf32>
    %105 = arith.addf %103, %104 : vector<16x512xf32>
    %106 = arith.truncf %102 : vector<16x512xf32> to vector<16x512xbf16>
    %c80 = arith.constant 80 : index
    %c0_17 = arith.constant 0 : index
    %107 = vector.load %arg6[%c80, %c0_17] : memref<512x512xbf16, #tpu.memory_space<vmem>>, vector<16x512xbf16>
    tpu.vector_store %arg6[%c80, %c0_17], %106 {strides = array<i32>} : memref<512x512xbf16, #tpu.memory_space<vmem>>, vector<16x512xbf16>,
    %108 = arith.truncf %105 : vector<16x512xf32> to vector<16x512xbf16>
    %c336 = arith.constant 336 : index
    %c0_18 = arith.constant 0 : index
    %109 = vector.load %arg6[%c336, %c0_18] : memref<512x512xbf16, #tpu.memory_space<vmem>>, vector<16x512xbf16>
    tpu.vector_store %arg6[%c336, %c0_18], %108 {strides = array<i32>} : memref<512x512xbf16, #tpu.memory_space<vmem>>, vector<16x512xbf16>,
    %110 = vector.extract_strided_slice %10 {offsets = [6, 0], sizes = [1, 512], strides = [1, 1]} : vector<16x512xf32> to vector<1x512xf32>
    %111 = vector.shape_cast %110 : vector<1x512xf32> to vector<1x512xf32>
    %112 = vector.broadcast %111 : vector<1x512xf32> to vector<16x512xf32>
    %113 = vector.extract_strided_slice %11 {offsets = [6, 0], sizes = [1, 512], strides = [1, 1]} : vector<16x512xf32> to vector<1x512xf32>
    %114 = vector.shape_cast %113 : vector<1x512xf32> to vector<1x512xf32>
    %115 = vector.broadcast %114 : vector<1x512xf32> to vector<16x512xf32>
    %116 = arith.mulf %112, %12 : vector<16x512xf32>
    %117 = arith.mulf %115, %13 : vector<16x512xf32>
    %118 = arith.subf %116, %117 : vector<16x512xf32>
    %119 = arith.mulf %115, %12 : vector<16x512xf32>
    %120 = arith.mulf %112, %13 : vector<16x512xf32>
    %121 = arith.addf %119, %120 : vector<16x512xf32>
    %122 = arith.truncf %118 : vector<16x512xf32> to vector<16x512xbf16>
    %c96 = arith.constant 96 : index
    %c0_19 = arith.constant 0 : index
    %123 = vector.load %arg6[%c96, %c0_19] : memref<512x512xbf16, #tpu.memory_space<vmem>>, vector<16x512xbf16>
    tpu.vector_store %arg6[%c96, %c0_19], %122 {strides = array<i32>} : memref<512x512xbf16, #tpu.memory_space<vmem>>, vector<16x512xbf16>,
    %124 = arith.truncf %121 : vector<16x512xf32> to vector<16x512xbf16>
    %c352 = arith.constant 352 : index
    %c0_20 = arith.constant 0 : index
    %125 = vector.load %arg6[%c352, %c0_20] : memref<512x512xbf16, #tpu.memory_space<vmem>>, vector<16x512xbf16>
    tpu.vector_store %arg6[%c352, %c0_20], %124 {strides = array<i32>} : memref<512x512xbf16, #tpu.memory_space<vmem>>, vector<16x512xbf16>,
    %126 = vector.extract_strided_slice %10 {offsets = [7, 0], sizes = [1, 512], strides = [1, 1]} : vector<16x512xf32> to vector<1x512xf32>
    %127 = vector.shape_cast %126 : vector<1x512xf32> to vector<1x512xf32>
    %128 = vector.broadcast %127 : vector<1x512xf32> to vector<16x512xf32>
    %129 = vector.extract_strided_slice %11 {offsets = [7, 0], sizes = [1, 512], strides = [1, 1]} : vector<16x512xf32> to vector<1x512xf32>
    %130 = vector.shape_cast %129 : vector<1x512xf32> to vector<1x512xf32>
    %131 = vector.broadcast %130 : vector<1x512xf32> to vector<16x512xf32>
    %132 = arith.mulf %128, %12 : vector<16x512xf32>
    %133 = arith.mulf %131, %13 : vector<16x512xf32>
    %134 = arith.subf %132, %133 : vector<16x512xf32>
    %135 = arith.mulf %131, %12 : vector<16x512xf32>
    %136 = arith.mulf %128, %13 : vector<16x512xf32>
    %137 = arith.addf %135, %136 : vector<16x512xf32>
    %138 = arith.truncf %134 : vector<16x512xf32> to vector<16x512xbf16>
    %c112 = arith.constant 112 : index
    %c0_21 = arith.constant 0 : index
    %139 = vector.load %arg6[%c112, %c0_21] : memref<512x512xbf16, #tpu.memory_space<vmem>>, vector<16x512xbf16>
    tpu.vector_store %arg6[%c112, %c0_21], %138 {strides = array<i32>} : memref<512x512xbf16, #tpu.memory_space<vmem>>, vector<16x512xbf16>,
    %140 = arith.truncf %137 : vector<16x512xf32> to vector<16x512xbf16>
    %c368 = arith.constant 368 : index
    %c0_22 = arith.constant 0 : index
    %141 = vector.load %arg6[%c368, %c0_22] : memref<512x512xbf16, #tpu.memory_space<vmem>>, vector<16x512xbf16>
    tpu.vector_store %arg6[%c368, %c0_22], %140 {strides = array<i32>} : memref<512x512xbf16, #tpu.memory_space<vmem>>, vector<16x512xbf16>,
    %142 = vector.extract_strided_slice %10 {offsets = [8, 0], sizes = [1, 512], strides = [1, 1]} : vector<16x512xf32> to vector<1x512xf32>
    %143 = vector.shape_cast %142 : vector<1x512xf32> to vector<1x512xf32>
    %144 = vector.broadcast %143 : vector<1x512xf32> to vector<16x512xf32>
    %145 = vector.extract_strided_slice %11 {offsets = [8, 0], sizes = [1, 512], strides = [1, 1]} : vector<16x512xf32> to vector<1x512xf32>
    %146 = vector.shape_cast %145 : vector<1x512xf32> to vector<1x512xf32>
    %147 = vector.broadcast %146 : vector<1x512xf32> to vector<16x512xf32>
    %148 = arith.mulf %144, %12 : vector<16x512xf32>
    %149 = arith.mulf %147, %13 : vector<16x512xf32>
    %150 = arith.subf %148, %149 : vector<16x512xf32>
    %151 = arith.mulf %147, %12 : vector<16x512xf32>
    %152 = arith.mulf %144, %13 : vector<16x512xf32>
    %153 = arith.addf %151, %152 : vector<16x512xf32>
    %154 = arith.truncf %150 : vector<16x512xf32> to vector<16x512xbf16>
    %c128 = arith.constant 128 : index
    %c0_23 = arith.constant 0 : index
    %155 = vector.load %arg6[%c128, %c0_23] : memref<512x512xbf16, #tpu.memory_space<vmem>>, vector<16x512xbf16>
    tpu.vector_store %arg6[%c128, %c0_23], %154 {strides = array<i32>} : memref<512x512xbf16, #tpu.memory_space<vmem>>, vector<16x512xbf16>,
    %156 = arith.truncf %153 : vector<16x512xf32> to vector<16x512xbf16>
    %c384 = arith.constant 384 : index
    %c0_24 = arith.constant 0 : index
    %157 = vector.load %arg6[%c384, %c0_24] : memref<512x512xbf16, #tpu.memory_space<vmem>>, vector<16x512xbf16>
    tpu.vector_store %arg6[%c384, %c0_24], %156 {strides = array<i32>} : memref<512x512xbf16, #tpu.memory_space<vmem>>, vector<16x512xbf16>,
    %158 = vector.extract_strided_slice %10 {offsets = [9, 0], sizes = [1, 512], strides = [1, 1]} : vector<16x512xf32> to vector<1x512xf32>
    %159 = vector.shape_cast %158 : vector<1x512xf32> to vector<1x512xf32>
    %160 = vector.broadcast %159 : vector<1x512xf32> to vector<16x512xf32>
    %161 = vector.extract_strided_slice %11 {offsets = [9, 0], sizes = [1, 512], strides = [1, 1]} : vector<16x512xf32> to vector<1x512xf32>
    %162 = vector.shape_cast %161 : vector<1x512xf32> to vector<1x512xf32>
    %163 = vector.broadcast %162 : vector<1x512xf32> to vector<16x512xf32>
    %164 = arith.mulf %160, %12 : vector<16x512xf32>
    %165 = arith.mulf %163, %13 : vector<16x512xf32>
    %166 = arith.subf %164, %165 : vector<16x512xf32>
    %167 = arith.mulf %163, %12 : vector<16x512xf32>
    %168 = arith.mulf %160, %13 : vector<16x512xf32>
    %169 = arith.addf %167, %168 : vector<16x512xf32>
    %170 = arith.truncf %166 : vector<16x512xf32> to vector<16x512xbf16>
    %c144 = arith.constant 144 : index
    %c0_25 = arith.constant 0 : index
    %171 = vector.load %arg6[%c144, %c0_25] : memref<512x512xbf16, #tpu.memory_space<vmem>>, vector<16x512xbf16>
    tpu.vector_store %arg6[%c144, %c0_25], %170 {strides = array<i32>} : memref<512x512xbf16, #tpu.memory_space<vmem>>, vector<16x512xbf16>,
    %172 = arith.truncf %169 : vector<16x512xf32> to vector<16x512xbf16>
    %c400 = arith.constant 400 : index
    %c0_26 = arith.constant 0 : index
    %173 = vector.load %arg6[%c400, %c0_26] : memref<512x512xbf16, #tpu.memory_space<vmem>>, vector<16x512xbf16>
    tpu.vector_store %arg6[%c400, %c0_26], %172 {strides = array<i32>} : memref<512x512xbf16, #tpu.memory_space<vmem>>, vector<16x512xbf16>,
    %174 = vector.extract_strided_slice %10 {offsets = [10, 0], sizes = [1, 512], strides = [1, 1]} : vector<16x512xf32> to vector<1x512xf32>
    %175 = vector.shape_cast %174 : vector<1x512xf32> to vector<1x512xf32>
    %176 = vector.broadcast %175 : vector<1x512xf32> to vector<16x512xf32>
    %177 = vector.extract_strided_slice %11 {offsets = [10, 0], sizes = [1, 512], strides = [1, 1]} : vector<16x512xf32> to vector<1x512xf32>
    %178 = vector.shape_cast %177 : vector<1x512xf32> to vector<1x512xf32>
    %179 = vector.broadcast %178 : vector<1x512xf32> to vector<16x512xf32>
    %180 = arith.mulf %176, %12 : vector<16x512xf32>
    %181 = arith.mulf %179, %13 : vector<16x512xf32>
    %182 = arith.subf %180, %181 : vector<16x512xf32>
    %183 = arith.mulf %179, %12 : vector<16x512xf32>
    %184 = arith.mulf %176, %13 : vector<16x512xf32>
    %185 = arith.addf %183, %184 : vector<16x512xf32>
    %186 = arith.truncf %182 : vector<16x512xf32> to vector<16x512xbf16>
    %c160 = arith.constant 160 : index
    %c0_27 = arith.constant 0 : index
    %187 = vector.load %arg6[%c160, %c0_27] : memref<512x512xbf16, #tpu.memory_space<vmem>>, vector<16x512xbf16>
    tpu.vector_store %arg6[%c160, %c0_27], %186 {strides = array<i32>} : memref<512x512xbf16, #tpu.memory_space<vmem>>, vector<16x512xbf16>,
    %188 = arith.truncf %185 : vector<16x512xf32> to vector<16x512xbf16>
    %c416 = arith.constant 416 : index
    %c0_28 = arith.constant 0 : index
    %189 = vector.load %arg6[%c416, %c0_28] : memref<512x512xbf16, #tpu.memory_space<vmem>>, vector<16x512xbf16>
    tpu.vector_store %arg6[%c416, %c0_28], %188 {strides = array<i32>} : memref<512x512xbf16, #tpu.memory_space<vmem>>, vector<16x512xbf16>,
    %190 = vector.extract_strided_slice %10 {offsets = [11, 0], sizes = [1, 512], strides = [1, 1]} : vector<16x512xf32> to vector<1x512xf32>
    %191 = vector.shape_cast %190 : vector<1x512xf32> to vector<1x512xf32>
    %192 = vector.broadcast %191 : vector<1x512xf32> to vector<16x512xf32>
    %193 = vector.extract_strided_slice %11 {offsets = [11, 0], sizes = [1, 512], strides = [1, 1]} : vector<16x512xf32> to vector<1x512xf32>
    %194 = vector.shape_cast %193 : vector<1x512xf32> to vector<1x512xf32>
    %195 = vector.broadcast %194 : vector<1x512xf32> to vector<16x512xf32>
    %196 = arith.mulf %192, %12 : vector<16x512xf32>
    %197 = arith.mulf %195, %13 : vector<16x512xf32>
    %198 = arith.subf %196, %197 : vector<16x512xf32>
    %199 = arith.mulf %195, %12 : vector<16x512xf32>
    %200 = arith.mulf %192, %13 : vector<16x512xf32>
    %201 = arith.addf %199, %200 : vector<16x512xf32>
    %202 = arith.truncf %198 : vector<16x512xf32> to vector<16x512xbf16>
    %c176 = arith.constant 176 : index
    %c0_29 = arith.constant 0 : index
    %203 = vector.load %arg6[%c176, %c0_29] : memref<512x512xbf16, #tpu.memory_space<vmem>>, vector<16x512xbf16>
    tpu.vector_store %arg6[%c176, %c0_29], %202 {strides = array<i32>} : memref<512x512xbf16, #tpu.memory_space<vmem>>, vector<16x512xbf16>,
    %204 = arith.truncf %201 : vector<16x512xf32> to vector<16x512xbf16>
    %c432 = arith.constant 432 : index
    %c0_30 = arith.constant 0 : index
    %205 = vector.load %arg6[%c432, %c0_30] : memref<512x512xbf16, #tpu.memory_space<vmem>>, vector<16x512xbf16>
    tpu.vector_store %arg6[%c432, %c0_30], %204 {strides = array<i32>} : memref<512x512xbf16, #tpu.memory_space<vmem>>, vector<16x512xbf16>,
    %206 = vector.extract_strided_slice %10 {offsets = [12, 0], sizes = [1, 512], strides = [1, 1]} : vector<16x512xf32> to vector<1x512xf32>
    %207 = vector.shape_cast %206 : vector<1x512xf32> to vector<1x512xf32>
    %208 = vector.broadcast %207 : vector<1x512xf32> to vector<16x512xf32>
    %209 = vector.extract_strided_slice %11 {offsets = [12, 0], sizes = [1, 512], strides = [1, 1]} : vector<16x512xf32> to vector<1x512xf32>
    %210 = vector.shape_cast %209 : vector<1x512xf32> to vector<1x512xf32>
    %211 = vector.broadcast %210 : vector<1x512xf32> to vector<16x512xf32>
    %212 = arith.mulf %208, %12 : vector<16x512xf32>
    %213 = arith.mulf %211, %13 : vector<16x512xf32>
    %214 = arith.subf %212, %213 : vector<16x512xf32>
    %215 = arith.mulf %211, %12 : vector<16x512xf32>
    %216 = arith.mulf %208, %13 : vector<16x512xf32>
    %217 = arith.addf %215, %216 : vector<16x512xf32>
    %218 = arith.truncf %214 : vector<16x512xf32> to vector<16x512xbf16>
    %c192 = arith.constant 192 : index
    %c0_31 = arith.constant 0 : index
    %219 = vector.load %arg6[%c192, %c0_31] : memref<512x512xbf16, #tpu.memory_space<vmem>>, vector<16x512xbf16>
    tpu.vector_store %arg6[%c192, %c0_31], %218 {strides = array<i32>} : memref<512x512xbf16, #tpu.memory_space<vmem>>, vector<16x512xbf16>,
    %220 = arith.truncf %217 : vector<16x512xf32> to vector<16x512xbf16>
    %c448 = arith.constant 448 : index
    %c0_32 = arith.constant 0 : index
    %221 = vector.load %arg6[%c448, %c0_32] : memref<512x512xbf16, #tpu.memory_space<vmem>>, vector<16x512xbf16>
    tpu.vector_store %arg6[%c448, %c0_32], %220 {strides = array<i32>} : memref<512x512xbf16, #tpu.memory_space<vmem>>, vector<16x512xbf16>,
    %222 = vector.extract_strided_slice %10 {offsets = [13, 0], sizes = [1, 512], strides = [1, 1]} : vector<16x512xf32> to vector<1x512xf32>
    %223 = vector.shape_cast %222 : vector<1x512xf32> to vector<1x512xf32>
    %224 = vector.broadcast %223 : vector<1x512xf32> to vector<16x512xf32>
    %225 = vector.extract_strided_slice %11 {offsets = [13, 0], sizes = [1, 512], strides = [1, 1]} : vector<16x512xf32> to vector<1x512xf32>
    %226 = vector.shape_cast %225 : vector<1x512xf32> to vector<1x512xf32>
    %227 = vector.broadcast %226 : vector<1x512xf32> to vector<16x512xf32>
    %228 = arith.mulf %224, %12 : vector<16x512xf32>
    %229 = arith.mulf %227, %13 : vector<16x512xf32>
    %230 = arith.subf %228, %229 : vector<16x512xf32>
    %231 = arith.mulf %227, %12 : vector<16x512xf32>
    %232 = arith.mulf %224, %13 : vector<16x512xf32>
    %233 = arith.addf %231, %232 : vector<16x512xf32>
    %234 = arith.truncf %230 : vector<16x512xf32> to vector<16x512xbf16>
    %c208 = arith.constant 208 : index
    %c0_33 = arith.constant 0 : index
    %235 = vector.load %arg6[%c208, %c0_33] : memref<512x512xbf16, #tpu.memory_space<vmem>>, vector<16x512xbf16>
    tpu.vector_store %arg6[%c208, %c0_33], %234 {strides = array<i32>} : memref<512x512xbf16, #tpu.memory_space<vmem>>, vector<16x512xbf16>,
    %236 = arith.truncf %233 : vector<16x512xf32> to vector<16x512xbf16>
    %c464 = arith.constant 464 : index
    %c0_34 = arith.constant 0 : index
    %237 = vector.load %arg6[%c464, %c0_34] : memref<512x512xbf16, #tpu.memory_space<vmem>>, vector<16x512xbf16>
    tpu.vector_store %arg6[%c464, %c0_34], %236 {strides = array<i32>} : memref<512x512xbf16, #tpu.memory_space<vmem>>, vector<16x512xbf16>,
    %238 = vector.extract_strided_slice %10 {offsets = [14, 0], sizes = [1, 512], strides = [1, 1]} : vector<16x512xf32> to vector<1x512xf32>
    %239 = vector.shape_cast %238 : vector<1x512xf32> to vector<1x512xf32>
    %240 = vector.broadcast %239 : vector<1x512xf32> to vector<16x512xf32>
    %241 = vector.extract_strided_slice %11 {offsets = [14, 0], sizes = [1, 512], strides = [1, 1]} : vector<16x512xf32> to vector<1x512xf32>
    %242 = vector.shape_cast %241 : vector<1x512xf32> to vector<1x512xf32>
    %243 = vector.broadcast %242 : vector<1x512xf32> to vector<16x512xf32>
    %244 = arith.mulf %240, %12 : vector<16x512xf32>
    %245 = arith.mulf %243, %13 : vector<16x512xf32>
    %246 = arith.subf %244, %245 : vector<16x512xf32>
    %247 = arith.mulf %243, %12 : vector<16x512xf32>
    %248 = arith.mulf %240, %13 : vector<16x512xf32>
    %249 = arith.addf %247, %248 : vector<16x512xf32>
    %250 = arith.truncf %246 : vector<16x512xf32> to vector<16x512xbf16>
    %c224 = arith.constant 224 : index
    %c0_35 = arith.constant 0 : index
    %251 = vector.load %arg6[%c224, %c0_35] : memref<512x512xbf16, #tpu.memory_space<vmem>>, vector<16x512xbf16>
    tpu.vector_store %arg6[%c224, %c0_35], %250 {strides = array<i32>} : memref<512x512xbf16, #tpu.memory_space<vmem>>, vector<16x512xbf16>,
    %252 = arith.truncf %249 : vector<16x512xf32> to vector<16x512xbf16>
    %c480 = arith.constant 480 : index
    %c0_36 = arith.constant 0 : index
    %253 = vector.load %arg6[%c480, %c0_36] : memref<512x512xbf16, #tpu.memory_space<vmem>>, vector<16x512xbf16>
    tpu.vector_store %arg6[%c480, %c0_36], %252 {strides = array<i32>} : memref<512x512xbf16, #tpu.memory_space<vmem>>, vector<16x512xbf16>,
    %254 = vector.extract_strided_slice %10 {offsets = [15, 0], sizes = [1, 512], strides = [1, 1]} : vector<16x512xf32> to vector<1x512xf32>
    %255 = vector.shape_cast %254 : vector<1x512xf32> to vector<1x512xf32>
    %256 = vector.broadcast %255 : vector<1x512xf32> to vector<16x512xf32>
    %257 = vector.extract_strided_slice %11 {offsets = [15, 0], sizes = [1, 512], strides = [1, 1]} : vector<16x512xf32> to vector<1x512xf32>
    %258 = vector.shape_cast %257 : vector<1x512xf32> to vector<1x512xf32>
    %259 = vector.broadcast %258 : vector<1x512xf32> to vector<16x512xf32>
    %260 = arith.mulf %256, %12 : vector<16x512xf32>
    %261 = arith.mulf %259, %13 : vector<16x512xf32>
    %262 = arith.subf %260, %261 : vector<16x512xf32>
    %263 = arith.mulf %259, %12 : vector<16x512xf32>
    %264 = arith.mulf %256, %13 : vector<16x512xf32>
    %265 = arith.addf %263, %264 : vector<16x512xf32>
    %266 = arith.truncf %262 : vector<16x512xf32> to vector<16x512xbf16>
    %c240 = arith.constant 240 : index
    %c0_37 = arith.constant 0 : index
    %267 = vector.load %arg6[%c240, %c0_37] : memref<512x512xbf16, #tpu.memory_space<vmem>>, vector<16x512xbf16>
    tpu.vector_store %arg6[%c240, %c0_37], %266 {strides = array<i32>} : memref<512x512xbf16, #tpu.memory_space<vmem>>, vector<16x512xbf16>,
    %268 = arith.truncf %265 : vector<16x512xf32> to vector<16x512xbf16>
    %c496 = arith.constant 496 : index
    %c0_38 = arith.constant 0 : index
    %269 = vector.load %arg6[%c496, %c0_38] : memref<512x512xbf16, #tpu.memory_space<vmem>>, vector<16x512xbf16>
    tpu.vector_store %arg6[%c496, %c0_38], %268 {strides = array<i32>} : memref<512x512xbf16, #tpu.memory_space<vmem>>, vector<16x512xbf16>,
    %c0_39 = arith.constant 0 : index
    %c0_40 = arith.constant 0 : index
    %270 = vector.load %arg4[%c0_39, %c0_40] : memref<8x512xbf16, #tpu.memory_space<vmem>>, vector<8x512xbf16>
    %c0_41 = arith.constant 0 : index
    %c0_42 = arith.constant 0 : index
    %271 = vector.load %arg6[%c0_41, %c0_42] : memref<512x512xbf16, #tpu.memory_space<vmem>>, vector<512x512xbf16>
    %cst = arith.constant dense<0.000000e+00> : vector<8x512xf32>
    %272 = tpu.matmul %270, %271, %cst {dimension_numbers = #tpu.dot_dimension_numbers<[1], [0], [0], [1], [0, 0, 1, 1], [], []>} : vector<8x512xbf16>, vector<512x512xbf16>, vector<8x512xf32> -> vector<8x512xf32>
    %c0_43 = arith.constant 0 : index
    %c0_44 = arith.constant 0 : index
    %273 = vector.load %arg5[%c0_43, %c0_44] : memref<8x512xf32, #tpu.memory_space<vmem>>, vector<8x512xf32>
    tpu.vector_store %arg5[%c0_43, %c0_44], %272 {strides = array<i32>} : memref<8x512xf32, #tpu.memory_space<vmem>>, vector<8x512xf32>,
    return
  }
  func.func @transform_0(%arg0: i32) -> (i32, i32) {
    %c0_i32 = arith.constant 0 : i32
    %c0_i32_0 = arith.constant 0 : i32
    return %c0_i32, %arg0 : i32, i32
  }
  func.func @transform_1(%arg0: i32) -> (i32, i32) {
    %c0_i32 = arith.constant 0 : i32
    %c0_i32_0 = arith.constant 0 : i32
    %c0_i32_1 = arith.constant 0 : i32
    return %c0_i32, %c0_i32_0 : i32, i32
  }
  func.func @transform_2(%arg0: i32) -> (i32, i32) {
    %c0_i32 = arith.constant 0 : i32
    %c0_i32_0 = arith.constant 0 : i32
    %c0_i32_1 = arith.constant 0 : i32
    return %c0_i32, %c0_i32_0 : i32, i32
  }
  func.func @transform_3(%arg0: i32) -> (i32, i32) {
    %c0_i32 = arith.constant 0 : i32
    %c0_i32_0 = arith.constant 0 : i32
    %c0_i32_1 = arith.constant 0 : i32
    return %c0_i32, %c0_i32_0 : i32, i32
  }
  func.func @transform_4(%arg0: i32) -> (i32, i32) {
    %c0_i32 = arith.constant 0 : i32
    %c0_i32_0 = arith.constant 0 : i32
    return %c0_i32, %arg0 : i32, i32
  }
}

</mosaic_0001>

<bundles_post_ra>
// kernel: tpu_custom_call.1
= control target key start
LH: loop header
LB: loop body
LE: loop exit
PB: predicated region body
PF: predicated region fallthrough
CT: control target
= control target key end

     0   :  { %9 = vsyncpa [#allocation4], 0  ;;  %s10562_s0 = inlined_call_operand.vmem [shape: f32[2,1024], index: 0, kind: input, shape index: {}]   ;;  %s10563_s1 = inlined_call_operand.vmem [shape: f32[16,1], index: 1, kind: input, shape index: {}]   ;;  %s10564_s2 = inlined_call_operand.vmem [shape: f32[16,1], index: 2, kind: input, shape index: {}]   ;;  %s10565_s3 = inlined_call_operand.vmem [shape: bf16[8,512], index: 3, kind: input, shape index: {}]   ;;  %s10566_s4 = inlined_call_operand.hbm [shape: f32[8,1024], index: 4, kind: output, shape index: {}]  }
   0x1   :  { %11 = vsyncpa [#allocation4 + $0x1], 0  ;;  %s7731_s15 = smov 0   ;;  %s7733_s16 = smov 0  }
   0x2   :  { %s7735_s17 = smov 0   ;;  %s7737_s18 = smov 0  }
   0x3 LB: > { %s7752_s19 = sadd.s32 4294967295, %s7696_s18   ;;  %s6798_s20 = sadd.s32 4294967294, %s7696_s18   ;;  %s7696_s18 = sphi %s7737_s18, %s10769_s18   ;;  %s7692_s17 = sphi %s7735_s17, %s10768_s17   ;;  %s7688_s16 = sphi %s7733_s16, %s10767_s16   ;;  %s7684_s15 = sphi %s7731_s15, %s10766_s15  }
   0x4   : > { %s7756_s21 = sadd.s32 1, %s7696_s18   ;;  %s113_s22 = sadd.s32 1, %s7692_s17 }
   0x5   : > { %s110_s23 = ssub.s32 %s7696_s18, %s7756_s21  ;;  %p123_p0 = scmp.ne.s32.totalorder %s7692_s17, %s7688_s16 }
   0x6   : > { %p111_p1 = scmp.eq.s32.totalorder %s110_s23, 0  ;;  %p124_p2 = scmp.eq.s32.totalorder %s7752_s19, 1 }
   0x7   : > { %p129_p3 = scmp.ne.s32.totalorder %s7688_s16, %s7684_s15  ;;  %p130_p4 = scmp.eq.s32.totalorder %s6798_s20, 1 }
   0x8   : > { %s7767_s24 = scalar_select %p111_p1, %s7692_s17, %s113_s22  }
   0x9   : > { %p7769_p5 = por %p124_p2, %p123_p0  ;;  %p7773_p6 = por %p130_p4, %p129_p3 }
   0xa   : > { %p6801_p7 = scmp.ge.s32.totalorder %s7696_s18, 1  ;;  %p166_p8 = scmp.lt.s32.totalorder %s7696_s18, 3 }
   0xc   : > { %p167_p9 = pnand %p6801_p7, %p166_p8 }
   0xe   : > { %170 = sbr.rel (%p167_p9) target bundleno = 1066 (0x42a), region = 36 }
  0x13   : > { %v244_v0 = vld [vmem:[%s10564_s2 + $0x8] sm:$0xff]  ;;  %v202_v1 = vld [vmem:[%s10563_s1] sm:$0xff]  ;;  %v7698_v2 = vmov 0   ;;  %s6803_s9 = sshll.u32 %s7752_s19, 2  ;;  %v215_v5 = vlaneseq  ;;  %v10587_v50 = vmov 683565275  }
  0x14   : > { %7567 = vset.pattern.permute.xlu1 %v7698_v2  ;;  %7566 = vset.pattern.permute.xlu0 %v7698_v2  ;;  %v203_v3 = vld [vmem:[%s10563_s1 + $0x8] sm:$0xff]  ;;  %v243_v4 = vld [vmem:[%s10564_s2] sm:$0xff]  ;;  %p193_p10 = scmp.lt.s32.totalorder %s6803_s9, 7  ;;  %v10580_v54 = vmov 2475754826   ;;  %s189_s27 = sand.u32 1, %s7688_s16  }
  0x15   : > { %252 = vperm.xlu1 %7567, %v244_v0   ;;  %206 = vperm.xlu0 %7566, %v202_v1   ;;  %v7792_v6 = vshrl.u32 %v215_v5, 7  ;;  %v10578_v56 = vmov 2131351028   ;;  %v10574_v58 = vmov 2102212464   ;;  %s6802_s28 = sshll.u32 %s189_s27, 5 }
  0x16   : > { %s10771_s9 = smov (!%p193_p10, %s6803_s9), 7  ;;  %v10572_v60 = vmov 920167782   ;;  %s191_s29 = scalar_lea.vmem [#allocation3], %s6802_s28 }
  0x17   : > { %s6804_s10 = sshll.u32 %s10771_s9, 1  ;;  %10637 = vst [vmem:[#allocation6_spill] sm:$0xff] %v7792_v6  ;;  %v7800_v7 = vsub.s32 0, %v7792_v6  ;;  %v7803_v8 = vsub.s32 1, %v7792_v6  ;;  %v7806_v9 = vsub.s32 2, %v7792_v6  ;;  %v7809_v10 = vsub.s32 3, %v7792_v6 }
  0x18   : > { %s7797_s13 = scalar_lea.vmem %s10562_s0, %s6804_s10  ;;  %s7327_s30 = sshll.u32 %s7752_s19, 9 }
  0x19   : > { %211 = vperm.xlu1 %7567, %v203_v3   ;;  %247 = vperm.xlu0 %7566, %v243_v4   ;;  %10638 = vst [vmem:[#allocation7_spill] sm:$0xff] %v7800_v7  ;;  %10639 = vst [vmem:[#allocation8_spill] sm:$0xff] %v7803_v8  ;;  %v199_v11 = vld [vmem:[%s7797_s13] ss:$2 sm:$0xf]  ;;  %s6739_s5 = sshll.u32 %s191_s29, 4  ;;  %s10519_s8 = scalar_lea.hbm %s10566_s4, %s7327_s30  ;;  %s10521_s5 = int_to_ptr.vmem [resolvable:$true] %s6739_s5 }
  0x1a   : > { %10640 = vst [vmem:[#allocation9_spill] sm:$0xff] %v7806_v9  ;;  %10641 = vst [vmem:[#allocation10_spill] sm:$0xff] %v7809_v10  ;;  %v7813_v12 = vrot.slane %v199_v11, %v7800_v7  ;;  %v7816_v13 = vrot.slane %v199_v11, %v7803_v8  ;;  %v226_v14 = vrot.slane %v199_v11, %v7806_v9  ;;  %v10570_v3 = vmov 1326507024   ;;  %s6725_s19 = scalar_lea.sflag [#allocation4], %s189_s27  ;;  %s7636_s9 = scalar_lea.vmem %s10521_s5, 512 }
  0x1b   : > { %v230_v15 = vrot.slane %v199_v11, %v7809_v10  ;;  %p7637_p11 = scmp.ne.s32.totalorder %s10521_s5, %s7636_s9  ;;  %s7705_s10 = smov [#allocation3]  }
  0x1c   : > { %s7640_s11 = sshll.u32 %s7705_s10, 4  ;;  %s7641_s11 = int_to_ptr.vmem [resolvable:$false] %s7640_s11 }
  0x1d   : > { %p7638_p12 = pnand %p7637_p11, %p7769_p5  ;;  %s7642_s12 = scalar_lea.vmem %s7641_s11, 1024 }
  0x1e   : > { %p7643_p0 = scmp.lt.s32.totalorder %s10521_s5, %s7641_s11  ;;  %p7644_p1 = scmp.lt.s32.totalorder %s7642_s12, %s7636_s9 }
  0x1f   : > { %p7639_p13 = pneg %p7638_p12 }
  0x20   : > { %p7645_p2 = por %p7644_p1, %p7643_p0 }
  0x22   : > { %p7646_p3 = pnand %p7645_p2, %p7639_p13 }
  0x90   : > { %v7820_v16 = vpop.permute.xlu1 %252  ;;  %v207_v17 = vpop.permute.xlu0 %206 }
  0x91   : > { %10642 = vst [vmem:[#allocation11_spill] sm:$0xff] %v7820_v16  ;;  %v7823_v18 = vmul.f32 %v7813_v12, %v207_v17  ;;  %v7826_v19 = vmul.f32 %v7816_v13, %v207_v17  ;;  %v7828_v20 = vmul.f32 %v226_v14, %v207_v17  ;;  %v7830_v21 = vmul.f32 %v230_v15, %v207_v17 }
  0x93   : > { %v284_v22 = vand.u32 2147483647, %v7823_v18  ;;  %v287_v23 = vand.u32 2139095040, %v7823_v18  ;;  %v387_v25 = vand.u32 2147483647, %v7826_v19  ;;  %v390_v26 = vand.u32 2139095040, %v7826_v19 }
  0x94   : > { %v7834_v24 = vpop.permute.xlu1 %211  ;;  %v493_v35 = vand.u32 2139095040, %v7828_v20 }
  0x95   : > { %v7839_v27 = vmul.f32 %v226_v14, %v7834_v24  ;;  %v7842_v28 = vmul.f32 %v230_v15, %v7834_v24  ;;  %v288_v29 = vshrl.u32 %v287_v23, 23  ;;  %v391_v30 = vshrl.u32 %v390_v26, 23 }
  0x96   : > { %v291_v31 = vand.u32 8388607, %v284_v22  ;;  %v394_v32 = vand.u32 8388607, %v387_v25  ;;  %v494_v40 = vshrl.u32 %v493_v35, 23 }
  0x97   : > { %10643 = vst [vmem:[#allocation12_spill] sm:$0xff] %v7842_v28  ;;  %v6806_v33 = vadd.s32 4294967169, %v288_v29  ;;  %v6810_v34 = vadd.s32 4294967169, %v391_v30 }
  0x98   : > { %v292_v38 = vor.u32 8388608, %v291_v31  ;;  %v395_v39 = vor.u32 8388608, %v394_v32  ;;  %v6814_v43 = vadd.s32 4294967169, %v494_v40 }
  0x99   : > { %v294_v36 = vadd.s32 1, %v6806_v33  ;;  %v397_v37 = vadd.s32 1, %v6810_v34 }
  0x9a   : > { %v7849_v46 = vshll.u32 %v292_v38, 8  ;;  %v7853_v48 = vshll.u32 %v395_v39, 8  ;;  %v7856_v53 = vadd.s32 1, %v6814_v43 }
  0x9b   : > { %vm295_vm0 = vcmp.gt.s32.totalorder %v294_v36, 0  ;;  %vm398_vm1 = vcmp.gt.s32.totalorder %v397_v37, 0 }
  0x9c   : > { %v296_v41 = vsel %vm295_vm0, %v294_v36, 0  ;;  %v399_v42 = vsel %vm398_vm1, %v397_v37, 0  ;;  %vm501_vm11 = vcmp.gt.s32.totalorder %v7856_v53, 0 }
  0x9d   : > { %v297_v44 = vshrl.u32 %v296_v41, 5  ;;  %v298_v45 = vand.u32 31, %v296_v41  ;;  %v7851_v47 = vshrl.u32 %v399_v42, 5  ;;  %v401_v52 = vand.u32 31, %v399_v42 }
  0x9f   : > { %v299_v49 = vsub.s32 32, %v298_v45  ;;  %v301_v51 = vshll.u32 %v10587_v50, %v298_v45  ;;  %v304_v55 = vshll.u32 %v10580_v54, %v298_v45  ;;  %v307_v57 = vshll.u32 %v10578_v56, %v298_v45 }
  0xa0   : > { %v310_v59 = vshll.u32 %v10574_v58, %v298_v45  ;;  %v313_v61 = vshll.u32 %v10572_v60, %v298_v45  ;;  %vm316_vm2 = vcmp.lt.s32.totalorder %v297_v44, 1  ;;  %vm317_vm3 = vcmp.lt.s32.totalorder %v297_v44, 2 }
  0xa1   : > { %v302_v62 = vshrl.u32 %v10580_v54, %v299_v49  ;;  %v305_v63 = vshrl.u32 %v10578_v56, %v299_v49  ;;  %v308_v0 = vshrl.u32 %v10574_v58, %v299_v49  ;;  %v300_v1 = vshrl.u32 %v10587_v50, %v299_v49 }
  0xa2   : > { %v311_v2 = vshrl.u32 %v10572_v60, %v299_v49  ;;  %v314_v4 = vshrl.u32 %v10570_v3, %v299_v49  ;;  %v402_v15 = vsub.s32 32, %v401_v52  ;;  %vm318_vm4 = vcmp.lt.s32.totalorder %v297_v44, 3 }
  0xa3   : > { %v303_v5 = vor.u32 %v302_v62, %v301_v51  ;;  %v306_v11 = vor.u32 %v305_v63, %v304_v55  ;;  %v309_v14 = vor.u32 %v308_v0, %v307_v57  ;;  %vm319_vm5 = vcmp.lt.s32.totalorder %v297_v44, 4 }
  0xa4   : > { %v312_v17 = vor.u32 %v311_v2, %v310_v59  ;;  %v315_v23 = vor.u32 %v314_v4, %v313_v61  ;;  %v404_v35 = vshll.u32 %v10587_v50, %v401_v52  ;;  %v405_v38 = vshrl.u32 %v10580_v54, %v402_v15 }
  0xa5   : > { %v320_v26 = vsel %vm316_vm2, %v300_v1, %v303_v5  ;;  %v321_v29 = vsel %vm319_vm5, %v309_v14, 2102212464  ;;  %v324_v30 = vsel %vm316_vm2, %v303_v5, %v306_v11  ;;  %v328_v31 = vsel %vm316_vm2, %v306_v11, %v309_v14 }
  0xa6   : > { %v322_v32 = vsel %vm318_vm4, %v306_v11, %v321_v29  ;;  %v325_v33 = vsel %vm319_vm5, %v312_v17, 920167782  ;;  %v329_v34 = vsel %vm319_vm5, %v315_v23, 1326507024  ;;  %v407_v39 = vshll.u32 %v10580_v54, %v401_v52 }
  0xa7   : > { %v326_v36 = vsel %vm318_vm4, %v309_v14, %v325_v33  ;;  %v330_v37 = vsel %vm318_vm4, %v312_v17, %v329_v34  ;;  %v323_v40 = vsel %vm317_vm3, %v320_v26, %v322_v32  ;;  %v408_v43 = vshrl.u32 %v10578_v56, %v402_v15 }
  0xa8   : > { %v327_v41 = vsel %vm317_vm3, %v324_v30, %v326_v36  ;;  %v331_v42 = vsel %vm317_vm3, %v328_v31, %v330_v37  ;;  %v406_v57 = vor.u32 %v405_v38, %v404_v35  ;;  %v410_v61 = vshll.u32 %v10578_v56, %v401_v52 }
  0xa9   : > { %v7879_v45 = vmul.u32.u64.low %v7849_v46, %v331_v42  ;;  %v7880_v49 = vmul.u32.u64.high %v7849_v46, %v331_v42, %v7879_v45  ;;  %v7883_v51 = vmul.u32.u64.low %v7849_v46, %v327_v41  ;;  %v7884_v55 = vmul.u32.u64.high %v7849_v46, %v327_v41, %v7883_v51 }
  0xaa   : > { %v409_v59 = vor.u32 %v408_v43, %v407_v39  ;;  %v411_v62 = vshrl.u32 %v10574_v58, %v402_v15  ;;  %v403_v44 = vshrl.u32 %v10587_v50, %v402_v15  ;;  %v413_v63 = vshll.u32 %v10574_v58, %v401_v52 }
  0xab   : > { %v414_v0 = vshrl.u32 %v10572_v60, %v402_v15  ;;  %v417_v1 = vshrl.u32 %v10570_v3, %v402_v15  ;;  %v339_v2 = vmul.u32 %v7849_v46, %v323_v40  ;;  %v416_v5 = vshll.u32 %v10572_v60, %v401_v52 }
  0xac   : > { %v412_v4 = vor.u32 %v411_v62, %v410_v61  ;;  %vm419_vm6 = vcmp.lt.s32.totalorder %v7851_v47, 1  ;;  %vm341_vm7 = vc.u32 %v7880_v49, %v7883_v51  ;;  %v342_v11 = vadd.s32 1, %v7884_v55 }
  0xad   : > { %v415_v14 = vor.u32 %v414_v0, %v413_v63  ;;  %vm420_vm8 = vcmp.lt.s32.totalorder %v7851_v47, 2  ;;  %v418_v17 = vor.u32 %v417_v1, %v416_v5  ;;  %vm421_vm9 = vcmp.lt.s32.totalorder %v7851_v47, 3 }
  0xae   : > { %vm422_vm10 = vcmp.lt.s32.totalorder %v7851_v47, 4  ;;  %v427_v15 = vsel %vm419_vm6, %v406_v57, %v409_v59  ;;  %v343_v46 = vsel %vm341_vm7, %v342_v11, %v7884_v55  ;;  %v431_v26 = vsel %vm419_vm6, %v409_v59, %v412_v4 }
  0xaf   : > { %v424_v23 = vsel %vm422_vm10, %v412_v4, 2102212464  ;;  %v428_v52 = vsel %vm422_vm10, %v415_v14, 920167782  ;;  %v344_v29 = vadd.s32 %v343_v46, %v339_v2  ;;  %v423_v30 = vsel %vm419_vm6, %v403_v44, %v406_v57 }
  0xb0   : > { %v429_v31 = vsel %vm421_vm9, %v412_v4, %v428_v52  ;;  %v432_v32 = vsel %vm422_vm10, %v418_v17, 1326507024  ;;  %v425_v33 = vsel %vm421_vm9, %v409_v59, %v424_v23  ;;  %v502_v42 = vsel %vm501_vm11, %v7856_v53, 0 }
  0xb1   : > { %v430_v34 = vsel %vm420_vm8, %v427_v15, %v429_v31  ;;  %v433_v35 = vsel %vm421_vm9, %v415_v14, %v432_v32  ;;  %v345_v36 = vadd.s32 536870912, %v344_v29  ;;  %v426_v43 = vsel %vm420_vm8, %v423_v30, %v425_v33 }
  0xb2   : > { %v434_v37 = vsel %vm420_vm8, %v431_v26, %v433_v35  ;;  %v7909_v38 = vmul.u32.u64.low %v7853_v48, %v430_v34  ;;  %v7910_v39 = vmul.u32.u64.high %v7853_v48, %v430_v34, %v7909_v38  ;;  %v504_v45 = vand.u32 31, %v502_v42 }
  0xb3   : > { %v7914_v40 = vmul.u32.u64.low %v7853_v48, %v434_v37  ;;  %v7915_v41 = vmul.u32.u64.high %v7853_v48, %v434_v37, %v7914_v40  ;;  %v7920_v55 = vshrl.u32 %v345_v36, 30  ;;  %v10568_v59 = vand.u32 2147483647, %v7828_v20 }
  0xb4   : > { %v445_v57 = vadd.s32 1, %v7910_v39  ;;  %v442_v61 = vmul.u32 %v7853_v48, %v426_v43  ;;  %v505_v62 = vsub.s32 32, %v504_v45  ;;  %v596_v4 = vand.u32 2139095040, %v7830_v21 }
  0xb5   : > { %vm444_vm12 = vc.u32 %v7915_v41, %v7909_v38  ;;  %v347_v53 = vshll.u32 %v7920_v55, 30  ;;  %v497_v47 = vand.u32 8388607, %v10568_v59  ;;  %v503_v48 = vshrl.u32 %v502_v42, 5 }
  0xb6   : > { %v446_v44 = vsel %vm444_vm12, %v445_v57, %v7910_v39  ;;  %v508_v1 = vshrl.u32 %v10580_v54, %v505_v62  ;;  %v511_v2 = vshrl.u32 %v10578_v56, %v505_v62  ;;  %v507_v5 = vshll.u32 %v10587_v50, %v504_v45 }
  0xb7   : > { %v447_v63 = vadd.s32 %v446_v44, %v442_v61  ;;  %v510_v11 = vshll.u32 %v10580_v54, %v504_v45  ;;  %v514_v14 = vshrl.u32 %v10574_v58, %v505_v62  ;;  %v7937_v17 = vsub.s32 %v344_v29, %v347_v53 }
  0xb8   : > { %v516_v46 = vshll.u32 %v10574_v58, %v504_v45  ;;  %v517_v23 = vshrl.u32 %v10572_v60, %v505_v62  ;;  %v513_v52 = vshll.u32 %v10578_v56, %v504_v45  ;;  %v509_v26 = vor.u32 %v508_v1, %v507_v5 }
  0xb9   : > { %v448_v0 = vadd.s32 536870912, %v447_v63  ;;  %v512_v30 = vor.u32 %v511_v2, %v510_v11  ;;  %v520_v32 = vshrl.u32 %v10570_v3, %v505_v62  ;;  %v498_v33 = vor.u32 8388608, %v497_v47 }
  0xba   : > { %v518_v31 = vor.u32 %v517_v23, %v516_v46  ;;  %v515_v34 = vor.u32 %v514_v14, %v513_v52  ;;  %v597_v35 = vshrl.u32 %v596_v4, 23  ;;  %v350_v36 = vsub.s32 0, %v7937_v17 }
  0xbb   : > { %v7939_v15 = vshrl.u32 %v448_v0, 30  ;;  %v519_v37 = vshll.u32 %v10572_v60, %v504_v45  ;;  %vm525_vm13 = vcmp.lt.s32.totalorder %v503_v48, 4  ;;  %vm522_vm14 = vcmp.lt.s32.totalorder %v503_v48, 1 }
  0xbc   : > { %v531_v39 = vsel %vm525_vm13, %v518_v31, 920167782  ;;  %vm524_vm15 = vcmp.lt.s32.totalorder %v503_v48, 3  ;;  %v530_v42 = vsel %vm522_vm14, %v509_v26, %v512_v30  ;;  %v538_v57 = vshll.u32 %v498_v33, 8 }
  0xbd   : > { %v450_v29 = vshll.u32 %v7939_v15, 30  ;;  %v521_v40 = vor.u32 %v520_v32, %v519_v37  ;;  %v532_v43 = vsel %vm524_vm15, %v515_v34, %v531_v39  ;;  %v6818_v61 = vadd.s32 4294967169, %v597_v35 }
  0xbe   : > { %v6807_v44 = vmin.u32 %v350_v36, %v7937_v17  ;;  %vm523_vm0 = vcmp.lt.s32.totalorder %v503_v48, 2  ;;  %v527_v47 = vsel %vm525_vm13, %v515_v34, 2102212464  ;;  %v506_v45 = vshrl.u32 %v10587_v50, %v505_v62 }
  0xbf   : > { %v7952_v53 = vsub.s32 %v447_v63, %v450_v29  ;;  %v533_v0 = vsel %vm523_vm0, %v530_v42, %v532_v43  ;;  %v534_v1 = vsel %vm522_vm14, %v512_v30, %v515_v34  ;;  %v535_v2 = vsel %vm525_vm13, %v521_v40, 1326507024 }
  0xc0   : > { %v7959_v4 = vmul.u32.u64.low %v538_v57, %v533_v0  ;;  %v7960_v5 = vmul.u32.u64.high %v538_v57, %v533_v0, %v7959_v4  ;;  %v526_v11 = vsel %vm522_vm14, %v506_v45, %v509_v26  ;;  %v528_v63 = vsel %vm524_vm15, %v512_v30, %v527_v47 }
  0xc1   : > { %v536_v14 = vsel %vm524_vm15, %v518_v31, %v535_v2  ;;  %v352_v46 = vclz %v6807_v44  ;;  %v453_v23 = vsub.s32 0, %v7952_v53  ;;  %v603_v52 = vadd.s32 1, %v6818_v61 }
  0xc2   : > { %v537_v62 = vsel %vm523_vm0, %v534_v1, %v536_v14  ;;  %v529_v34 = vsel %vm523_vm0, %v526_v11, %v528_v63  ;;  %v548_v35 = vadd.s32 1, %v7960_v5  ;;  %v10567_v40 = vand.u32 2147483647, %v7830_v21 }
  0xc3   : > { %v7968_v32 = vmul.u32.u64.low %v538_v57, %v537_v62  ;;  %v7969_v33 = vmul.u32.u64.high %v538_v57, %v537_v62, %v7968_v32  ;;  %vm604_vm1 = vcmp.gt.s32.totalorder %v603_v52, 0  ;;  %v6808_v26 = vadd.s32 4294967294, %v352_v46 }
  0xc4   : > { %v605_v36 = vsel %vm604_vm1, %v603_v52, 0  ;;  %v6811_v30 = vmin.u32 %v453_v23, %v7952_v53  ;;  %v545_v29 = vmul.u32 %v538_v57, %v529_v34  ;;  %v7982_v57 = vmul.f32 %v7813_v12, %v7834_v24 }
  0xc5   : > { %vm547_vm2 = vc.u32 %v7969_v33, %v7959_v4  ;;  %v607_v31 = vand.u32 31, %v605_v36  ;;  %vm6809_vm3 = vcmp.lt.s32.totalorder %v6808_v26, 0  ;;  %v600_v0 = vand.u32 8388607, %v10567_v40 }
  0xc6   : > { %v549_v37 = vsel %vm547_vm2, %v548_v35, %v7960_v5  ;;  %v455_v48 = vclz %v6811_v30  ;;  %v7984_v47 = vsel %vm6809_vm3, 0, %v6808_v26  ;;  %v606_v14 = vshrl.u32 %v605_v36, 5 }
  0xc7   : > { %v550_v39 = vadd.s32 %v549_v37, %v545_v29  ;;  %v608_v42 = vsub.s32 32, %v607_v31  ;;  %v610_v2 = vshll.u32 %v10587_v50, %v607_v31  ;;  %v613_v5 = vshll.u32 %v10580_v54, %v607_v31 }
  0xc8   : > { %v6812_v1 = vadd.s32 4294967294, %v455_v48  ;;  %v619_v12 = vshll.u32 %v10574_v58, %v607_v31  ;;  %v616_v52 = vshll.u32 %v10578_v56, %v607_v31  ;;  %v360_v34 = vsub.s32 4294967266, %v7984_v47 }
  0xc9   : > { %v551_v43 = vadd.s32 536870912, %v550_v39  ;;  %v611_v61 = vshrl.u32 %v10580_v54, %v608_v42  ;;  %v614_v44 = vshrl.u32 %v10578_v56, %v608_v42  ;;  %v617_v11 = vshrl.u32 %v10574_v58, %v608_v42 }
  0xca   : > { %v620_v46 = vshrl.u32 %v10572_v60, %v608_v42  ;;  %v623_v32 = vshrl.u32 %v10570_v3, %v608_v42  ;;  %v601_v26 = vor.u32 8388608, %v600_v0  ;;  %v622_v37 = vshll.u32 %v10572_v60, %v607_v31 }
  0xcb   : > { %v7986_v45 = vshrl.u32 %v551_v43, 30  ;;  %v612_v23 = vor.u32 %v611_v61, %v610_v2  ;;  %v615_v62 = vor.u32 %v614_v44, %v613_v5  ;;  %v618_v29 = vor.u32 %v617_v11, %v616_v52 }
  0xcc   : > { %v621_v30 = vor.u32 %v620_v46, %v619_v12  ;;  %v699_v36 = vand.u32 2139095040, %v7982_v57  ;;  %vm6813_vm4 = vcmp.lt.s32.totalorder %v6812_v1, 0  ;;  %vm625_vm5 = vcmp.lt.s32.totalorder %v606_v14, 1 }
  0xcd   : > { %v553_v63 = vshll.u32 %v7986_v45, 30  ;;  %vm628_vm6 = vcmp.lt.s32.totalorder %v606_v14, 4  ;;  %v624_v43 = vor.u32 %v623_v32, %v622_v37  ;;  %v633_v61 = vsel %vm625_vm5, %v612_v23, %v615_v62 }
  0xce   : > { %v634_v44 = vsel %vm628_vm6, %v621_v30, 920167782  ;;  %v361_v2 = vadd.s32 127, %v360_v34  ;;  %vm627_vm7 = vcmp.lt.s32.totalorder %v606_v14, 3  ;;  %v458_v0 = vsel %vm6813_vm4, 0, %v6812_v1 }
  0xcf   : > { %v7999_v35 = vsub.s32 %v550_v39, %v553_v63  ;;  %v641_v39 = vshll.u32 %v601_v26, 8  ;;  %vm626_vm8 = vcmp.lt.s32.totalorder %v606_v14, 2  ;;  %v635_v5 = vsel %vm627_vm7, %v618_v29, %v634_v44 }
  0xd0   : > { %v700_v31 = vshrl.u32 %v699_v36, 23  ;;  %v630_v63 = vsel %vm628_vm6, %v618_v29, 2102212464  ;;  %v636_v12 = vsel %vm626_vm8, %v633_v61, %v635_v5  ;;  %v637_v46 = vsel %vm625_vm5, %v615_v62, %v618_v29 }
  0xd1   : > { %v556_v48 = vsub.s32 0, %v7999_v35  ;;  %v609_v52 = vshrl.u32 %v10587_v50, %v608_v42  ;;  %v638_v32 = vsel %vm628_vm6, %v624_v43, 1326507024  ;;  %v340_v1 = vadd.s32 %v7883_v51, %v7880_v49 }
  0xd2   : > { %v8013_v34 = vmul.u32.u64.low %v641_v39, %v636_v12  ;;  %v8014_v37 = vmul.u32.u64.high %v641_v39, %v636_v12, %v8013_v34  ;;  %v356_v26 = vsub.s32 32, %v7984_v47  ;;  %v362_v36 = vshll.u32 %v361_v2, 23 }
  0xd3   : > { %v6815_v11 = vmin.u32 %v556_v48, %v7999_v35  ;;  %v639_v48 = vsel %vm627_vm7, %v621_v30, %v638_v32  ;;  %v629_v61 = vsel %vm625_vm5, %v609_v52, %v612_v23  ;;  %v631_v29 = vsel %vm627_vm7, %v615_v62, %v630_v63 }
  0xd4   : > { %v640_v42 = vsel %vm626_vm8, %v637_v46, %v639_v48  ;;  %v6822_v44 = vadd.s32 4294967169, %v700_v31  ;;  %v463_v43 = vsub.s32 4294967266, %v458_v0  ;;  %v358_v59 = vshrl.u32 %v340_v1, %v356_v26 }
  0xd5   : > { %v558_v5 = vclz %v6815_v11  ;;  %v8024_v12 = vmul.u32.u64.low %v641_v39, %v640_v42  ;;  %v8025_v40 = vmul.u32.u64.high %v641_v39, %v640_v42, %v8024_v12  ;;  %v632_v49 = vsel %vm626_vm8, %v629_v61, %v631_v29 }
  0xd6   : > { %v651_v51 = vadd.s32 1, %v8014_v37  ;;  %v357_v30 = vshll.u32 %v7937_v17, %v7984_v47  ;;  %v706_v2 = vadd.s32 1, %v6822_v44  ;;  %v363_v23 = vor.u32 4788187, %v362_v36 }
  0xd7   : > { %v459_v52 = vsub.s32 32, %v458_v0  ;;  %v464_v62 = vadd.s32 127, %v463_v43  ;;  %v6816_v63 = vadd.s32 4294967294, %v558_v5  ;;  %v648_v46 = vmul.u32 %v641_v39, %v632_v49 }
  0xd8   : > { %vm650_vm9 = vc.u32 %v8025_v40, %v8013_v34  ;;  %v10569_v31 = vand.u32 2147483647, %v7982_v57  ;;  %vm707_vm10 = vcmp.gt.s32.totalorder %v706_v2, 0  ;;  %v359_v11 = vor.u32 %v358_v59, %v357_v30 }
  0xd9   : > { %v443_v14 = vadd.s32 %v7909_v38, %v7915_v41  ;;  %v652_v32 = vsel %vm650_vm9, %v651_v51, %v8014_v37  ;;  %v708_v1 = vsel %vm707_vm10, %v706_v2, 0  ;;  %v364_v26 = vand.u32 2147483647, %v363_v23 }
  0xda   : > { %v653_v17 = vadd.s32 %v652_v32, %v648_v46  ;;  %v710_v47 = vand.u32 31, %v708_v1  ;;  %v465_v48 = vshll.u32 %v464_v62, 23  ;;  %vm6817_vm11 = vcmp.lt.s32.totalorder %v6816_v63, 0 }
  0xdb   : > { %v461_v36 = vshrl.u32 %v443_v14, %v459_v52  ;;  %v703_v61 = vand.u32 8388607, %v10569_v31  ;;  %v8041_v59 = vmul.f32 %v7816_v13, %v7834_v24  ;;  %v366_v42 = vcvt.s32.f32 %v359_v11 }
  0xdc   : > { %v654_v39 = vadd.s32 536870912, %v653_v17  ;;  %v711_v29 = vsub.s32 32, %v710_v47  ;;  %v460_v38 = vshll.u32 %v7952_v53, %v458_v0  ;;  %v8044_v41 = vsel %vm6817_vm11, 0, %v6816_v63 }
  0xdd   : > { %v367_v44 = vmul.f32 %v366_v42, %v364_v26  ;;  %v466_v5 = vor.u32 4788187, %v465_v48  ;;  %v704_v51 = vor.u32 8388608, %v703_v61  ;;  %v566_v24 = vsub.s32 4294967266, %v8044_v41 }
  0xde   : > { %v8046_v37 = vshrl.u32 %v654_v39, 30  ;;  %v462_v43 = vor.u32 %v461_v36, %v460_v38  ;;  %v714_v12 = vshrl.u32 %v10580_v54, %v711_v29  ;;  %v717_v30 = vshrl.u32 %v10578_v56, %v711_v29 }
  0xdf   : > { %v720_v13 = vshrl.u32 %v10574_v58, %v711_v29  ;;  %v713_v53 = vshll.u32 %v10587_v50, %v710_v47  ;;  %v716_v0 = vshll.u32 %v10580_v54, %v710_v47  ;;  %v802_v2 = vand.u32 2139095040, %v8041_v59 }
  0xe0   : > { %v656_v49 = vshll.u32 %v8046_v37, 30  ;;  %v719_v52 = vshll.u32 %v10578_v56, %v710_v47  ;;  %v722_v62 = vshll.u32 %v10574_v58, %v710_v47  ;;  %v723_v63 = vshrl.u32 %v10572_v60, %v711_v29 }
  0xe1   : > { %v709_v46 = vshrl.u32 %v708_v1, 5  ;;  %v715_v11 = vor.u32 %v714_v12, %v713_v53  ;;  %v725_v14 = vshll.u32 %v10572_v60, %v710_v47  ;;  %v726_v32 = vshrl.u32 %v10570_v3, %v711_v29 }
  0xe2   : > { %v8056_v23 = vsub.s32 %v653_v17, %v656_v49  ;;  %v718_v36 = vor.u32 %v717_v30, %v716_v0  ;;  %v721_v48 = vor.u32 %v720_v13, %v719_v52  ;;  %v724_v39 = vor.u32 %v723_v63, %v722_v62 }
  0xe3   : > { %vm286_vm12 = vcmp.lt.s32.totalorder %v7823_v18, 0  ;;  %v368_v17 = vxor.u32 2147483648, %v367_v44  ;;  %v467_v61 = vand.u32 2147483647, %v466_v5  ;;  %v469_v42 = vcvt.s32.f32 %v462_v43 }
  0xe4   : > { %v659_v26 = vsub.s32 0, %v8056_v23  ;;  %v727_v38 = vor.u32 %v726_v32, %v725_v14  ;;  %v562_v49 = vsub.s32 32, %v8044_v41  ;;  %v567_v31 = vadd.s32 127, %v566_v24 }
  0xe5   : > { %v744_v1 = vshll.u32 %v704_v51, 8  ;;  %v803_v12 = vshrl.u32 %v802_v2, 23  ;;  %v712_v53 = vshrl.u32 %v10587_v50, %v711_v29  ;;  %vm728_vm13 = vcmp.lt.s32.totalorder %v709_v46, 1 }
  0xe6   : > { %v6819_v47 = vmin.u32 %v659_v26, %v8056_v23  ;;  %vm731_vm14 = vcmp.lt.s32.totalorder %v709_v46, 4  ;;  %vm730_vm15 = vcmp.lt.s32.totalorder %v709_v46, 3  ;;  %v736_v13 = vsel %vm728_vm13, %v715_v11, %v718_v36 }
  0xe7   : > { %v733_v30 = vsel %vm731_vm14, %v721_v48, 2102212464  ;;  %v737_v0 = vsel %vm731_vm14, %v724_v39, 920167782  ;;  %vm729_vm0 = vcmp.lt.s32.totalorder %v709_v46, 2  ;;  %v740_v5 = vsel %vm728_vm13, %v718_v36, %v721_v48 }
  0xe8   : > { %v738_v52 = vsel %vm730_vm15, %v721_v48, %v737_v0  ;;  %v741_v43 = vsel %vm731_vm14, %v727_v38, 1326507024  ;;  %v732_v62 = vsel %vm728_vm13, %v712_v53, %v715_v11  ;;  %v734_v63 = vsel %vm730_vm15, %v718_v36, %v733_v30 }
  0xe9   : > { %v739_v24 = vsel %vm729_vm0, %v736_v13, %v738_v52  ;;  %v742_v51 = vsel %vm730_vm15, %v724_v39, %v741_v43  ;;  %v661_v2 = vclz %v6819_v47  ;;  %v470_v26 = vmul.f32 %v469_v42, %v467_v61 }
  0xea   : > { %v743_v14 = vsel %vm729_vm0, %v740_v5, %v742_v51  ;;  %v8070_v32 = vmul.u32.u64.low %v744_v1, %v739_v24  ;;  %v8071_v29 = vmul.u32.u64.high %v744_v1, %v739_v24, %v8070_v32  ;;  %v6826_v58 = vadd.s32 4294967169, %v803_v12 }
  0xeb   : > { %v8074_v3 = vmul.u32.u64.low %v744_v1, %v743_v14  ;;  %v8075_v60 = vmul.u32.u64.high %v744_v1, %v743_v14, %v8074_v3  ;;  %v370_v48 = vsub.s32 4, %v7920_v55  ;;  %vm389_vm1 = vcmp.lt.s32.totalorder %v7826_v19, 0 }
  0xec   : > { %v546_v11 = vadd.s32 %v7959_v4, %v7969_v33  ;;  %v735_v36 = vsel %vm729_vm0, %v732_v62, %v734_v63  ;;  %vm8084_vm2 = vcmp.le.f32.partialorder %v284_v22, 0.7853982  ;;  %v369_v61 = vsel %vm286_vm12, %v368_v17, %v367_v44 }
  0xed   : > { %v473_v3 = vsub.s32 4, %v7939_v15  ;;  %v809_v42 = vadd.s32 1, %v6826_v58  ;;  %v568_v12 = vshll.u32 %v567_v31, 23  ;;  %v6820_v47 = vadd.s32 4294967294, %v661_v2 }
  0xee   : > { %v564_v38 = vshrl.u32 %v546_v11, %v562_v49  ;;  %v754_v53 = vadd.s32 1, %v8071_v29  ;;  %v471_v4 = vxor.u32 2147483648, %v470_v26  ;;  %v751_v33 = vmul.u32 %v744_v1, %v735_v36 }
  0xef   : > { %vm753_vm3 = vc.u32 %v8075_v60, %v8070_v32  ;;  %v10577_v22 = vand.u32 2147483647, %v8041_v59  ;;  %v371_v46 = vsel %vm286_vm12, %v370_v48, %v7920_v55  ;;  %v563_v44 = vshll.u32 %v7999_v35, %v8044_v41 }
  0xf0   : > { %v755_v58 = vsel %vm753_vm3, %v754_v53, %v8071_v29  ;;  %vm810_vm4 = vcmp.gt.s32.totalorder %v809_v42, 0  ;;  %v372_v31 = vsel %vm8084_vm2, %v7823_v18, %v369_v61  ;;  %v474_v17 = vsel %vm389_vm1, %v473_v3, %v7939_v15 }
  0xf1   : > { %v756_v49 = vadd.s32 %v755_v58, %v751_v33  ;;  %v811_v1 = vsel %vm810_vm4, %v809_v42, 0  ;;  %v565_v30 = vor.u32 %v564_v38, %v563_v44  ;;  %v569_v13 = vor.u32 4788187, %v568_v12 }
  0xf2   : > { %vm6821_vm5 = vcmp.lt.s32.totalorder %v6820_v47, 0  ;;  %v813_v55 = vand.u32 31, %v811_v1  ;;  %v472_v35 = vsel %vm389_vm1, %v471_v4, %v470_v26  ;;  %v806_v0 = vand.u32 8388607, %v10577_v22 }
  0xf3   : > { %v757_v41 = vadd.s32 536870912, %v756_v49  ;;  %v8113_v52 = vsel %vm8084_vm2, 0, %v371_v46  ;;  %vm388_vm6 = vcmp.le.f32.partialorder %v387_v25, 0.7853982  ;;  %v905_v5 = vand.u32 2139095040, %v7839_v27 }
  0xf4   : > { %v814_v15 = vsub.s32 32, %v813_v55  ;;  %7572 = vcosq.f32 %v372_v31  ;;  %v8118_v43 = vsel %vm388_vm6, 0, %v474_v17  ;;  %v8120_v62 = vsel %vm6821_vm5, 0, %v6820_v47 }
  0xf5   : > { %v8122_v63 = vshrl.u32 %v757_v41, 30  ;;  %7574 = vsinq.f32 %v372_v31  ;;  %v8125_v24 = vsel %vm388_vm6, %v7826_v19, %v472_v35  ;;  %v570_v51 = vand.u32 2147483647, %v569_v13 }
  0xf6   : > { %v572_v2 = vcvt.s32.f32 %v565_v30  ;;  %v807_v29 = vor.u32 8388608, %v806_v0  ;;  %v817_v25 = vshrl.u32 %v10580_v54, %v814_v15  ;;  %v820_v26 = vshrl.u32 %v10578_v56, %v814_v15 }
  0xf7   : > { %v759_v14 = vshll.u32 %v8122_v63, 30  ;;  %v669_v48 = vsub.s32 4294967266, %v8120_v62  ;;  %v816_v11 = vshll.u32 %v10587_v50, %v813_v55  ;;  %v10646_v36 = vmov 2102212464  }
  0xf8   : > { %v823_v39 = vshrl.u32 %v10646_v36, %v814_v15  ;;  %v906_v61 = vshrl.u32 %v905_v5, 23  ;;  %v819_v42 = vshll.u32 %v10580_v54, %v813_v55  ;;  %v822_v38 = vshll.u32 %v10578_v56, %v813_v55 }
  0xf9   : > { %v8133_v3 = vsub.s32 %v756_v49, %v759_v14  ;;  %v10647_v12 = vmov 920167782   ;;  %v812_v53 = vshrl.u32 %v811_v1, 5  ;;  %v825_v4 = vshll.u32 %v10646_v36, %v813_v55 }
  0xfa   : > { %v826_v47 = vshrl.u32 %v10647_v12, %v814_v15  ;;  %v828_v33 = vshll.u32 %v10647_v12, %v813_v55  ;;  %v10648_v46 = vmov 1326507024   ;;  %v818_v31 = vor.u32 %v817_v25, %v816_v11 }
  0xfb   : > { %v829_v44 = vshrl.u32 %v10648_v46, %v814_v15  ;;  %v762_v58 = vsub.s32 0, %v8133_v3  ;;  %v821_v17 = vor.u32 %v820_v26, %v819_v42  ;;  %v824_v30 = vor.u32 %v823_v39, %v822_v38 }
  0xfc   : > { %7576 = vcosq.f32 %v8125_v24  ;;  %v649_v49 = vadd.s32 %v8013_v34, %v8025_v40  ;;  %v827_v13 = vor.u32 %v826_v47, %v825_v4  ;;  %v573_v41 = vmul.f32 %v572_v2, %v570_v51 }
  0xfd   : > { %v830_v35 = vor.u32 %v829_v44, %v828_v33  ;;  %v665_v1 = vsub.s32 32, %v8120_v62  ;;  %v6823_v0 = vmin.u32 %v762_v58, %v8133_v3  ;;  %v847_v55 = vshll.u32 %v807_v29, 8 }
  0xfe   : > { %v670_v5 = vadd.s32 127, %v669_v48  ;;  %vm831_vm7 = vcmp.lt.s32.totalorder %v812_v53, 1  ;;  %vm834_vm8 = vcmp.lt.s32.totalorder %v812_v53, 4  ;;  %v6830_v14 = vadd.s32 4294967169, %v906_v61 }
  0xff   : > { %v764_v25 = vclz %v6823_v0  ;;  %v815_v26 = vshrl.u32 %v10587_v50, %v814_v15  ;;  %v836_v11 = vsel %vm834_vm8, %v824_v30, 2102212464  ;;  %v839_v39 = vsel %vm831_vm7, %v818_v31, %v821_v17 }
 0x100   : > { %vm492_vm9 = vcmp.lt.s32.totalorder %v7828_v20, 0  ;;  %vm833_vm10 = vcmp.lt.s32.totalorder %v812_v53, 3  ;;  %v840_v40 = vsel %vm834_vm8, %v827_v13, 920167782  ;;  %v843_v34 = vsel %vm831_vm7, %v821_v17, %v824_v30 }
 0x101   : > { %v844_v51 = vsel %vm834_vm8, %v830_v35, 1326507024  ;;  %v6824_v2 = vadd.s32 4294967294, %v764_v25  ;;  %vm832_vm11 = vcmp.lt.s32.totalorder %v812_v53, 2  ;;  %v841_v29 = vsel %vm833_vm10, %v824_v30, %v840_v40  ;;  %v8151_v42 = vpop.eup %7572 }
 0x102   : > { %v845_v48 = vsel %vm833_vm10, %v827_v13, %v844_v51  ;;  %v835_v61 = vsel %vm831_vm7, %v815_v26, %v818_v31  ;;  %v837_v38 = vsel %vm833_vm10, %v821_v17, %v836_v11  ;;  %v842_v15 = vsel %vm832_vm11, %v839_v39, %v841_v29  ;;  %v8156_v4 = vpop.eup %7574 }
 0x103   : > { %v846_v47 = vsel %vm832_vm11, %v843_v34, %v845_v48  ;;  %vm6825_vm12 = vcmp.lt.s32.totalorder %v6824_v2, 0  ;;  %v912_v58 = vadd.s32 1, %v6830_v14  ;;  %v667_v35 = vshrl.u32 %v649_v49, %v665_v1 }
 0x104   : > { %v8158_v33 = vmul.u32.u64.low %v847_v55, %v846_v47  ;;  %v8159_v44 = vmul.u32.u64.high %v847_v55, %v846_v47, %v8158_v33  ;;  %v767_v0 = vsel %vm6825_vm12, 0, %v6824_v2  ;;  %v574_v25 = vxor.u32 2147483648, %v573_v41 }
 0x105   : > { %v8161_v30 = vmul.u32.u64.low %v847_v55, %v842_v15  ;;  %v8162_v13 = vmul.u32.u64.high %v847_v55, %v842_v15, %v8161_v30  ;;  %v576_v31 = vsub.s32 4, %v7986_v45  ;;  %v671_v17 = vshll.u32 %v670_v5, 23 }
 0x106   : > { %vm913_vm13 = vcmp.gt.s32.totalorder %v912_v58, 0  ;;  %v666_v26 = vshll.u32 %v8056_v23, %v8120_v62  ;;  %v838_v11 = vsel %vm832_vm11, %v835_v61, %v837_v38  ;;  %v10576_v39 = vand.u32 2147483647, %v7839_v27 }
 0x107   : > { %v914_v40 = vsel %vm913_vm13, %v912_v58, 0  ;;  %v8171_v49 = vand.u32 3, %v8113_v52  ;;  %v10649_v1 = vand.u32 2147483647, %v7828_v20  ;;  %v772_v34 = vsub.s32 4294967266, %v767_v0 }
 0x108   : > { %vm856_vm15 = vc.u32 %v8159_v44, %v8161_v30  ;;  %v8182_v23 = vand.u32 3, %v8118_v43  ;;  %v668_v62 = vor.u32 %v667_v35, %v666_v26  ;;  %v857_v53 = vadd.s32 1, %v8162_v13 }
 0x109   : > { %vm8175_vm14 = vcmp.le.f32.partialorder %v10649_v1, 0.7853982  ;;  %v916_v5 = vand.u32 31, %v914_v40  ;;  %v8185_v51 = vpop.eup %7576  ;;  %v575_v2 = vsel %vm492_vm9, %v574_v25, %v573_v41  ;;  %v672_v29 = vor.u32 4788187, %v671_v17 }
 0x10a   : > { %v768_v48 = vsub.s32 32, %v767_v0  ;;  %v854_v61 = vmul.u32 %v847_v55, %v838_v11  ;;  %v8192_v38 = vsel %vm492_vm9, %v576_v31, %v7986_v45  ;;  %v858_v15 = vsel %vm856_vm15, %v857_v53, %v8162_v13 }
 0x10b   : > { %v909_v47 = vand.u32 8388607, %v10576_v39  ;;  %v917_v33 = vsub.s32 32, %v916_v5  ;;  %7578 = vsinq.f32 %v8125_v24  ;;  %v752_v58 = vadd.s32 %v8070_v32, %v8075_v60 }
 0x10c   : > { %v773_v41 = vadd.s32 127, %v772_v34  ;;  %v859_v35 = vadd.s32 %v858_v15, %v854_v61  ;;  %v10586_v55 = vxor.u32 2147483648, %v8156_v4  ;;  %v10585_v25 = vxor.u32 2147483648, %v8151_v42 }
 0x10d   : > { %v8205_v45 = vsel %vm8175_vm14, %v7828_v20, %v575_v2  ;;  %v675_v13 = vcvt.s32.f32 %v668_v62  ;;  %v673_v31 = vand.u32 2147483647, %v672_v29  ;;  %v770_v17 = vshrl.u32 %v752_v58, %v768_v48 }
 0x10e   : > { %v860_v26 = vadd.s32 536870912, %v859_v35  ;;  %v920_v24 = vshrl.u32 %v10580_v54, %v917_v33  ;;  %v769_v11 = vshll.u32 %v8133_v3, %v767_v0  ;;  %v910_v60 = vor.u32 8388608, %v909_v47 }
 0x10f   : > { %v923_v32 = vshrl.u32 %v10578_v56, %v917_v33  ;;  %v926_v1 = vshrl.u32 %v10646_v36, %v917_v33  ;;  %v774_v34 = vshll.u32 %v773_v41, 23  ;;  %v8213_v61 = vshrl.u32 %v914_v40, 5 }
 0x110   : > { %v8211_v53 = vshrl.u32 %v860_v26, 30  ;;  %v919_v2 = vshll.u32 %v10587_v50, %v916_v5  ;;  %v922_v62 = vshll.u32 %v10580_v54, %v916_v5  ;;  %v925_v29 = vshll.u32 %v10578_v56, %v916_v5 }
 0x111   : > { %v928_v48 = vshll.u32 %v10646_v36, %v916_v5  ;;  %v929_v3 = vshrl.u32 %v10647_v12, %v917_v33  ;;  %v771_v0 = vor.u32 %v770_v17, %v769_v11  ;;  %v932_v58 = vshrl.u32 %v10648_v46, %v917_v33 }
 0x112   : > { %v862_v15 = vshll.u32 %v8211_v53, 30  ;;  %v921_v47 = vor.u32 %v920_v24, %v919_v2  ;;  %v924_v41 = vor.u32 %v923_v32, %v922_v62  ;;  %v927_v26 = vor.u32 %v926_v1, %v925_v29 }
 0x113   : > { %v930_v40 = vor.u32 %v929_v3, %v928_v48  ;;  %v931_v39 = vshll.u32 %v10647_v12, %v916_v5  ;;  %vm382_vm0 = vcmp.eq.s32.totalorder %v8171_v49, 2  ;;  %v10582_v22 = vxor.u32 2147483648, %v8185_v51 }
 0x114   : > { %7580 = vcosq.f32 %v8205_v45  ;;  %v775_v56 = vor.u32 4788187, %v774_v34  ;;  %v8226_v54 = vsub.s32 %v859_v35, %v862_v15  ;;  %vm379_vm1 = vcmp.eq.s32.totalorder %v8171_v49, 0 }
 0x115   : > { %v676_v17 = vmul.f32 %v675_v13, %v673_v31  ;;  %v933_v24 = vor.u32 %v932_v58, %v931_v39  ;;  %v8229_v11 = vshll.u32 %v910_v60, 8  ;;  %v1008_v32 = vand.u32 2139095040, %v7842_v28 }
 0x116   : > { %v778_v1 = vcvt.s32.f32 %v771_v0  ;;  %v865_v5 = vsub.s32 0, %v8226_v54  ;;  %vm934_vm2 = vcmp.lt.s32.totalorder %v8213_v61, 1  ;;  %vm937_vm3 = vcmp.lt.s32.totalorder %v8213_v61, 4 }
 0x117   : > { %vm485_vm4 = vcmp.eq.s32.totalorder %v8182_v23, 2  ;;  %vm595_vm5 = vcmp.lt.s32.totalorder %v7830_v21, 0  ;;  %v918_v35 = vshrl.u32 %v10587_v50, %v917_v33  ;;  %v939_v34 = vsel %vm937_vm3, %v927_v26, 2102212464 }
 0x118   : > { %v942_v13 = vsel %vm934_vm2, %v921_v47, %v924_v41  ;;  %v943_v39 = vsel %vm937_vm3, %v930_v40, 920167782  ;;  %v776_v31 = vand.u32 2147483647, %v775_v56  ;;  %v6827_v60 = vmin.u32 %v865_v5, %v8226_v54  ;;  %v8241_v2 = vpop.eup %7578 }
 0x119   : > { %vm935_vm6 = vcmp.lt.s32.totalorder %v8213_v61, 2  ;;  %vm936_vm7 = vcmp.lt.s32.totalorder %v8213_v61, 3  ;;  %v938_v62 = vsel %vm934_vm2, %v918_v35, %v921_v47  ;;  %v946_v48 = vsel %vm934_vm2, %v924_v41, %v927_v26 }
 0x11a   : > { %v944_v29 = vsel %vm936_vm7, %v927_v26, %v943_v39  ;;  %v947_v3 = vsel %vm937_vm3, %v933_v24, 1326507024  ;;  %vm482_vm8 = vcmp.eq.s32.totalorder %v8182_v23, 0  ;;  %v867_v0 = vclz %v6827_v60 }
 0x11b   : > { %v940_v33 = vsel %vm936_vm7, %v924_v41, %v939_v34  ;;  %v945_v15 = vsel %vm935_vm6, %v942_v13, %v944_v29  ;;  %v948_v56 = vsel %vm936_vm7, %v930_v40, %v947_v3  ;;  %v10652_v58 = vand.u32 2147483647, %v7830_v21 }
 0x11c   : > { %v949_v47 = vsel %vm935_vm6, %v946_v48, %v948_v56  ;;  %v8255_v26 = vmul.u32.u64.low %v8229_v11, %v945_v15  ;;  %v8256_v24 = vmul.u32.u64.high %v8229_v11, %v945_v15, %v8255_v26  ;;  %v1009_v35 = vshrl.u32 %v1008_v32, 23 }
 0x11d   : > { %vm8248_vm9 = vcmp.le.f32.partialorder %v10652_v58, 0.7853982  ;;  %v677_v41 = vxor.u32 2147483648, %v676_v17  ;;  %vm698_vm10 = vcmp.lt.s32.totalorder %v7982_v57, 0  ;;  %v6828_v34 = vadd.s32 4294967294, %v867_v0 }
 0x11e   : > { %v8261_v40 = vmul.u32.u64.low %v8229_v11, %v949_v47  ;;  %v8262_v13 = vmul.u32.u64.high %v8229_v11, %v949_v47, %v8261_v40  ;;  %vm378_vm11 = vcmp.lt.s32.totalorder %v8171_v49, 2  ;;  %v384_v39 = vsel %vm382_vm0, %v10585_v25, %v8156_v4 }
 0x11f   : > { %vm481_vm12 = vcmp.lt.s32.totalorder %v8182_v23, 2  ;;  %v8274_v32 = vsel %vm8175_vm14, 0, %v8192_v38  ;;  %v779_v60 = vmul.f32 %v778_v1, %v776_v31  ;;  %v6834_v29 = vadd.s32 4294967169, %v1009_v35 }
 0x120   : > { %v381_v48 = vsel %vm379_vm1, %v8151_v42, %v10586_v55  ;;  %v10583_v3 = vxor.u32 2147483648, %v8241_v2  ;;  %vm6829_vm13 = vcmp.lt.s32.totalorder %v6828_v34, 0  ;;  %v941_v0 = vsel %vm935_vm6, %v938_v62, %v940_v33 }
 0x121   : > { %7582 = vsinq.f32 %v8205_v45  ;;  %v870_v15 = vsel %vm6829_vm13, 0, %v6828_v34  ;;  %v960_v14 = vadd.s32 1, %v8256_v24  ;;  %v1015_v38 = vadd.s32 1, %v6834_v29  ;;  %v8294_v61 = vpop.eup %7580 }
 0x122   : > { %v487_v1 = vsel %vm485_vm4, %v10582_v22, %v8241_v2  ;;  %v678_v31 = vsel %vm595_vm5, %v677_v41, %v676_v17  ;;  %v875_v56 = vsub.s32 4294967266, %v870_v15  ;;  %v10584_v58 = vand.u32 2147483647, %v7842_v28 }
 0x123   : > { %v780_v62 = vxor.u32 2147483648, %v779_v60  ;;  %v957_v45 = vmul.u32 %v8229_v11, %v941_v0  ;;  %vm959_vm14 = vc.u32 %v8262_v13, %v8255_v26  ;;  %vm1016_vm15 = vcmp.gt.s32.totalorder %v1015_v38, 0 }
 0x124   : > { %v871_v33 = vsub.s32 32, %v870_v15  ;;  %v876_v47 = vadd.s32 127, %v875_v56  ;;  %v961_v35 = vsel %vm959_vm14, %v960_v14, %v8256_v24  ;;  %v1017_v34 = vsel %vm1016_vm15, %v1015_v38, 0 }
 0x125   : > { %v484_v17 = vsel %vm482_vm8, %v8185_v51, %v10583_v3  ;;  %v679_v41 = vsub.s32 4, %v8046_v37  ;;  %v962_v40 = vadd.s32 %v961_v35, %v957_v45  ;;  %v1019_v29 = vand.u32 31, %v1017_v34 }
 0x126   : > { %v681_v11 = vsel %vm8248_vm9, %v7830_v21, %v678_v31  ;;  %v10655_v0 = vand.u32 2147483647, %v7982_v57  ;;  %v855_v24 = vadd.s32 %v8161_v30, %v8159_v44  ;;  %v877_v14 = vshll.u32 %v876_v47, 23 }
 0x127   : > { %v781_v38 = vsel %vm698_vm10, %v780_v62, %v779_v60  ;;  %v963_v22 = vadd.s32 536870912, %v962_v40  ;;  %v1012_v45 = vand.u32 8388607, %v10584_v58  ;;  %v1020_v35 = vsub.s32 32, %v1019_v29 }
 0x128   : > { %vm8311_vm0 = vcmp.le.f32.partialorder %v10655_v0, 0.7853982  ;;  %v8323_v31 = vsel %vm378_vm11, %v381_v48, %v384_v39  ;;  %v8327_v0 = vsel %vm481_vm12, %v484_v17, %v487_v1  ;;  %v8330_v3 = vand.u32 3, %v8274_v32 }
 0x129   : > { %v873_v44 = vshrl.u32 %v855_v24, %v871_v33  ;;  %v680_v30 = vsel %vm595_vm5, %v679_v41, %v8046_v37  ;;  %7584 = vcosq.f32 %v681_v11  ;;  %v878_v60 = vor.u32 4788187, %v877_v14 }
 0x12a   : > { %v8335_v62 = vshrl.u32 %v963_v22, 30  ;;  %7586 = vsinq.f32 %v681_v11  ;;  %v784_v23 = vsel %vm8311_vm0, %v7982_v57, %v781_v38  ;;  %v872_v39 = vshll.u32 %v8226_v54, %v870_v15 }
 0x12b   : > { %v1013_v1 = vor.u32 8388608, %v1012_v45  ;;  %v10658_v33 = vmov 2475754826   ;;  %v10659_v17 = vmov 2131351028   ;;  %v8345_v24 = vshrl.u32 %v1017_v34, 5 }
 0x12c   : > { %v965_v48 = vshll.u32 %v8335_v62, 30  ;;  %v1023_v47 = vshrl.u32 %v10658_v33, %v1020_v35  ;;  %v1026_v37 = vshrl.u32 %v10659_v17, %v1020_v35  ;;  %v874_v41 = vor.u32 %v873_v44, %v872_v39 }
 0x12d   : > { %v1022_v22 = vshll.u32 %v10587_v50, %v1019_v29  ;;  %v1029_v11 = vshrl.u32 %v10646_v36, %v1020_v35  ;;  %v879_v14 = vand.u32 2147483647, %v878_v60  ;;  %v1025_v38 = vshll.u32 %v10658_v33, %v1019_v29 }
 0x12e   : > { %v8349_v58 = vsub.s32 %v962_v40, %v965_v48  ;;  %v1032_v54 = vshrl.u32 %v10647_v12, %v1020_v35  ;;  %v8353_v15 = vpop.eup %7582  ;;  %v1028_v45 = vshll.u32 %v10659_v17, %v1019_v29  ;;  %v1031_v25 = vshll.u32 %v10646_v36, %v1019_v29 }
 0x12f   : > { %v1034_v34 = vshll.u32 %v10647_v12, %v1019_v29  ;;  %v1035_v44 = vshrl.u32 %v10648_v46, %v1020_v35  ;;  %7588 = vcosq.f32 %v784_v23  ;;  %v1024_v60 = vor.u32 %v1023_v47, %v1022_v22 }
 0x130   : > { %v968_v39 = vsub.s32 0, %v8349_v58  ;;  %v1027_v40 = vor.u32 %v1026_v37, %v1025_v38  ;;  %vm585_vm1 = vcmp.eq.s32.totalorder %v8330_v3, 0  ;;  %vm588_vm2 = vcmp.eq.s32.totalorder %v8330_v3, 2 }
 0x131   : > { %v881_v48 = vcvt.s32.f32 %v874_v41  ;;  %v1030_v55 = vor.u32 %v1029_v11, %v1028_v45  ;;  %v1033_v49 = vor.u32 %v1032_v54, %v1031_v25  ;;  %v1036_v50 = vor.u32 %v1035_v44, %v1034_v34 }
 0x132   : > { %vm376_vm3 = vweird.f32 %v7823_v18  ;;  %v10594_v6 = vxor.u32 2147483648, %v8353_v15  ;;  %v782_v29 = vsub.s32 4, %v8122_v63  ;;  %7590 = vsinq.f32 %v784_v23 }
 0x133   : > { %v6831_v16 = vmin.u32 %v968_v39, %v8349_v58  ;;  %vm479_vm4 = vweird.f32 %v7826_v19  ;;  %v882_v47 = vmul.f32 %v881_v48, %v879_v14  ;;  %v10660_v37 = vmov 683565275  }
 0x134   : > { %v1021_v22 = vshrl.u32 %v10660_v37, %v1020_v35  ;;  %vm1037_vm5 = vcmp.lt.s32.totalorder %v8345_v24, 1  ;;  %v1053_v41 = vshll.u32 %v1013_v1, 8  ;;  %vm584_vm6 = vcmp.lt.s32.totalorder %v8330_v3, 2 }
 0x135   : > { %v970_v25 = vclz %v6831_v16  ;;  %vm1039_vm7 = vcmp.lt.s32.totalorder %v8345_v24, 3  ;;  %vm1040_vm8 = vcmp.lt.s32.totalorder %v8345_v24, 4  ;;  %v1045_v23 = vsel %vm1037_vm5, %v1024_v60, %v1027_v40 }
 0x136   : > { %v1042_v11 = vsel %vm1040_vm8, %v1030_v55, 2102212464  ;;  %v1046_v38 = vsel %vm1040_vm8, %v1033_v49, 920167782  ;;  %v1049_v14 = vsel %vm1037_vm5, %v1027_v40, %v1030_v55  ;;  %v1050_v54 = vsel %vm1040_vm8, %v1036_v50, 1326507024  ;;  %v8381_v45 = vpop.eup %7584 }
 0x137   : > { %v6832_v35 = vadd.s32 4294967294, %v970_v25  ;;  %vm1038_vm11 = vcmp.lt.s32.totalorder %v8345_v24, 2  ;;  %v1047_v1 = vsel %vm1039_vm7, %v1030_v55, %v1046_v38  ;;  %v1051_v16 = vsel %vm1039_vm7, %v1033_v49, %v1050_v54  ;;  %v8391_v48 = vpop.eup %7586 }
 0x138   : > { %v8385_v34 = vsel %vm8248_vm9, 0, %v680_v30  ;;  %v883_v44 = vxor.u32 2147483648, %v882_v47  ;;  %v1048_v39 = vsel %vm1038_vm11, %v1045_v23, %v1047_v1  ;;  %v1052_v50 = vsel %vm1038_vm11, %v1049_v14, %v1051_v16 }
 0x139   : > { %vm582_vm12 = vweird.f32 %v7828_v20  ;;  %v1041_v55 = vsel %vm1037_vm5, %v1021_v22, %v1024_v60  ;;  %v1043_v49 = vsel %vm1039_vm7, %v1027_v40, %v1042_v11  ;;  %v783_v25 = vsel %vm698_vm10, %v782_v29, %v8122_v63 }
 0x13a   : > { %v8398_v5 = vmul.u32.u64.low %v1053_v41, %v1052_v50  ;;  %v8399_v30 = vmul.u32.u64.high %v1053_v41, %v1052_v50, %v8398_v5  ;;  %vm6833_vm9 = vcmp.lt.s32.totalorder %v6832_v35, 0  ;;  %v587_v60 = vsel %vm585_vm1, %v8294_v61, %v10594_v6 }
 0x13b   : > { %v8404_v23 = vmul.u32.u64.low %v1053_v41, %v1048_v39  ;;  %v8405_v38 = vmul.u32.u64.high %v1053_v41, %v1048_v39, %v8404_v23  ;;  %v10661_v40 = vxor.u32 2147483648, %v8294_v61  ;;  %v10662_v11 = vand.u32 2147483647, %v8041_v59 }
 0x13c   : > { %vm801_vm13 = vcmp.lt.s32.totalorder %v8041_v59, 0  ;;  %v8428_v29 = vsel %vm376_vm3, nan, %v8323_v31  ;;  %v686_v14 = vand.u32 3, %v8385_v34  ;;  %v1044_v1 = vsel %vm1038_vm11, %v1041_v55, %v1043_v49  ;;  %v8448_v31 = vpop.eup %7588 }
 0x13d   : > { %v590_v22 = vsel %vm588_vm2, %v10661_v40, %v8353_v15  ;;  %vm8420_vm10 = vcmp.le.f32.partialorder %v10662_v11, 0.7853982  ;;  %10665 = vst [vmem:[#allocation13_spill] sm:$0xff] %v8428_v29  ;;  %v884_v54 = vsel %vm801_vm13, %v883_v44, %v882_v47  ;;  %v8438_v16 = vsel %vm479_vm4, nan, %v8327_v0 }
 0x13e   : > { %v8442_v39 = vsel %vm8311_vm0, 0, %v783_v25  ;;  %v8444_v50 = vsel %vm6833_vm9, 0, %v6832_v35  ;;  %vm1062_vm14 = vc.u32 %v8399_v30, %v8404_v23  ;;  %v591_v24 = vsel %vm584_vm6, %v587_v60, %v590_v22 }
 0x13f   : > { %v10592_v47 = vxor.u32 2147483648, %v8381_v45  ;;  %v1063_v44 = vadd.s32 1, %v8405_v38  ;;  %v1201_v0 = vadd.s32 3, %v8113_v52  ;;  %v10593_v56 = vxor.u32 2147483648, %v8391_v48  ;;  %v8460_v5 = vpop.eup %7590 }
 0x140   : > { %v885_v55 = vsub.s32 4, %v8211_v53  ;;  %v887_v35 = vsel %vm8420_vm10, %v8041_v59, %v884_v54  ;;  %v1060_v49 = vmul.u32 %v1053_v41, %v1044_v1  ;;  %vm687_vm15 = vcmp.lt.s32.totalorder %v686_v14, 2 }
 0x141   : > { %v789_v3 = vand.u32 3, %v8442_v39  ;;  %v978_v25 = vsub.s32 4294967266, %v8444_v50  ;;  %v1064_v60 = vsel %vm1062_vm14, %v1063_v44, %v8405_v38  ;;  %vm685_vm0 = vweird.f32 %v7830_v21 }
 0x142   : > { %vm688_vm1 = vcmp.eq.s32.totalorder %v686_v14, 0  ;;  %vm691_vm2 = vcmp.eq.s32.totalorder %v686_v14, 2  ;;  %vm904_vm5 = vcmp.lt.s32.totalorder %v7839_v27, 0  ;;  %v1065_v52 = vadd.s32 %v1064_v60, %v1060_v49 }
 0x143   : > { %v8469_v40 = vsel %vm582_vm12, nan, %v591_v24  ;;  %v693_v41 = vsel %vm691_vm2, %v10592_v47, %v8391_v48  ;;  %7592 = vcosq.f32 %v887_v35  ;;  %v1202_v22 = vand.u32 3, %v1201_v0 }
 0x144   : > { %10666 = vst [vmem:[#allocation14_spill] sm:$0xff] %v8469_v40  ;;  %v690_v38 = vsel %vm688_vm1, %v8381_v45, %v10593_v56  ;;  %v886_v11 = vsel %vm801_vm13, %v885_v55, %v8211_v53  ;;  %7594 = vsinq.f32 %v887_v35  ;;  %v10667_v54 = vand.u32 2147483647, %v7839_v27 }
 0x145   : > { %v1066_v24 = vadd.s32 536870912, %v1065_v52  ;;  %vm791_vm7 = vcmp.eq.s32.totalorder %v789_v3, 0  ;;  %v10595_v44 = vxor.u32 2147483648, %v8460_v5  ;;  %v10596_v0 = vxor.u32 2147483648, %v8448_v31 }
 0x146   : > { %vm8482_vm6 = vcmp.le.f32.partialorder %v10667_v54, 0.7853982  ;;  %v979_v49 = vadd.s32 127, %v978_v25  ;;  %vm794_vm8 = vcmp.eq.s32.totalorder %v789_v3, 2  ;;  %v988_v60 = vsub.s32 4, %v8335_v62 }
 0x147   : > { %v8489_v47 = vshrl.u32 %v1066_v24, 30  ;;  %v1305_v53 = vadd.s32 3, %v8118_v43  ;;  %v694_v55 = vsel %vm687_vm15, %v690_v38, %v693_v41  ;;  %vm788_vm11 = vweird.f32 %v7982_v57 }
 0x148   : > { %v888_v35 = vsel %vm8420_vm10, 0, %v886_v11  ;;  %v974_v54 = vsub.s32 32, %v8444_v50  ;;  %vm1204_vm9 = vcmp.eq.s32.totalorder %v1202_v22, 0  ;;  %v958_v25 = vadd.s32 %v8255_v26, %v8262_v13 }
 0x149   : > { %v1068_v56 = vshll.u32 %v8489_v47, 30  ;;  %v10670_v24 = vxor.u32 2147483648, %v8156_v4  ;;  %v1409_v43 = vadd.s32 3, %v8274_v32  ;;  %v793_v63 = vsel %vm791_vm7, %v8448_v31, %v10595_v44 }
 0x14a   : > { %v796_v14 = vsel %vm794_vm8, %v10596_v0, %v8460_v5  ;;  %v980_v41 = vshll.u32 %v979_v49, 23  ;;  %vm1207_vm10 = vcmp.eq.s32.totalorder %v1202_v22, 2  ;;  %v989_v26 = vsel %vm904_vm5, %v988_v60, %v8335_v62 }
 0x14b   : > { %v1206_v6 = vsel %vm1204_vm9, %v8151_v42, %v10670_v24  ;;  %v8514_v13 = vsub.s32 %v1065_v52, %v1068_v56  ;;  %v10671_v32 = vxor.u32 2147483648, %v8151_v42  ;;  %v1306_v11 = vand.u32 3, %v1305_v53 }
 0x14c   : > { %v8521_v24 = vsel %vm685_vm0, nan, %v694_v55  ;;  %vm790_vm13 = vcmp.lt.s32.totalorder %v789_v3, 2  ;;  %v8523_v44 = vand.u32 3, %v888_v35  ;;  %v976_v49 = vshrl.u32 %v958_v25, %v974_v54 }
 0x14d   : > { %v1209_v38 = vsel %vm1207_vm10, %v10671_v32, %v8156_v4  ;;  %10672 = vst [vmem:[#allocation15_spill] sm:$0xff] %v8521_v24  ;;  %v797_v0 = vsel %vm790_vm13, %v793_v63, %v796_v14  ;;  %v1071_v40 = vsub.s32 0, %v8514_v13  ;;  %vm1203_vm14 = vcmp.lt.s32.totalorder %v1202_v22, 2  ;;  %v248_v32 = vpop.permute.xlu0 %247 }
 0x14e   : > { %v1513_v62 = vadd.s32 3, %v8385_v34  ;;  %v975_v56 = vshll.u32 %v8349_v58, %v8444_v50  ;;  %v981_v42 = vor.u32 4788187, %v980_v41  ;;  %v8531_v4 = vsel %vm8482_vm6, 0, %v989_v26 }
 0x14f   : > { %v1210_v52 = vsel %vm1203_vm14, %v1206_v6, %v1209_v38  ;;  %v6835_v3 = vmin.u32 %v1071_v40, %v8514_v13  ;;  %vm1308_vm15 = vcmp.eq.s32.totalorder %v1306_v11, 0  ;;  %vm1311_vm1 = vcmp.eq.s32.totalorder %v1306_v11, 2 }
 0x150   : > { %v1410_v60 = vand.u32 3, %v1409_v43  ;;  %vm894_vm2 = vcmp.eq.s32.totalorder %v8523_v44, 0  ;;  %vm897_vm7 = vcmp.eq.s32.totalorder %v8523_v44, 2  ;;  %v977_v34 = vor.u32 %v976_v49, %v975_v56  ;;  %v8542_v55 = vpop.eup %7592  ;;  %v6805_v43 = vld [vmem:[%s7797_s13 + $0x1] ss:$2 sm:$0xf] }
 0x151   : > { %v10673_v22 = vxor.u32 2147483648, %v8241_v2  ;;  %v10674_v50 = vxor.u32 2147483648, %v8185_v51  ;;  %v8546_v6 = vsel %vm788_vm11, nan, %v797_v0  ;;  %v8549_v40 = vand.u32 3, %v8531_v4  ;;  %v8556_v63 = vpop.eup %7594 }
 0x152   : > { %10675 = vst [vmem:[#allocation16_spill] sm:$0xff] %v8546_v6  ;;  %v1073_v54 = vclz %v6835_v3  ;;  %v8553_v25 = vsel %vm376_vm3, nan, %v1210_v52  ;;  %v982_v14 = vand.u32 2147483647, %v981_v42  ;;  %vm1307_vm8 = vcmp.lt.s32.totalorder %v1306_v11, 2 }
 0x153   : > { %v1310_v58 = vsel %vm1308_vm15, %v8185_v51, %v10673_v22  ;;  %v1313_v53 = vsel %vm1311_vm1, %v10674_v50, %v8241_v2  ;;  %10676 = vst [vmem:[#allocation17_spill] sm:$0xff] %v8553_v25  ;;  %v8558_v51 = vand.u32 3, %v1513_v62  ;;  %v1617_v2 = vadd.s32 3, %v8442_v39 }
 0x154   : > { %vm893_vm9 = vcmp.lt.s32.totalorder %v8523_v44, 2  ;;  %v6836_v0 = vadd.s32 4294967294, %v1073_v54  ;;  %v1314_v41 = vsel %vm1307_vm8, %v1310_v58, %v1313_v53  ;;  %vm1412_vm10 = vcmp.eq.s32.totalorder %v1410_v60, 0 }
 0x155   : > { %v8562_v26 = vadd.s32 3, %v888_v35  ;;  %v10598_v18 = vxor.u32 2147483648, %v8542_v55  ;;  %v984_v38 = vcvt.s32.f32 %v977_v34  ;;  %v8566_v49 = vrot.slane %v6805_v43, %v7800_v7 }
 0x156   : > { %v8569_v11 = vrot.slane %v6805_v43, %v7806_v9  ;;  %v10599_v62 = vxor.u32 2147483648, %v8556_v63  ;;  %vm6837_vm3 = vcmp.lt.s32.totalorder %v6836_v0, 0  ;;  %vm1415_vm13 = vcmp.eq.s32.totalorder %v1410_v60, 2 }
 0x157   : > { %v8573_v39 = vrot.slane %v6805_v43, %v7809_v10  ;;  %v985_v56 = vmul.f32 %v984_v38, %v982_v14  ;;  %vm1007_vm14 = vcmp.lt.s32.totalorder %v7842_v28, 0  ;;  %v1076_v35 = vsel %vm6837_vm3, 0, %v6836_v0 }
 0x158   : > { %v8577_v42 = vmul.f32 %v8566_v49, %v248_v32  ;;  %v8580_v52 = vmul.f32 %v8569_v11, %v248_v32  ;;  %vm891_vm15 = vweird.f32 %v8041_v59  ;;  %v1081_v3 = vsub.s32 4294967266, %v1076_v35 }
 0x159   : > { %v10677_v34 = vxor.u32 2147483648, %v8353_v15  ;;  %v10678_v58 = vxor.u32 2147483648, %v8294_v61  ;;  %v8591_v53 = vmul.f32 %v8573_v39, %v248_v32  ;;  %v899_v54 = vsel %vm897_vm7, %v10598_v18, %v8556_v63 }
 0x15a   : > { %v1061_v14 = vadd.s32 %v8404_v23, %v8399_v30  ;;  %v1077_v0 = vsub.s32 32, %v1076_v35  ;;  %vm1411_vm1 = vcmp.lt.s32.totalorder %v1410_v60, 2  ;;  %v986_v23 = vxor.u32 2147483648, %v985_v56 }
 0x15b   : > { %v1414_v22 = vsel %vm1412_vm10, %v8294_v61, %v10677_v34  ;;  %v1417_v50 = vsel %vm1415_vm13, %v10678_v58, %v8353_v15  ;;  %v896_v61 = vsel %vm894_vm2, %v8542_v55, %v10599_v62  ;;  %v10679_v15 = vand.u32 2147483647, %v7842_v28 }
 0x15c   : > { %v1082_v34 = vadd.s32 127, %v1081_v3  ;;  %v8612_v58 = vrot.slane %v6805_v43, %v7803_v8  ;;  %v8617_v60 = vsel %vm479_vm4, nan, %v1314_v41  ;;  %v1418_v18 = vsel %vm1411_vm1, %v1414_v22, %v1417_v50 }
 0x15d   : > { %vm8607_vm8 = vcmp.le.f32.partialorder %v10679_v15, 0.7853982  ;;  %10682 = vst [vmem:[#allocation18_spill] sm:$0xff] %v8617_v60  ;;  %v1943_v62 = vand.u32 2139095040, %v8577_v42  ;;  %v1091_v15 = vsub.s32 4, %v8489_v47  ;;  %vm1516_vm2 = vcmp.eq.s32.totalorder %v8558_v51, 0 }
 0x15e   : > { %v1083_v24 = vshll.u32 %v1082_v34, 23  ;;  %v8623_v3 = vmul.f32 %v8612_v58, %v248_v32  ;;  %v900_v43 = vsel %vm893_vm9, %v896_v61, %v899_v54  ;;  %v1079_v30 = vshrl.u32 %v1061_v14, %v1077_v0 }
 0x15f   : > { %vm1519_vm7 = vcmp.eq.s32.totalorder %v8558_v51, 2  ;;  %v1944_v19 = vshrl.u32 %v1943_v62, 23  ;;  %v10683_v41 = vxor.u32 2147483648, %v8391_v48  ;;  %v10684_v50 = vxor.u32 2147483648, %v8381_v45 }
 0x160   : > { %v8634_v6 = vand.u32 3, %v1617_v2  ;;  %v10685_v32 = vand.u32 2147483647, %v8577_v42  ;;  %v987_v44 = vsel %vm904_vm5, %v986_v23, %v985_v56  ;;  %v1078_v54 = vshll.u32 %v8514_v13, %v1076_v35 }
 0x161   : > { %v1518_v22 = vsel %vm1516_vm2, %v8381_v45, %v10683_v41  ;;  %v1521_v34 = vsel %vm1519_vm7, %v10684_v50, %v8391_v48  ;;  %v1084_v14 = vor.u32 4788187, %v1083_v24  ;;  %v6870_v62 = vadd.s32 4294967169, %v1944_v19 }
 0x162   : > { %v1947_v7 = vand.u32 8388607, %v10685_v32  ;;  %v1092_v0 = vsel %vm1007_vm14, %v1091_v15, %v8489_v47  ;;  %v8646_v45 = vsel %vm582_vm12, nan, %v1418_v18  ;;  %vm1515_vm4 = vcmp.lt.s32.totalorder %v8558_v51, 2 }
 0x163   : > { %10686 = vst [vmem:[#allocation19_spill] sm:$0xff] %v8646_v45  ;;  %v2046_v48 = vand.u32 2139095040, %v8623_v3  ;;  %v8652_v2 = vsel %vm891_vm15, nan, %v900_v43  ;;  %v1080_v56 = vor.u32 %v1079_v30, %v1078_v54  ;;  %v1522_v13 = vsel %vm1515_vm4, %v1518_v22, %v1521_v34 }
 0x164   : > { %10687 = vst [vmem:[#allocation20_spill] sm:$0xff] %v8652_v2  ;;  %v1950_v24 = vadd.s32 1, %v6870_v62  ;;  %v8657_v35 = vsel %vm8482_vm6, %v7839_v27, %v987_v44  ;;  %vm1620_vm5 = vcmp.eq.s32.totalorder %v8634_v6, 0  ;;  %v1948_v20 = vor.u32 8388608, %v1947_v7 }
 0x165   : > { %v2047_v47 = vshrl.u32 %v2046_v48, 23  ;;  %v1085_v18 = vand.u32 2147483647, %v1084_v14  ;;  %v8662_v51 = vsel %vm8607_vm8, 0, %v1092_v0  ;;  %vm1623_vm12 = vcmp.eq.s32.totalorder %v8634_v6, 2 }
 0x166   : > { %vm1951_vm9 = vcmp.gt.s32.totalorder %v1950_v24, 0  ;;  %v8667_v61 = vsel %vm685_vm0, nan, %v1522_v13  ;;  %v10689_v1 = vxor.u32 2147483648, %v8460_v5  ;;  %7596 = vcosq.f32 %v8657_v35 }
 0x167   : > { %10688 = vst [vmem:[#allocation21_spill] sm:$0xff] %v8667_v61  ;;  %v1952_v23 = vsel %vm1951_vm9, %v1950_v24, 0  ;;  %v6874_v15 = vadd.s32 4294967169, %v2047_v47  ;;  %v1087_v7 = vcvt.s32.f32 %v1080_v56  ;;  %v10690_v43 = vxor.u32 2147483648, %v8448_v31 }
 0x168   : > { %v1622_v30 = vsel %vm1620_vm5, %v8448_v31, %v10689_v1  ;;  %v1954_v41 = vand.u32 31, %v1952_v23  ;;  %v8677_v22 = vand.u32 3, %v8662_v51  ;;  %v8680_v21 = vand.u32 3, %v8562_v26 }
 0x169   : > { %v1625_v19 = vsel %vm1623_vm12, %v10690_v43, %v8460_v5  ;;  %v8682_v50 = vshll.u32 %v1948_v20, 8  ;;  %v8685_v32 = vmul.f32 %v1087_v7, %v1085_v18  ;;  %v1953_v44 = vshrl.u32 %v1952_v23, 5 }
 0x16a   : > { %v1955_v54 = vsub.s32 32, %v1954_v41  ;;  %v2149_v14 = vand.u32 2139095040, %v8580_v52  ;;  %v1957_v31 = vshll.u32 %v10660_v37, %v1954_v41  ;;  %v1960_v5 = vshll.u32 %v10658_v33, %v1954_v41 }
 0x16b   : > { %v1963_v62 = vshll.u32 %v10659_v17, %v1954_v41  ;;  %v2053_v0 = vadd.s32 1, %v6874_v15  ;;  %v1966_v56 = vshll.u32 %v10646_v36, %v1954_v41  ;;  %v1969_v13 = vshll.u32 %v10647_v12, %v1954_v41 }
 0x16c   : > { %v1958_v26 = vshrl.u32 %v10658_v33, %v1955_v54  ;;  %v1961_v48 = vshrl.u32 %v10659_v17, %v1955_v54  ;;  %vm1619_vm0 = vcmp.lt.s32.totalorder %v8634_v6, 2  ;;  %v1956_v24 = vshrl.u32 %v10660_v37, %v1955_v54 }
 0x16d   : > { %v1964_v20 = vshrl.u32 %v10646_v36, %v1955_v54  ;;  %v1967_v47 = vshrl.u32 %v10647_v12, %v1955_v54  ;;  %v1970_v18 = vshrl.u32 %v10648_v46, %v1955_v54  ;;  %vm1972_vm6 = vcmp.lt.s32.totalorder %v1953_v44, 1 }
 0x16e   : > { %v1959_v1 = vor.u32 %v1958_v26, %v1957_v31  ;;  %v1962_v23 = vor.u32 %v1961_v48, %v1960_v5  ;;  %vm1973_vm10 = vcmp.lt.s32.totalorder %v1953_v44, 2  ;;  %vm1974_vm3 = vcmp.lt.s32.totalorder %v1953_v44, 3 }
 0x16f   : > { %v1965_v15 = vor.u32 %v1964_v20, %v1963_v62  ;;  %v1968_v7 = vor.u32 %v1967_v47, %v1966_v56  ;;  %v1971_v43 = vor.u32 %v1970_v18, %v1969_v13  ;;  %vm1975_vm13 = vcmp.lt.s32.totalorder %v1953_v44, 4 }
 0x170   : > { %v1976_v41 = vsel %vm1972_vm6, %v1956_v24, %v1959_v1  ;;  %v1980_v34 = vsel %vm1972_vm6, %v1959_v1, %v1962_v23  ;;  %vm2054_vm1 = vcmp.gt.s32.totalorder %v2053_v0, 0  ;;  %v10691_v62 = vand.u32 2147483647, %v8623_v3 }
 0x171   : > { %v1977_v45 = vsel %vm1975_vm13, %v1965_v15, 2102212464  ;;  %v1981_v61 = vsel %vm1975_vm13, %v1968_v7, 920167782  ;;  %v1984_v2 = vsel %vm1972_vm6, %v1962_v23, %v1965_v15  ;;  %v1985_v8 = vsel %vm1975_vm13, %v1971_v43, 1326507024 }
 0x172   : > { %v1978_v9 = vsel %vm1974_vm3, %v1962_v23, %v1977_v45  ;;  %v1982_v10 = vsel %vm1974_vm3, %v1965_v15, %v1981_v61  ;;  %v1986_v25 = vsel %vm1974_vm3, %v1968_v7, %v1985_v8  ;;  %v2055_v54 = vsel %vm2054_vm1, %v2053_v0, 0 }
 0x173   : > { %v1983_v31 = vsel %vm1973_vm10, %v1980_v34, %v1982_v10  ;;  %v1987_v5 = vsel %vm1973_vm10, %v1984_v2, %v1986_v25  ;;  %v2050_v26 = vand.u32 8388607, %v10691_v62  ;;  %v2150_v48 = vshrl.u32 %v2149_v14, 23  ;;  %v8713_v45 = vpop.eup %7596 }
 0x174   : > { %v8705_v56 = vmul.u32.u64.low %v8682_v50, %v1987_v5  ;;  %v8706_v13 = vmul.u32.u64.high %v8682_v50, %v1987_v5, %v8705_v56  ;;  %v8709_v24 = vmul.u32.u64.low %v8682_v50, %v1983_v31  ;;  %v8710_v20 = vmul.u32.u64.high %v8682_v50, %v1983_v31, %v8709_v24 }
 0x175   : > { %vm1724_vm2 = vcmp.eq.s32.totalorder %v8680_v21, 0  ;;  %vm1727_vm7 = vcmp.eq.s32.totalorder %v8680_v21, 2  ;;  %v1979_v8 = vsel %vm1973_vm10, %v1976_v41, %v1978_v9  ;;  %v2057_v10 = vand.u32 31, %v2055_v54 }
 0x176   : > { %v8720_v25 = vsel %vm1619_vm0, %v1622_v30, %v1625_v19  ;;  %v10692_v2 = vxor.u32 2147483648, %v8556_v63  ;;  %v10693_v34 = vxor.u32 2147483648, %v8542_v55  ;;  %v8729_v0 = vadd.s32 3, %v8531_v4 }
 0x177   : > { %v1089_v47 = vxor.u32 2147483648, %v8685_v32  ;;  %v2051_v44 = vor.u32 8388608, %v2050_v26  ;;  %v2058_v9 = vsub.s32 32, %v2057_v10  ;;  %v6878_v18 = vadd.s32 4294967169, %v2150_v48 }
 0x178   : > { %v1726_v61 = vsel %vm1724_vm2, %v8542_v55, %v10692_v2  ;;  %v1729_v14 = vsel %vm1727_vm7, %v10693_v34, %v8556_v63  ;;  %v1995_v6 = vmul.u32 %v8682_v50, %v1979_v8  ;;  %vm1997_vm4 = vc.u32 %v8706_v13, %v8709_v24 }
 0x179   : > { %v1998_v30 = vadd.s32 1, %v8710_v20  ;;  %v2056_v19 = vshrl.u32 %v2055_v54, 5  ;;  %v2060_v1 = vshll.u32 %v10660_v37, %v2057_v10  ;;  %v2061_v55 = vshrl.u32 %v10658_v33, %v2058_v9 }
 0x17a   : > { %v2063_v4 = vshll.u32 %v10658_v33, %v2057_v10  ;;  %v2064_v63 = vshrl.u32 %v10659_v17, %v2058_v9  ;;  %v2066_v15 = vshll.u32 %v10659_v17, %v2057_v10  ;;  %v2067_v50 = vshrl.u32 %v10646_v36, %v2058_v9 }
 0x17b   : > { %v1999_v23 = vsel %vm1997_vm4, %v1998_v30, %v8710_v20  ;;  %v2070_v7 = vshrl.u32 %v10647_v12, %v2058_v9  ;;  %vm1723_vm5 = vcmp.lt.s32.totalorder %v8680_v21, 2  ;;  %v2062_v41 = vor.u32 %v2061_v55, %v2060_v1 }
 0x17c   : > { %v2000_v43 = vadd.s32 %v1999_v23, %v1995_v6  ;;  %v2069_v54 = vshll.u32 %v10646_v36, %v2057_v10  ;;  %v1730_v31 = vsel %vm1723_vm5, %v1726_v61, %v1729_v14  ;;  %v1929_v5 = vadd.s32 3, %v8662_v51 }
 0x17d   : > { %v2065_v62 = vor.u32 %v2064_v63, %v2063_v4  ;;  %v2068_v26 = vor.u32 %v2067_v50, %v2066_v15  ;;  %v1090_v48 = vsel %vm1007_vm14, %v1089_v47, %v8685_v32  ;;  %v2091_v8 = vshll.u32 %v2051_v44, 8 }
 0x17e   : > { %v2001_v56 = vadd.s32 536870912, %v2000_v43  ;;  %v2071_v20 = vor.u32 %v2070_v7, %v2069_v54  ;;  %v2072_v2 = vshll.u32 %v10647_v12, %v2057_v10  ;;  %v2073_v21 = vshrl.u32 %v10648_v46, %v2058_v9 }
 0x17f   : > { %vm2075_vm12 = vcmp.lt.s32.totalorder %v2056_v19, 1  ;;  %v2156_v34 = vadd.s32 1, %v6878_v18  ;;  %vm2077_vm9 = vcmp.lt.s32.totalorder %v2056_v19, 3  ;;  %vm2078_vm0 = vcmp.lt.s32.totalorder %v2056_v19, 4 }
 0x180   : > { %v8752_v6 = vshrl.u32 %v2001_v56, 30  ;;  %v2083_v51 = vsel %vm2075_vm12, %v2062_v41, %v2065_v62  ;;  %v2059_v61 = vshrl.u32 %v10660_v37, %v2058_v9  ;;  %v2074_v14 = vor.u32 %v2073_v21, %v2072_v2 }
 0x181   : > { %v2080_v30 = vsel %vm2078_vm0, %v2068_v26, 2102212464  ;;  %v2084_v1 = vsel %vm2078_vm0, %v2071_v20, 920167782  ;;  %vm2076_vm14 = vcmp.lt.s32.totalorder %v2056_v19, 2  ;;  %v2087_v10 = vsel %vm2075_vm12, %v2065_v62, %v2068_v26 }
 0x182   : > { %v2003_v32 = vshll.u32 %v8752_v6, 30  ;;  %v2085_v47 = vsel %vm2077_vm9, %v2068_v26, %v2084_v1  ;;  %v2079_v44 = vsel %vm2075_vm12, %v2059_v61, %v2062_v41  ;;  %v2088_v18 = vsel %vm2078_vm0, %v2074_v14, 1326507024 }
 0x183   : > { %v2086_v55 = vsel %vm2076_vm14, %v2083_v51, %v2085_v47  ;;  %vm2157_vm6 = vcmp.gt.s32.totalorder %v2156_v34, 0  ;;  %v2081_v63 = vsel %vm2077_vm9, %v2065_v62, %v2080_v30  ;;  %v2089_v9 = vsel %vm2077_vm9, %v2071_v20, %v2088_v18 }
 0x184   : > { %v8758_v4 = vsub.s32 %v2000_v43, %v2003_v32  ;;  %v2158_v23 = vsel %vm2157_vm6, %v2156_v34, 0  ;;  %v2090_v15 = vsel %vm2076_vm14, %v2087_v10, %v2089_v9  ;;  %v10617_v54 = vand.u32 2147483647, %v8580_v52 }
 0x185   : > { %v8763_v50 = vmul.u32.u64.low %v2091_v8, %v2086_v55  ;;  %v8764_v7 = vmul.u32.u64.high %v2091_v8, %v2086_v55, %v8763_v50  ;;  %7598 = vsinq.f32 %v8657_v35  ;;  %v1093_v62 = vsel %vm8607_vm8, %v7842_v28, %v1090_v48  ;;  %v10696_v48 = vld [vmem:[#allocation11_spill] sm:$0xff] }
 0x186   : > { %v2006_v41 = vsub.s32 0, %v8758_v4  ;;  %v8770_v26 = vmul.u32.u64.low %v2091_v8, %v2090_v15  ;;  %v8771_v43 = vmul.u32.u64.high %v2091_v8, %v2090_v15, %v8770_v26  ;;  %v8779_v56 = vsel %vm788_vm11, nan, %v8720_v25 }
 0x187   : > { %10694 = vst [vmem:[#allocation22_spill] sm:$0xff] %v8779_v56  ;;  %v2082_v20 = vsel %vm2076_vm14, %v2079_v44, %v2081_v63  ;;  %v2160_v2 = vand.u32 31, %v2158_v23  ;;  %v8784_v35 = vsel %vm891_vm15, nan, %v1730_v31  ;;  %v8787_v21 = vand.u32 3, %v8729_v0 }
 0x188   : > { %10695 = vst [vmem:[#allocation23_spill] sm:$0xff] %v8784_v35  ;;  %v8789_v34 = vand.u32 3, %v1929_v5  ;;  %v6871_v38 = vmin.u32 %v2006_v41, %v8758_v4  ;;  %v8794_v51 = vmul.f32 %v8566_v49, %v10696_v48  ;;  %v2101_v57 = vadd.s32 1, %v8764_v7 }
 0x189   : > { %v8799_v25 = vand.u32 8388607, %v10617_v54  ;;  %v2161_v59 = vsub.s32 32, %v2160_v2  ;;  %7600 = vcosq.f32 %v1093_v62  ;;  %v2098_v31 = vmul.u32 %v2091_v8, %v2082_v20 }
 0x18a   : > { %v2008_v19 = vclz %v6871_v38  ;;  %vm2100_vm11 = vc.u32 %v8771_v43, %v8763_v50  ;;  %v1996_v0 = vadd.s32 %v8709_v24, %v8706_v13  ;;  %v8806_v49 = vshrl.u32 %v2158_v23, 5 }
 0x18b   : > { %v2102_v5 = vsel %vm2100_vm11, %v2101_v57, %v8764_v7  ;;  %v2164_v61 = vshrl.u32 %v10658_v33, %v2161_v59  ;;  %v2163_v1 = vshll.u32 %v10660_v37, %v2160_v2  ;;  %v2167_v32 = vshrl.u32 %v10659_v17, %v2161_v59 }
 0x18c   : > { %v6872_v14 = vadd.s32 4294967294, %v2008_v19  ;;  %v2103_v30 = vadd.s32 %v2102_v5, %v2098_v31  ;;  %v2166_v8 = vshll.u32 %v10658_v33, %v2160_v2  ;;  %v2170_v47 = vshrl.u32 %v10646_v36, %v2161_v59 }
 0x18d   : > { %v2172_v10 = vshll.u32 %v10646_v36, %v2160_v2  ;;  %v2173_v13 = vshrl.u32 %v10647_v12, %v2161_v59  ;;  %v2169_v44 = vshll.u32 %v10659_v17, %v2160_v2  ;;  %v2176_v55 = vshrl.u32 %v10648_v46, %v2161_v59 }
 0x18e   : > { %vm6873_vm15 = vcmp.lt.s32.totalorder %v6872_v14, 0  ;;  %v2104_v24 = vadd.s32 536870912, %v2103_v30  ;;  %v2165_v63 = vor.u32 %v2164_v61, %v2163_v1  ;;  %v2175_v23 = vshll.u32 %v10647_v12, %v2160_v2 }
 0x18f   : > { %v2011_v18 = vsel %vm6873_vm15, 0, %v6872_v14  ;;  %v2174_v9 = vor.u32 %v2173_v13, %v2172_v10  ;;  %v2168_v26 = vor.u32 %v2167_v32, %v2166_v8  ;;  %7602 = vsinq.f32 %v1093_v62 }
 0x190   : > { %v2012_v15 = vsub.s32 32, %v2011_v18  ;;  %v2016_v7 = vsub.s32 4294967266, %v2011_v18  ;;  %v8818_v41 = vshrl.u32 %v2104_v24, 30  ;;  %v2154_v20 = vor.u32 8388608, %v8799_v25 }
 0x191   : > { %v2171_v38 = vor.u32 %v2170_v47, %v2169_v44  ;;  %v2177_v57 = vor.u32 %v2176_v55, %v2175_v23  ;;  %vm2181_vm8 = vcmp.lt.s32.totalorder %v8806_v49, 4  ;;  %v2013_v14 = vshll.u32 %v8758_v4, %v2011_v18 }
 0x192   : > { %v2014_v19 = vshrl.u32 %v1996_v0, %v2012_v15  ;;  %v2017_v31 = vadd.s32 127, %v2016_v7  ;;  %v2106_v5 = vshll.u32 %v8818_v41, 30  ;;  %v7599_v61 = vpop.eup %7598  ;;  %v2162_v2 = vshrl.u32 %v10660_v37, %v2161_v59 }
 0x193   : > { %vm2178_vm10 = vcmp.lt.s32.totalorder %v8806_v49, 1  ;;  %v2187_v62 = vsel %vm2181_vm8, %v2174_v9, 920167782  ;;  %vm1000_vm3 = vcmp.eq.s32.totalorder %v8549_v40, 2  ;;  %vm1831_vm13 = vcmp.eq.s32.totalorder %v8787_v21, 2 }
 0x194   : > { %v2018_v25 = vshll.u32 %v2017_v31, 23  ;;  %v8830_v0 = vsub.s32 %v2103_v30, %v2106_v5  ;;  %vm2180_vm1 = vcmp.lt.s32.totalorder %v8806_v49, 3  ;;  %v2186_v1 = vsel %vm2178_vm10, %v2165_v63, %v2168_v26 }
 0x195   : > { %vm997_vm2 = vcmp.eq.s32.totalorder %v8549_v40, 0  ;;  %vm1828_vm7 = vcmp.eq.s32.totalorder %v8787_v21, 0  ;;  %vm2179_vm4 = vcmp.lt.s32.totalorder %v8806_v49, 2  ;;  %v2183_v4 = vsel %vm2181_vm8, %v2171_v38, 2102212464 }
 0x196   : > { %v2188_v59 = vsel %vm2180_vm1, %v2171_v38, %v2187_v62  ;;  %v2191_v30 = vsel %vm2181_vm8, %v2177_v57, 1326507024  ;;  %v2015_v32 = vor.u32 %v2014_v19, %v2013_v14  ;;  %v2019_v8 = vor.u32 4788187, %v2018_v25  ;;  %v8847_v13 = vpop.eup %7600 }
 0x197   : > { %v2109_v47 = vsub.s32 0, %v8830_v0  ;;  %v2190_v10 = vsel %vm2178_vm10, %v2168_v26, %v2171_v38  ;;  %v1001_v24 = vxor.u32 2147483648, %v8713_v45  ;;  %v2189_v44 = vsel %vm2179_vm4, %v2186_v1, %v2188_v59 }
 0x198   : > { %v2192_v55 = vsel %vm2180_vm1, %v2174_v9, %v2191_v30  ;;  %v2194_v18 = vshll.u32 %v2154_v20, 8  ;;  %vm996_vm5 = vcmp.lt.s32.totalorder %v8549_v40, 2  ;;  %v998_v23 = vxor.u32 2147483648, %v7599_v61 }
 0x199   : > { %v2020_v15 = vand.u32 2147483647, %v2019_v8  ;;  %v6875_v7 = vmin.u32 %v2109_v47, %v8830_v0  ;;  %v2182_v38 = vsel %vm2178_vm10, %v2162_v2, %v2165_v63  ;;  %vm1827_vm12 = vcmp.lt.s32.totalorder %v8787_v21, 2 }
 0x19a   : > { %v2184_v57 = vsel %vm2180_vm1, %v2168_v26, %v2183_v4  ;;  %v2193_v19 = vsel %vm2179_vm4, %v2190_v10, %v2192_v55  ;;  %v8863_v31 = vmul.u32.u64.low %v2194_v18, %v2189_v44  ;;  %v8864_v9 = vmul.u32.u64.high %v2194_v18, %v2189_v44, %v8863_v31 }
 0x19b   : > { %v2022_v20 = vcvt.s32.f32 %v2015_v32  ;;  %v2111_v5 = vclz %v6875_v7  ;;  %v8867_v14 = vmul.u32.u64.low %v2194_v18, %v2193_v19  ;;  %v8868_v62 = vmul.u32.u64.high %v2194_v18, %v2193_v19, %v8867_v14 }
 0x19c   : > { %v8872_v63 = vmul.f32 %v8612_v58, %v10696_v48  ;;  %v8876_v2 = vmul.f32 %v8569_v11, %v10696_v48  ;;  %v8880_v26 = vmul.f32 %v8573_v39, %v10696_v48  ;;  %v2252_v25 = vand.u32 2139095040, %v8591_v53  ;;  %v8892_v30 = vpop.eup %7602 }
 0x19d   : > { %vm1942_vm9 = vcmp.lt.s32.totalorder %v8577_v42, 0  ;;  %v2023_v1 = vmul.f32 %v2022_v20, %v2020_v15  ;;  %v6876_v4 = vadd.s32 4294967294, %v2111_v5  ;;  %v2185_v59 = vsel %vm2179_vm4, %v2182_v38, %v2184_v57 }
 0x19e   : > { %vm994_vm0 = vweird.f32 %v7839_v27  ;;  %v1002_v58 = vsel %vm1000_vm3, %v1001_v24, %v7599_v61  ;;  %v1833_v11 = vsel %vm1831_vm13, %v1001_v24, %v7599_v61  ;;  %v2204_v39 = vadd.s32 1, %v8864_v9 }
 0x19f   : > { %v2253_v48 = vshrl.u32 %v2252_v25, 23  ;;  %v999_v32 = vsel %vm997_vm2, %v8713_v45, %v998_v23  ;;  %v1830_v49 = vsel %vm1828_vm7, %v8713_v45, %v998_v23  ;;  %vm6877_vm14 = vcmp.lt.s32.totalorder %v6876_v4, 0 }
 0x1a0   : > { %vm2203_vm6 = vc.u32 %v8868_v62, %v8863_v31  ;;  %vm1103_vm11 = vcmp.eq.s32.totalorder %v8677_v22, 2  ;;  %v2114_v61 = vsel %vm6877_vm14, 0, %v6876_v4  ;;  %v2201_v8 = vmul.u32 %v2194_v18, %v2185_v59 }
 0x1a1   : > { %v2205_v47 = vsel %vm2203_vm6, %v2204_v39, %v8864_v9  ;;  %v6882_v10 = vadd.s32 4294967169, %v2253_v48  ;;  %vm1100_vm15 = vcmp.eq.s32.totalorder %v8677_v22, 0  ;;  %v2024_v24 = vxor.u32 2147483648, %v2023_v1 }
 0x1a2   : > { %v2099_v44 = vadd.s32 %v8763_v50, %v8771_v43  ;;  %v2115_v55 = vsub.s32 32, %v2114_v61  ;;  %v2119_v15 = vsub.s32 4294967266, %v2114_v61  ;;  %v1003_v45 = vsel %vm996_vm5, %v999_v32, %v1002_v58 }
 0x1a3   : > { %v10697_v23 = vand.u32 2147483647, %v8577_v42  ;;  %v2206_v18 = vadd.s32 %v2205_v47, %v2201_v8  ;;  %v2259_v38 = vadd.s32 1, %v6882_v10  ;;  %v1834_v57 = vsel %vm1827_vm12, %v1830_v49, %v1833_v11 }
 0x1a4   : > { %v2116_v19 = vshll.u32 %v8830_v0, %v2114_v61  ;;  %v2117_v9 = vshrl.u32 %v2099_v44, %v2115_v55  ;;  %v2120_v50 = vadd.s32 127, %v2119_v15  ;;  %v10615_v43 = vxor.u32 2147483648, %v8847_v13 }
 0x1a5   : > { %vm8911_vm8 = vcmp.le.f32.partialorder %v10697_v23, 0.7853982  ;;  %v2207_v20 = vadd.s32 536870912, %v2206_v18  ;;  %v10614_v40 = vand.u32 2147483647, %v8591_v53  ;;  %vm2260_vm10 = vcmp.gt.s32.totalorder %v2259_v38, 0 }
 0x1a6   : > { %v2025_v5 = vsel %vm1942_vm9, %v2024_v24, %v2023_v1  ;;  %v2118_v14 = vor.u32 %v2117_v9, %v2116_v19  ;;  %v2121_v25 = vshll.u32 %v2120_v50, 23  ;;  %v2261_v4 = vsel %vm2260_vm10, %v2259_v38, 0 }
 0x1a7   : > { %v10616_v59 = vxor.u32 2147483648, %v8892_v30  ;;  %v2026_v21 = vsub.s32 4, %v8752_v6  ;;  %vm2045_vm3 = vcmp.lt.s32.totalorder %v8623_v3, 0  ;;  %v8925_v0 = vshrl.u32 %v2207_v20, 30 }
 0x1a8   : > { %v2263_v58 = vand.u32 31, %v2261_v4  ;;  %v8929_v11 = vsel %vm994_vm0, nan, %v1003_v45  ;;  %v8933_v39 = vsel %vm994_vm0, nan, %v1834_v57  ;;  %v10702_v1 = vand.u32 2147483647, %v8623_v3 }
 0x1a9   : > { %10700 = vst [vmem:[#allocation11_spill] sm:$0xff] %v8929_v11  ;;  %10701 = vst [vmem:[#allocation24_spill] sm:$0xff] %v8933_v39  ;;  %v2122_v32 = vor.u32 4788187, %v2121_v25  ;;  %v2028_v49 = vsel %vm8911_vm8, %v8577_v42, %v2025_v5  ;;  %v2209_v61 = vshll.u32 %v8925_v0, 30  ;;  %v8952_v27 = vsel %vm1103_vm11, %v10615_v43, %v8892_v30 }
 0x1aa   : > { %vm8937_vm13 = vcmp.le.f32.partialorder %v10702_v1, 0.7853982  ;;  %v2256_v8 = vand.u32 8388607, %v10614_v40  ;;  %v2264_v47 = vsub.s32 32, %v2263_v58  ;;  %v2125_v24 = vcvt.s32.f32 %v2118_v14 }
 0x1ab   : > { %v2123_v10 = vand.u32 2147483647, %v2122_v32  ;;  %v2355_v44 = vand.u32 2139095040, %v8794_v51  ;;  %v8960_v55 = vsel %vm1100_vm15, %v8847_v13, %v10616_v59  ;;  %v8965_v15 = vsel %vm1942_vm9, %v2026_v21, %v8752_v6 }
 0x1ac   : > { %v8968_v23 = vsub.s32 %v2206_v18, %v2209_v61  ;;  %7604 = vcosq.f32 %v2028_v49  ;;  %v2267_v57 = vshrl.u32 %v10658_v33, %v2264_v47  ;;  %v2270_v19 = vshrl.u32 %v10659_v17, %v2264_v47 }
 0x1ad   : > { %v2126_v38 = vmul.f32 %v2125_v24, %v2123_v10  ;;  %v2257_v50 = vor.u32 8388608, %v2256_v8  ;;  %v2273_v20 = vshrl.u32 %v10646_v36, %v2264_v47  ;;  %v2276_v5 = vshrl.u32 %v10647_v12, %v2264_v47 }
 0x1ae   : > { %v2212_v9 = vsub.s32 0, %v8968_v23  ;;  %v2266_v6 = vshll.u32 %v10660_v37, %v2263_v58  ;;  %v2269_v25 = vshll.u32 %v10658_v33, %v2263_v58  ;;  %v2356_v18 = vshrl.u32 %v2355_v44, 23 }
 0x1af   : > { %v2127_v14 = vxor.u32 2147483648, %v2126_v38  ;;  %v2262_v1 = vshrl.u32 %v2261_v4, 5  ;;  %v2272_v32 = vshll.u32 %v10659_v17, %v2263_v58  ;;  %v2275_v61 = vshll.u32 %v10646_v36, %v2263_v58 }
 0x1b0   : > { %v6879_v21 = vmin.u32 %v2212_v9, %v8968_v23  ;;  %v2268_v10 = vor.u32 %v2267_v57, %v2266_v6  ;;  %v2271_v24 = vor.u32 %v2270_v19, %v2269_v25  ;;  %v2279_v40 = vshrl.u32 %v10648_v46, %v2264_v47 }
 0x1b1   : > { %v2128_v8 = vsel %vm2045_vm3, %v2127_v14, %v2126_v38  ;;  %v2274_v43 = vor.u32 %v2273_v20, %v2272_v32  ;;  %v2277_v9 = vor.u32 %v2276_v5, %v2275_v61  ;;  %7606 = vsinq.f32 %v2028_v49 }
 0x1b2   : > { %v8986_v45 = vsel %vm8937_vm13, %v8623_v3, %v2128_v8  ;;  %v2214_v44 = vclz %v6879_v21  ;;  %v2202_v4 = vadd.s32 %v8863_v31, %v8868_v62  ;;  %v2278_v59 = vshll.u32 %v10647_v12, %v2263_v58 }
 0x1b3   : > { %v8991_v54 = vshll.u32 %v2257_v50, 8  ;;  %vm1932_vm1 = vcmp.eq.s32.totalorder %v8789_v34, 0  ;;  %vm1935_vm2 = vcmp.eq.s32.totalorder %v8789_v34, 2  ;;  %v2265_v57 = vshrl.u32 %v10660_v37, %v2264_v47 }
 0x1b4   : > { %v6880_v38 = vadd.s32 4294967294, %v2214_v44  ;;  %vm2281_vm7 = vcmp.lt.s32.totalorder %v2262_v1, 1  ;;  %v6886_v19 = vadd.s32 4294967169, %v2356_v18  ;;  %7608 = vcosq.f32 %v8986_v45 }
 0x1b5   : > { %v2280_v20 = vor.u32 %v2279_v40, %v2278_v59  ;;  %vm2283_vm4 = vcmp.lt.s32.totalorder %v2262_v1, 3  ;;  %vm2284_vm5 = vcmp.lt.s32.totalorder %v2262_v1, 4  ;;  %vm1099_vm12 = vcmp.lt.s32.totalorder %v8677_v22, 2 }
 0x1b6   : > { %vm6881_vm9 = vcmp.lt.s32.totalorder %v6880_v38, 0  ;;  %v2286_v31 = vsel %vm2284_vm5, %v2274_v43, 2102212464  ;;  %v2289_v62 = vsel %vm2281_vm7, %v2268_v10, %v2271_v24  ;;  %v2290_v58 = vsel %vm2284_vm5, %v2277_v9, 920167782 }
 0x1b7   : > { %v2217_v49 = vsel %vm6881_vm9, 0, %v6880_v38  ;;  %v2285_v50 = vsel %vm2281_vm7, %v2265_v57, %v2268_v10  ;;  %v2287_v47 = vsel %vm2283_vm4, %v2271_v24, %v2286_v31  ;;  %v2291_v5 = vsel %vm2283_vm4, %v2274_v43, %v2290_v58 }
 0x1b8   : > { %vm1931_vm0 = vcmp.lt.s32.totalorder %v8789_v34, 2  ;;  %v2218_v40 = vsub.s32 32, %v2217_v49  ;;  %v2222_v59 = vsub.s32 4294967266, %v2217_v49  ;;  %vm2282_vm14 = vcmp.lt.s32.totalorder %v2262_v1, 2 }
 0x1b9   : > { %v2293_v14 = vsel %vm2281_vm7, %v2271_v24, %v2274_v43  ;;  %vm2148_vm6 = vcmp.lt.s32.totalorder %v8580_v52, 0  ;;  %v2219_v6 = vshll.u32 %v8968_v23, %v2217_v49  ;;  %v2292_v25 = vsel %vm2282_vm14, %v2289_v62, %v2291_v5  ;;  %v9009_v32 = vpop.eup %7604 }
 0x1ba   : > { %v2294_v18 = vsel %vm2284_vm5, %v2280_v20, 1326507024  ;;  %v2362_v21 = vadd.s32 1, %v6886_v19  ;;  %v2220_v61 = vshrl.u32 %v2202_v4, %v2218_v40  ;;  %v2223_v8 = vadd.s32 127, %v2222_v59 }
 0x1bb   : > { %v2288_v10 = vsel %vm2282_vm14, %v2285_v50, %v2287_v47  ;;  %v2295_v44 = vsel %vm2283_vm4, %v2277_v9, %v2294_v18  ;;  %v9013_v57 = vmul.u32.u64.low %v8991_v54, %v2292_v25  ;;  %v9014_v31 = vmul.u32.u64.high %v8991_v54, %v2292_v25, %v9013_v57 }
 0x1bc   : > { %v2296_v38 = vsel %vm2282_vm14, %v2293_v14, %v2295_v44  ;;  %vm2363_vm11 = vcmp.gt.s32.totalorder %v2362_v21, 0  ;;  %v10705_v43 = vand.u32 2147483647, %v8580_v52  ;;  %v2221_v24 = vor.u32 %v2220_v61, %v2219_v6 }
 0x1bd   : > { %v2224_v19 = vshll.u32 %v2223_v8, 23  ;;  %v9024_v4 = vmul.u32.u64.low %v8991_v54, %v2296_v38  ;;  %v9025_v20 = vmul.u32.u64.high %v8991_v54, %v2296_v38, %v9024_v4  ;;  %v10708_v1 = vxor.u32 2147483648, %v8892_v30 }
 0x1be   : > { %vm9019_vm15 = vcmp.le.f32.partialorder %v10705_v43, 0.7853982  ;;  %v10709_v62 = vxor.u32 2147483648, %v8847_v13  ;;  %v10618_v49 = vand.u32 2147483647, %v8794_v51  ;;  %v2364_v50 = vsel %vm2363_vm11, %v2362_v21, 0 }
 0x1bf   : > { %v1934_v9 = vsel %vm1932_vm1, %v8847_v13, %v10708_v1  ;;  %v10710_v47 = vsub.s32 4, %v8818_v41  ;;  %v2225_v40 = vor.u32 4788187, %v2224_v19  ;;  %v2232_v59 = vsub.s32 4, %v8925_v0 }
 0x1c0   : > { %v1937_v58 = vsel %vm1935_vm2, %v10709_v62, %v8892_v30  ;;  %v2366_v14 = vand.u32 31, %v2364_v50  ;;  %v9048_v13 = vsel %vm1099_vm12, %v8960_v55, %v8952_v27  ;;  %v9053_v30 = vsel %vm8911_vm8, 0, %v8965_v15 }
 0x1c1   : > { %v2130_v5 = vsel %vm2045_vm3, %v10710_v47, %v8818_v41  ;;  %v2304_v6 = vmul.u32 %v8991_v54, %v2288_v10  ;;  %v2307_v25 = vadd.s32 1, %v9014_v31  ;;  %v9057_v41 = vpop.eup %7606  ;;  %v2226_v18 = vand.u32 2147483647, %v2225_v40 }
 0x1c2   : > { %v2228_v21 = vcvt.s32.f32 %v2221_v24  ;;  %vm2306_vm10 = vc.u32 %v9025_v20, %v9013_v57  ;;  %v2367_v61 = vsub.s32 32, %v2366_v14  ;;  %v9063_v22 = vsel %vm1931_vm0, %v1934_v9, %v1937_v58  ;;  %v9072_v55 = vpop.eup %7608 }
 0x1c3   : > { %10711 = vst [vmem:[#allocation25_spill] sm:$0xff] %v9063_v22  ;;  %v9067_v7 = vsel %vm8937_vm13, 0, %v2130_v5  ;;  %v2308_v54 = vsel %vm2306_vm10, %v2307_v25, %v9014_v31  ;;  %v2359_v27 = vand.u32 8388607, %v10618_v49  ;;  %7610 = vsinq.f32 %v8986_v45 }
 0x1c4   : > { %v2229_v15 = vmul.f32 %v2228_v21, %v2226_v18  ;;  %v2233_v34 = vsel %vm2148_vm6, %v2232_v59, %v8925_v0  ;;  %v2309_v8 = vadd.s32 %v2308_v54, %v2304_v6  ;;  %v9079_v10 = vand.u32 3, %v9053_v30 }
 0x1c5   : > { %v2369_v48 = vshll.u32 %v10660_v37, %v2366_v14  ;;  %v2370_v44 = vshrl.u32 %v10658_v33, %v2367_v61  ;;  %v2372_v38 = vshll.u32 %v10658_v33, %v2366_v14  ;;  %v2373_v43 = vshrl.u32 %v10659_v17, %v2367_v61 }
 0x1c6   : > { %v2310_v31 = vadd.s32 536870912, %v2309_v8  ;;  %v2375_v45 = vshll.u32 %v10659_v17, %v2366_v14  ;;  %v2376_v24 = vshrl.u32 %v10646_v36, %v2367_v61  ;;  %v9088_v19 = vand.u32 3, %v9067_v7 }
 0x1c7   : > { %v9092_v0 = vsel %vm9019_vm15, 0, %v2233_v34  ;;  %v2360_v4 = vor.u32 8388608, %v2359_v27  ;;  %v2378_v1 = vshll.u32 %v10646_v36, %v2366_v14  ;;  %v2230_v62 = vxor.u32 2147483648, %v2229_v15 }
 0x1c8   : > { %v9096_v58 = vshrl.u32 %v2310_v31, 30  ;;  %v2458_v47 = vand.u32 2139095040, %v8872_v63  ;;  %v2365_v5 = vshrl.u32 %v2364_v50, 5  ;;  %v2379_v40 = vshrl.u32 %v10647_v12, %v2367_v61 }
 0x1c9   : > { %v2381_v59 = vshll.u32 %v10647_v12, %v2366_v14  ;;  %v2382_v6 = vshrl.u32 %v10648_v46, %v2367_v61  ;;  %v2371_v18 = vor.u32 %v2370_v44, %v2369_v48  ;;  %v2374_v21 = vor.u32 %v2373_v43, %v2372_v38 }
 0x1ca   : > { %v2312_v25 = vshll.u32 %v9096_v58, 30  ;;  %v2377_v54 = vor.u32 %v2376_v24, %v2375_v45  ;;  %v10620_v27 = vxor.u32 2147483648, %v9057_v41  ;;  %vm2038_vm8 = vcmp.eq.s32.totalorder %v9079_v10, 2 }
 0x1cb   : > { %v2380_v34 = vor.u32 %v2379_v40, %v2378_v1  ;;  %v2383_v31 = vor.u32 %v2382_v6, %v2381_v59  ;;  %v9105_v49 = vshll.u32 %v2360_v4, 8  ;;  %vm2035_vm3 = vcmp.eq.s32.totalorder %v9079_v10, 0 }
 0x1cc   : > { %v2231_v50 = vsel %vm2148_vm6, %v2230_v62, %v2229_v15  ;;  %v9110_v14 = vsub.s32 %v2309_v8, %v2312_v25  ;;  %v2368_v9 = vshrl.u32 %v10660_v37, %v2367_v61  ;;  %v2459_v48 = vshrl.u32 %v2458_v47, 23 }
 0x1cd   : > { %v10619_v44 = vxor.u32 2147483648, %v9072_v55  ;;  %vm2251_vm13 = vcmp.lt.s32.totalorder %v8591_v53, 0  ;;  %vm2384_vm1 = vcmp.lt.s32.totalorder %v2365_v5, 1  ;;  %vm2386_vm2 = vcmp.lt.s32.totalorder %v2365_v5, 3 }
 0x1ce   : > { %vm2387_vm7 = vcmp.lt.s32.totalorder %v2365_v5, 4  ;;  %vm2141_vm4 = vcmp.eq.s32.totalorder %v9088_v19, 2  ;;  %v2315_v38 = vsub.s32 0, %v9110_v14  ;;  %v2392_v45 = vsel %vm2384_vm1, %v2371_v18, %v2374_v21 }
 0x1cf   : > { %v2389_v43 = vsel %vm2387_vm7, %v2377_v54, 2102212464  ;;  %v2393_v15 = vsel %vm2387_vm7, %v2380_v34, 920167782  ;;  %vm2138_vm5 = vcmp.eq.s32.totalorder %v9088_v19, 0  ;;  %v2234_v61 = vsel %vm9019_vm15, %v8580_v52, %v2231_v50 }
 0x1d0   : > { %v2394_v8 = vsel %vm2386_vm2, %v2377_v54, %v2393_v15  ;;  %v2396_v24 = vsel %vm2384_vm1, %v2374_v21, %v2377_v54  ;;  %v2397_v4 = vsel %vm2387_vm7, %v2383_v31, 1326507024  ;;  %v10712_v1 = vand.u32 2147483647, %v8591_v53  ;;  %v9133_v23 = vpop.eup %7610 }
 0x1d1   : > { %v6883_v47 = vmin.u32 %v2315_v38, %v9110_v14  ;;  %v2335_v40 = vsub.s32 4, %v9096_v58  ;;  %vm2385_vm9 = vcmp.lt.s32.totalorder %v2365_v5, 2  ;;  %v2388_v59 = vsel %vm2384_vm1, %v2368_v9, %v2371_v18 }
 0x1d2   : > { %vm9126_vm12 = vcmp.le.f32.partialorder %v10712_v1, 0.7853982  ;;  %v2390_v6 = vsel %vm2386_vm2, %v2374_v21, %v2389_v43  ;;  %v2395_v25 = vsel %vm2385_vm9, %v2392_v45, %v2394_v8  ;;  %v2398_v54 = vsel %vm2386_vm2, %v2380_v34, %v2397_v4 }
 0x1d3   : > { %v6890_v31 = vadd.s32 4294967169, %v2459_v48  ;;  %vm2034_vm0 = vcmp.lt.s32.totalorder %v9079_v10, 2  ;;  %vm2137_vm14 = vcmp.lt.s32.totalorder %v9088_v19, 2  ;;  %v2317_v50 = vclz %v6883_v47 }
 0x1d4   : > { %v2399_v38 = vsel %vm2385_vm9, %v2396_v24, %v2398_v54  ;;  %v9142_v15 = vmul.u32.u64.low %v9105_v49, %v2395_v25  ;;  %v9143_v1 = vmul.u32.u64.high %v9105_v49, %v2395_v25, %v9142_v15  ;;  %7612 = vcosq.f32 %v2234_v61 }
 0x1d5   : > { %v9147_v9 = vmul.u32.u64.low %v9105_v49, %v2399_v38  ;;  %v9148_v18 = vmul.u32.u64.high %v9105_v49, %v2399_v38, %v9147_v9  ;;  %v2465_v21 = vadd.s32 1, %v6890_v31  ;;  %v10715_v34 = vxor.u32 2147483648, %v9009_v32 }
 0x1d6   : > { %v10621_v43 = vxor.u32 2147483648, %v9133_v23  ;;  %v9157_v45 = vand.u32 3, %v9092_v0  ;;  %v6884_v8 = vadd.s32 4294967294, %v2317_v50  ;;  %v2037_v24 = vsel %vm2035_vm3, %v9009_v32, %v10620_v27 }
 0x1d7   : > { %v2040_v48 = vsel %vm2038_vm8, %v10715_v34, %v9057_v41  ;;  %v2391_v4 = vsel %vm2385_vm9, %v2388_v59, %v2390_v6  ;;  %v10622_v47 = vand.u32 2147483647, %v8872_v63  ;;  %vm2466_vm6 = vcmp.gt.s32.totalorder %v2465_v21, 0 }
 0x1d8   : > { %vm6885_vm11 = vcmp.lt.s32.totalorder %v6884_v8, 0  ;;  %v2336_v25 = vsel %vm2251_vm13, %v2335_v40, %v9096_v58  ;;  %v2410_v54 = vadd.s32 1, %v9143_v1  ;;  %v2467_v31 = vsel %vm2466_vm6, %v2465_v21, 0 }
 0x1d9   : > { %v2143_v50 = vsel %vm2141_vm4, %v10619_v44, %v9133_v23  ;;  %v2305_v5 = vadd.s32 %v9013_v57, %v9025_v20  ;;  %v2320_v59 = vsel %vm6885_vm11, 0, %v6884_v8  ;;  %vm2409_vm15 = vc.u32 %v9148_v18, %v9142_v15 }
 0x1da   : > { %v2140_v58 = vsel %vm2138_vm5, %v9072_v55, %v10621_v43  ;;  %v2321_v40 = vsub.s32 32, %v2320_v59  ;;  %v2325_v6 = vsub.s32 4294967266, %v2320_v59  ;;  %v2407_v38 = vmul.u32 %v9105_v49, %v2391_v4 }
 0x1db   : > { %v9187_v9 = vsel %vm9126_vm12, 0, %v2336_v25  ;;  %v2411_v57 = vsel %vm2409_vm15, %v2410_v54, %v9143_v1  ;;  %v2462_v20 = vand.u32 8388607, %v10622_v47  ;;  %v2469_v21 = vand.u32 31, %v2467_v31 }
 0x1dc   : > { %v2322_v34 = vshll.u32 %v9110_v14, %v2320_v59  ;;  %v2323_v8 = vshrl.u32 %v2305_v5, %v2321_v40  ;;  %v2326_v44 = vadd.s32 127, %v2325_v6  ;;  %v2412_v27 = vadd.s32 %v2411_v57, %v2407_v38 }
 0x1dd   : > { %v9195_v43 = vsel %vm2034_vm0, %v2037_v24, %v2040_v48  ;;  %v9199_v49 = vsel %vm2137_vm14, %v2140_v58, %v2143_v50  ;;  %7614 = vsinq.f32 %v2234_v61  ;;  %v2470_v4 = vsub.s32 32, %v2469_v21 }
 0x1de   : > { %v2324_v1 = vor.u32 %v2323_v8, %v2322_v34  ;;  %v2327_v25 = vshll.u32 %v2326_v44, 23  ;;  %v2413_v54 = vadd.s32 536870912, %v2412_v27  ;;  %v2472_v47 = vshll.u32 %v10660_v37, %v2469_v21 }
 0x1df   : > { %v9203_v14 = vand.u32 3, %v9187_v9  ;;  %v2473_v5 = vshrl.u32 %v10658_v33, %v2470_v4  ;;  %v2475_v10 = vshll.u32 %v10658_v33, %v2469_v21  ;;  %v2476_v48 = vshrl.u32 %v10659_v17, %v2470_v4 }
 0x1e0   : > { %v2328_v24 = vor.u32 4788187, %v2327_v25  ;;  %v2414_v19 = vshrl.u32 %v2413_v54, 30  ;;  %v2463_v50 = vor.u32 8388608, %v2462_v20  ;;  %v2478_v61 = vshll.u32 %v10659_v17, %v2469_v21 }
 0x1e1   : > { %v2331_v59 = vcvt.s32.f32 %v2324_v1  ;;  %v2468_v58 = vshrl.u32 %v2467_v31, 5  ;;  %v2479_v44 = vshrl.u32 %v10646_v36, %v2470_v4  ;;  %v2481_v40 = vshll.u32 %v10646_v36, %v2469_v21  ;;  %v9211_v6 = vpop.eup %7612 }
 0x1e2   : > { %v2329_v38 = vand.u32 2147483647, %v2328_v24  ;;  %v2415_v57 = vshll.u32 %v2414_v19, 30  ;;  %v2474_v34 = vor.u32 %v2473_v5, %v2472_v47  ;;  %v2482_v8 = vshrl.u32 %v10647_v12, %v2470_v4 }
 0x1e3   : > { %v2477_v39 = vor.u32 %v2476_v48, %v2475_v10  ;;  %v2480_v11 = vor.u32 %v2479_v44, %v2478_v61  ;;  %v2484_v25 = vshll.u32 %v10647_v12, %v2469_v21  ;;  %v2485_v20 = vshrl.u32 %v10648_v46, %v2470_v4 }
 0x1e4   : > { %v2332_v54 = vmul.f32 %v2331_v59, %v2329_v38  ;;  %vm2354_vm10 = vcmp.lt.s32.totalorder %v8794_v51, 0  ;;  %v9217_v31 = vsub.s32 %v2412_v27, %v2415_v57  ;;  %v2483_v1 = vor.u32 %v2482_v8, %v2481_v40 }
 0x1e5   : > { %v2471_v47 = vshrl.u32 %v10660_v37, %v2470_v4  ;;  %v9222_v5 = vshll.u32 %v2463_v50, 8  ;;  %v2561_v10 = vand.u32 2139095040, %v8876_v2  ;;  %vm2487_vm8 = vcmp.lt.s32.totalorder %v2468_v58, 1 }
 0x1e6   : > { %v2333_v48 = vxor.u32 2147483648, %v2332_v54  ;;  %v2418_v21 = vsub.s32 0, %v9217_v31  ;;  %vm2490_vm3 = vcmp.lt.s32.totalorder %v2468_v58, 4  ;;  %vm2244_vm1 = vcmp.eq.s32.totalorder %v9157_v45, 2 }
 0x1e7   : > { %v2486_v27 = vor.u32 %v2485_v20, %v2484_v25  ;;  %v2492_v61 = vsel %vm2490_vm3, %v2480_v11, 2102212464  ;;  %v2495_v59 = vsel %vm2487_vm8, %v2474_v34, %v2477_v39  ;;  %v2496_v44 = vsel %vm2490_vm3, %v2483_v1, 920167782 }
 0x1e8   : > { %vm2241_vm2 = vcmp.eq.s32.totalorder %v9157_v45, 0  ;;  %v2334_v4 = vsel %vm2251_vm13, %v2333_v48, %v2332_v54  ;;  %v10716_v50 = vand.u32 2147483647, %v8794_v51  ;;  %v6887_v38 = vmin.u32 %v2418_v21, %v9217_v31 }
 0x1e9   : > { %v2438_v57 = vsub.s32 4, %v2414_v19  ;;  %vm2489_vm4 = vcmp.lt.s32.totalorder %v2468_v58, 3  ;;  %v2337_v8 = vsel %vm9126_vm12, %v8591_v53, %v2334_v4  ;;  %vm2488_vm5 = vcmp.lt.s32.totalorder %v2468_v58, 2 }
 0x1ea   : > { %vm9235_vm7 = vcmp.le.f32.partialorder %v10716_v50, 0.7853982  ;;  %v2491_v25 = vsel %vm2487_vm8, %v2471_v47, %v2474_v34  ;;  %v2497_v20 = vsel %vm2489_vm4, %v2480_v11, %v2496_v44  ;;  %v9245_v54 = vpop.eup %7614  ;;  %v2420_v48 = vclz %v6887_v38 }
 0x1eb   : > { %v2493_v50 = vsel %vm2489_vm4, %v2477_v39, %v2492_v61  ;;  %v2498_v24 = vsel %vm2488_vm5, %v2495_v59, %v2497_v20  ;;  %v2499_v21 = vsel %vm2487_vm8, %v2477_v39, %v2480_v11  ;;  %7616 = vcosq.f32 %v2337_v8 }
 0x1ec   : > { %v2500_v22 = vsel %vm2490_vm3, %v2486_v27, 1326507024  ;;  %v9252_v62 = vmul.u32.u64.low %v9222_v5, %v2498_v24  ;;  %v9253_v4 = vmul.u32.u64.high %v9222_v5, %v2498_v24, %v9252_v62  ;;  %vm1097_vm13 = vweird.f32 %v7842_v28 }
 0x1ed   : > { %vm2032_vm12 = vweird.f32 %v8577_v42  ;;  %7618 = vsinq.f32 %v2337_v8  ;;  %v6888_v34 = vadd.s32 4294967294, %v2420_v48  ;;  %v2501_v47 = vsel %vm2489_vm4, %v2483_v1, %v2500_v22 }
 0x1ee   : > { %v2562_v61 = vshrl.u32 %v2561_v10, 23  ;;  %vm2135_vm9 = vweird.f32 %v8623_v3  ;;  %v10625_v11 = vxor.u32 2147483648, %v9245_v54  ;;  %v2439_v39 = vsel %vm2354_vm10, %v2438_v57, %v2414_v19 }
 0x1ef   : > { %v2494_v27 = vsel %vm2488_vm5, %v2491_v25, %v2493_v50  ;;  %v2502_v24 = vsel %vm2488_vm5, %v2499_v21, %v2501_v47  ;;  %vm6889_vm0 = vcmp.lt.s32.totalorder %v6888_v34, 0  ;;  %v2408_v22 = vadd.s32 %v9142_v15, %v9148_v18 }
 0x1f0   : > { %v9265_v59 = vmul.u32.u64.low %v9222_v5, %v2502_v24  ;;  %v9266_v44 = vmul.u32.u64.high %v9222_v5, %v2502_v24, %v9265_v59  ;;  %v6894_v38 = vadd.s32 4294967169, %v2562_v61  ;;  %v2423_v1 = vsel %vm6889_vm0, 0, %v6888_v34 }
 0x1f1   : > { %v2513_v10 = vadd.s32 1, %v9253_v4  ;;  %v10719_v8 = vand.u32 2147483647, %v8876_v2  ;;  %v10720_v19 = vxor.u32 2147483648, %v9211_v6  ;;  %v2424_v57 = vsub.s32 32, %v2423_v1 }
 0x1f2   : > { %v2428_v25 = vsub.s32 4294967266, %v2423_v1  ;;  %v2568_v48 = vadd.s32 1, %v6894_v38  ;;  %v2243_v15 = vsel %vm2241_vm2, %v9211_v6, %v10625_v11  ;;  %v9285_v18 = vsel %vm9235_vm7, 0, %v2439_v39 }
 0x1f3   : > { %v2565_v20 = vand.u32 8388607, %v10719_v8  ;;  %v2246_v58 = vsel %vm2244_vm1, %v10720_v19, %v9245_v54  ;;  %v2510_v50 = vmul.u32 %v9222_v5, %v2494_v27  ;;  %v10626_v21 = vand.u32 2147483647, %v8880_v26 }
 0x1f4   : > { %v2425_v34 = vshll.u32 %v9217_v31, %v2423_v1  ;;  %v2426_v47 = vshrl.u32 %v2408_v22, %v2424_v57  ;;  %v2429_v61 = vadd.s32 127, %v2428_v25  ;;  %vm2512_vm14 = vc.u32 %v9266_v44, %v9252_v62 }
 0x1f5   : > { %v2514_v24 = vsel %vm2512_vm14, %v2513_v10, %v9253_v4  ;;  %v2566_v59 = vor.u32 8388608, %v2565_v20  ;;  %vm2569_vm6 = vcmp.gt.s32.totalorder %v2568_v48, 0  ;;  %v2664_v38 = vand.u32 2139095040, %v8880_v26 }
 0x1f6   : > { %v2427_v8 = vor.u32 %v2426_v47, %v2425_v34  ;;  %v2430_v19 = vshll.u32 %v2429_v61, 23  ;;  %v2515_v39 = vadd.s32 %v2514_v24, %v2510_v50  ;;  %v2570_v11 = vsel %vm2569_vm6, %v2568_v48, 0 }
 0x1f7   : > { %v9296_v5 = vsel %vm1097_vm13, nan, %v9048_v13  ;;  %v9301_v31 = vsel %vm2032_vm12, nan, %v9195_v43  ;;  %vm2240_vm11 = vcmp.lt.s32.totalorder %v9157_v45, 2  ;;  %v2572_v4 = vand.u32 31, %v2570_v11 }
 0x1f8   : > { %10721 = vst [vmem:[#allocation26_spill] sm:$0xff] %v9296_v5  ;;  %10722 = vst [vmem:[#allocation27_spill] sm:$0xff] %v9301_v31  ;;  %v9307_v27 = vsel %vm2135_vm9, nan, %v9199_v49  ;;  %v9309_v22 = vsel %vm2240_vm11, %v2243_v15, %v2246_v58  ;;  %v2431_v1 = vor.u32 4788187, %v2430_v19  ;;  %v2516_v10 = vadd.s32 536870912, %v2515_v39  ;;  %v9318_v57 = vpop.eup %7616 }
 0x1f9   : > { %10723 = vst [vmem:[#allocation28_spill] sm:$0xff] %v9307_v27  ;;  %vm2344_vm15 = vcmp.eq.s32.totalorder %v9203_v14, 0  ;;  %vm2347_vm8 = vcmp.eq.s32.totalorder %v9203_v14, 2  ;;  %v9314_v13 = vand.u32 3, %v9285_v18  ;;  %v2573_v43 = vsub.s32 32, %v2572_v4 }
 0x1fa   : > { %v9316_v20 = vshll.u32 %v2566_v59, 8  ;;  %v2665_v45 = vshrl.u32 %v2664_v38, 23  ;;  %v2432_v25 = vand.u32 2147483647, %v2431_v1  ;;  %v2434_v49 = vcvt.s32.f32 %v2427_v8  ;;  %v9325_v15 = vpop.eup %7618 }
 0x1fb   : > { %vm2457_vm3 = vcmp.lt.s32.totalorder %v8872_v63, 0  ;;  %v2517_v58 = vshrl.u32 %v2516_v10, 30  ;;  %v9323_v48 = vand.u32 8388607, %v10626_v21  ;;  %v9328_v50 = vadd.s32 %v9252_v62, %v9266_v44 }
 0x1fc   : > { %v9330_v34 = vshrl.u32 %v2570_v11, 5  ;;  %v2575_v47 = vshll.u32 %v10660_v37, %v2572_v4  ;;  %v2576_v61 = vshrl.u32 %v10658_v33, %v2573_v43  ;;  %v2435_v24 = vmul.f32 %v2434_v49, %v2432_v25 }
 0x1fd   : > { %v2518_v59 = vshll.u32 %v2517_v58, 30  ;;  %v2578_v38 = vshll.u32 %v10658_v33, %v2572_v4  ;;  %v2579_v8 = vshrl.u32 %v10659_v17, %v2573_v43  ;;  %v2581_v19 = vshll.u32 %v10659_v17, %v2572_v4 }
 0x1fe   : > { %v2582_v1 = vshrl.u32 %v10646_v36, %v2573_v43  ;;  %v2584_v10 = vshll.u32 %v10646_v36, %v2572_v4  ;;  %v6898_v62 = vadd.s32 4294967169, %v2665_v45  ;;  %v2436_v21 = vxor.u32 2147483648, %v2435_v24 }
 0x1ff   : > { %v9341_v5 = vsub.s32 %v2515_v39, %v2518_v59  ;;  %v2541_v25 = vsub.s32 4, %v2517_v58  ;;  %v2574_v49 = vshrl.u32 %v10660_v37, %v2573_v43  ;;  %v2577_v28 = vor.u32 %v2576_v61, %v2575_v47 }
 0x200   : > { %v2585_v56 = vshrl.u32 %v10647_v12, %v2573_v43  ;;  %v2437_v35 = vsel %vm2354_vm10, %v2436_v21, %v2435_v24  ;;  %v2580_v29 = vor.u32 %v2579_v8, %v2578_v38  ;;  %v2587_v45 = vshll.u32 %v10647_v12, %v2572_v4 }
 0x201   : > { %v2521_v31 = vsub.s32 0, %v9341_v5  ;;  %v2440_v44 = vsel %vm9235_vm7, %v8794_v51, %v2437_v35  ;;  %v2583_v39 = vor.u32 %v2582_v1, %v2581_v19  ;;  %v2588_v11 = vshrl.u32 %v10648_v46, %v2573_v43 }
 0x202   : > { %v2586_v59 = vor.u32 %v2585_v56, %v2584_v10  ;;  %vm2343_vm1 = vcmp.lt.s32.totalorder %v9203_v14, 2  ;;  %v10724_v47 = vxor.u32 2147483648, %v9325_v15  ;;  %v10725_v61 = vxor.u32 2147483648, %v9318_v57 }
 0x203   : > { %7620 = vcosq.f32 %v2440_v44  ;;  %v10726_v35 = vand.u32 2147483647, %v8872_v63  ;;  %v6891_v40 = vmin.u32 %v2521_v31, %v9341_v5  ;;  %v2542_v43 = vsel %vm2457_vm3, %v2541_v25, %v2517_v58 }
 0x204   : > { %v2346_v21 = vsel %vm2344_vm15, %v9318_v57, %v10724_v47  ;;  %v2349_v4 = vsel %vm2347_vm8, %v10725_v61, %v9325_v15  ;;  %7622 = vsinq.f32 %v2440_v44  ;;  %v2589_v24 = vor.u32 %v2588_v11, %v2587_v45 }
 0x205   : > { %vm9366_vm10 = vcmp.le.f32.partialorder %v10726_v35, 0.7853982  ;;  %vm2590_vm2 = vcmp.lt.s32.totalorder %v9330_v34, 1  ;;  %vm2238_vm7 = vweird.f32 %v8580_v52  ;;  %v2523_v38 = vclz %v6891_v40 }
 0x206   : > { %vm2591_vm4 = vcmp.lt.s32.totalorder %v9330_v34, 2  ;;  %vm2592_vm5 = vcmp.lt.s32.totalorder %v9330_v34, 3  ;;  %vm2593_vm0 = vcmp.lt.s32.totalorder %v9330_v34, 4  ;;  %v2598_v19 = vsel %vm2590_vm2, %v2577_v28, %v2580_v29 }
 0x207   : > { %v2595_v8 = vsel %vm2593_vm0, %v2583_v39, 2102212464  ;;  %v2599_v1 = vsel %vm2593_vm0, %v2586_v59, 920167782  ;;  %v2602_v31 = vsel %vm2590_vm2, %v2580_v29, %v2583_v39  ;;  %vm2341_vm14 = vweird.f32 %v8591_v53 }
 0x208   : > { %v6892_v10 = vadd.s32 4294967294, %v2523_v38  ;;  %v2594_v58 = vsel %vm2590_vm2, %v2574_v49, %v2577_v28  ;;  %v2600_v11 = vsel %vm2592_vm5, %v2583_v39, %v2599_v1  ;;  %v2603_v44 = vsel %vm2593_vm0, %v2589_v24, 1326507024 }
 0x209   : > { %v2596_v25 = vsel %vm2592_vm5, %v2580_v29, %v2595_v8  ;;  %v2601_v45 = vsel %vm2591_vm4, %v2598_v19, %v2600_v11  ;;  %v2604_v47 = vsel %vm2592_vm5, %v2586_v59, %v2603_v44  ;;  %v2671_v61 = vadd.s32 1, %v6898_v62 }
 0x20a   : > { %vm6893_vm6 = vcmp.lt.s32.totalorder %v6892_v10, 0  ;;  %v2605_v35 = vsel %vm2591_vm4, %v2602_v31, %v2604_v47  ;;  %v9384_v40 = vmul.u32.u64.low %v9316_v20, %v2601_v45  ;;  %v9385_v27 = vmul.u32.u64.high %v9316_v20, %v2601_v45, %v9384_v40 }
 0x20b   : > { %v2526_v60 = vsel %vm6893_vm6, 0, %v6892_v10  ;;  %v9388_v38 = vmul.u32.u64.low %v9316_v20, %v2605_v35  ;;  %v9389_v28 = vmul.u32.u64.high %v9316_v20, %v2605_v35, %v9388_v38  ;;  %v2669_v29 = vor.u32 8388608, %v9323_v48 }
 0x20c   : > { %v2527_v49 = vsub.s32 32, %v2526_v60  ;;  %v2531_v39 = vsub.s32 4294967266, %v2526_v60  ;;  %v2597_v62 = vsel %vm2591_vm4, %v2594_v58, %v2596_v25  ;;  %vm2672_vm11 = vcmp.gt.s32.totalorder %v2671_v61, 0 }
 0x20d   : > { %v2350_v59 = vsel %vm2343_vm1, %v2346_v21, %v2349_v4  ;;  %v9398_v24 = vsel %vm9366_vm10, 0, %v2542_v43  ;;  %v2673_v8 = vsel %vm2672_vm11, %v2671_v61, 0  ;;  %v2857_v19 = vadd.s32 3, %v9053_v30 }
 0x20e   : > { %v2528_v1 = vshll.u32 %v9341_v5, %v2526_v60  ;;  %v2529_v48 = vshrl.u32 %v9328_v50, %v2527_v49  ;;  %v2532_v31 = vadd.s32 127, %v2531_v39  ;;  %v2616_v10 = vadd.s32 1, %v9385_v27 }
 0x20f   : > { %v9407_v34 = vsel %vm2238_vm7, nan, %v9309_v22  ;;  %v2613_v14 = vmul.u32 %v9316_v20, %v2597_v62  ;;  %vm2615_vm15 = vc.u32 %v9389_v28, %v9384_v40  ;;  %v2675_v21 = vand.u32 31, %v2673_v8 }
 0x210   : > { %v2530_v4 = vor.u32 %v2529_v48, %v2528_v1  ;;  %v2533_v43 = vshll.u32 %v2532_v31, 23  ;;  %v2617_v30 = vsel %vm2615_vm15, %v2616_v10, %v9385_v27  ;;  %v9412_v60 = vshll.u32 %v2669_v29, 8  ;;  %v9414_v5 = vpop.eup %7620 }
 0x211   : > { %v9418_v50 = vsel %vm2341_vm14, nan, %v2350_v59  ;;  %vm2447_vm8 = vcmp.eq.s32.totalorder %v9314_v13, 0  ;;  %vm2450_vm1 = vcmp.eq.s32.totalorder %v9314_v13, 2  ;;  %v9423_v22 = vand.u32 3, %v9398_v24  ;;  %v9425_v11 = vpop.eup %7622 }
 0x212   : > { %v2618_v20 = vadd.s32 %v2617_v30, %v2613_v14  ;;  %v2676_v58 = vsub.s32 32, %v2675_v21  ;;  %v2534_v27 = vor.u32 4788187, %v2533_v43  ;;  %v2678_v44 = vshll.u32 %v10660_v37, %v2675_v21 }
 0x213   : > { %v9428_v25 = vand.u32 3, %v2857_v19  ;;  %v9431_v45 = vadd.s32 3, %v9067_v7  ;;  %v2537_v47 = vcvt.s32.f32 %v2530_v4  ;;  %v2681_v38 = vshll.u32 %v10658_v33, %v2675_v21 }
 0x214   : > { %v2619_v61 = vadd.s32 536870912, %v2618_v20  ;;  %v2679_v35 = vshrl.u32 %v10658_v33, %v2676_v58  ;;  %v2535_v29 = vand.u32 2147483647, %v2534_v27  ;;  %v2682_v49 = vshrl.u32 %v10659_v17, %v2676_v58 }
 0x215   : > { %v2684_v39 = vshll.u32 %v10659_v17, %v2675_v21  ;;  %v2685_v62 = vshrl.u32 %v10646_v36, %v2676_v58  ;;  %v2674_v1 = vshrl.u32 %v2673_v8, 5  ;;  %v2687_v19 = vshll.u32 %v10646_v36, %v2675_v21 }
 0x216   : > { %v2620_v59 = vshrl.u32 %v2619_v61, 30  ;;  %v9440_v7 = vadd.s32 3, %v9092_v0  ;;  %v2448_v48 = vxor.u32 2147483648, %v9425_v11  ;;  %v2451_v31 = vxor.u32 2147483648, %v9414_v5 }
 0x217   : > { %v2538_v10 = vmul.f32 %v2537_v47, %v2535_v29  ;;  %vm2560_vm2 = vcmp.lt.s32.totalorder %v8876_v2, 0  ;;  %v9446_v33 = vadd.s32 %v9384_v40, %v9389_v28  ;;  %v2680_v14 = vor.u32 %v2679_v35, %v2678_v44 }
 0x218   : > { %v2621_v17 = vshll.u32 %v2620_v59, 30  ;;  %v2683_v4 = vor.u32 %v2682_v49, %v2681_v38  ;;  %v2688_v8 = vshrl.u32 %v10647_v12, %v2676_v58  ;;  %v2686_v36 = vor.u32 %v2685_v62, %v2684_v39 }
 0x219   : > { %v2539_v43 = vxor.u32 2147483648, %v2538_v10  ;;  %v2690_v0 = vshll.u32 %v10647_v12, %v2675_v21  ;;  %v2691_v30 = vshrl.u32 %v10648_v46, %v2676_v58  ;;  %v2677_v47 = vshrl.u32 %v10660_v37, %v2676_v58 }
 0x21a   : > { %v9451_v27 = vsub.s32 %v2618_v20, %v2621_v17  ;;  %v2689_v61 = vor.u32 %v2688_v8, %v2687_v19  ;;  %vm2693_vm4 = vcmp.lt.s32.totalorder %v2674_v1, 1  ;;  %vm2446_vm5 = vcmp.lt.s32.totalorder %v9314_v13, 2 }
 0x21b   : > { %v2449_v40 = vsel %vm2447_vm8, %v9414_v5, %v2448_v48  ;;  %v2452_v12 = vsel %vm2450_vm1, %v2451_v31, %v9425_v11  ;;  %v2540_v46 = vsel %vm2457_vm3, %v2539_v43, %v2538_v10  ;;  %v2644_v37 = vsub.s32 4, %v2620_v59 }
 0x21c   : > { %v2543_v28 = vsel %vm9366_vm10, %v8872_v63, %v2540_v46  ;;  %v10729_v21 = vand.u32 2147483647, %v8876_v2  ;;  %v2624_v58 = vsub.s32 0, %v9451_v27  ;;  %v2692_v44 = vor.u32 %v2691_v30, %v2690_v0 }
 0x21d   : > { %vm2696_vm6 = vcmp.lt.s32.totalorder %v2674_v1, 4  ;;  %7624 = vcosq.f32 %v2543_v28  ;;  %v2701_v38 = vsel %vm2693_vm4, %v2680_v14, %v2683_v4  ;;  %vm2695_vm3 = vcmp.lt.s32.totalorder %v2674_v1, 3 }
 0x21e   : > { %vm9472_vm0 = vcmp.le.f32.partialorder %v10729_v21, 0.7853982  ;;  %v2698_v35 = vsel %vm2696_vm6, %v2686_v36, 2102212464  ;;  %v2702_v29 = vsel %vm2696_vm6, %v2689_v61, 920167782  ;;  %7626 = vsinq.f32 %v2543_v28 }
 0x21f   : > { %v6895_v56 = vmin.u32 %v2624_v58, %v9451_v27  ;;  %v2697_v49 = vsel %vm2693_vm4, %v2677_v47, %v2680_v14  ;;  %vm2694_vm10 = vcmp.lt.s32.totalorder %v2674_v1, 2  ;;  %v2699_v39 = vsel %vm2695_vm3, %v2683_v4, %v2698_v35 }
 0x220   : > { %v2703_v62 = vsel %vm2695_vm3, %v2686_v36, %v2702_v29  ;;  %v2705_v19 = vsel %vm2693_vm4, %v2683_v4, %v2686_v36  ;;  %v2645_v17 = vsel %vm2560_vm2, %v2644_v37, %v2620_v59  ;;  %v2706_v43 = vsel %vm2696_vm6, %v2692_v44, 1326507024 }
 0x221   : > { %v2626_v10 = vclz %v6895_v56  ;;  %v2704_v8 = vsel %vm2694_vm10, %v2701_v38, %v2703_v62  ;;  %v2700_v0 = vsel %vm2694_vm10, %v2697_v49, %v2699_v39  ;;  %v2707_v30 = vsel %vm2695_vm3, %v2689_v61, %v2706_v43 }
 0x222   : > { %v9487_v46 = vmul.u32.u64.low %v9412_v60, %v2704_v8  ;;  %v9488_v28 = vmul.u32.u64.high %v9412_v60, %v2704_v8, %v9487_v46  ;;  %v2708_v47 = vsel %vm2694_vm10, %v2705_v19, %v2707_v30  ;;  %vm2860_vm11 = vcmp.eq.s32.totalorder %v9428_v25, 0 }
 0x223   : > { %v6896_v14 = vadd.s32 4294967294, %v2626_v10  ;;  %vm2863_vm15 = vcmp.eq.s32.totalorder %v9428_v25, 2  ;;  %v9494_v4 = vmul.u32.u64.low %v9412_v60, %v2708_v47  ;;  %v9495_v36 = vmul.u32.u64.high %v9412_v60, %v2708_v47, %v9494_v4 }
 0x224   : > { %v10732_v59 = vxor.u32 2147483648, %v9057_v41  ;;  %v10733_v61 = vxor.u32 2147483648, %v9009_v32  ;;  %v2453_v21 = vsel %vm2446_vm5, %v2449_v40, %v2452_v12  ;;  %vm2553_vm8 = vcmp.eq.s32.totalorder %v9423_v22, 2 }
 0x225   : > { %vm6897_vm1 = vcmp.lt.s32.totalorder %v6896_v14, 0  ;;  %vm2859_vm4 = vcmp.lt.s32.totalorder %v9428_v25, 2  ;;  %v2962_v58 = vand.u32 3, %v9431_v45  ;;  %vm2550_vm6 = vcmp.eq.s32.totalorder %v9423_v22, 0 }
 0x226   : > { %v2862_v1 = vsel %vm2860_vm11, %v9009_v32, %v10732_v59  ;;  %v2865_v37 = vsel %vm2863_vm15, %v10733_v61, %v9057_v41  ;;  %v2629_v44 = vsel %vm6897_vm1, 0, %v6896_v14  ;;  %v9511_v35 = vsel %vm9472_vm0, 0, %v2645_v17 }
 0x227   : > { %v2719_v32 = vadd.s32 1, %v9488_v28  ;;  %v3066_v41 = vand.u32 3, %v9440_v7  ;;  %vm2444_vm5 = vweird.f32 %v8794_v51  ;;  %v2630_v13 = vsub.s32 32, %v2629_v44  ;;  %v10745_v51 = vld [vmem:[#allocation28_spill] sm:$0xff] }
 0x228   : > { %v2634_v40 = vsub.s32 4294967266, %v2629_v44  ;;  %v2716_v12 = vmul.u32 %v9412_v60, %v2700_v0  ;;  %v2866_v25 = vsel %vm2859_vm4, %v2862_v1, %v2865_v37  ;;  %v2631_v45 = vshll.u32 %v9451_v27, %v2629_v44 }
 0x229   : > { %vm2718_vm3 = vc.u32 %v9495_v36, %v9487_v46  ;;  %vm2964_vm10 = vcmp.eq.s32.totalorder %v2962_v58, 0  ;;  %v3169_v38 = vadd.s32 3, %v9187_v9  ;;  %v2632_v29 = vshrl.u32 %v9446_v33, %v2630_v13 }
 0x22a   : > { %v2635_v56 = vadd.s32 127, %v2634_v40  ;;  %v2720_v7 = vsel %vm2718_vm3, %v2719_v32, %v9488_v28  ;;  %vm2967_vm11 = vcmp.eq.s32.totalorder %v2962_v58, 2  ;;  %v10734_v39 = vxor.u32 2147483648, %v9133_v23  ;;  %v9529_v19 = vpop.eup %7624 }
 0x22b   : > { %v2721_v49 = vadd.s32 %v2720_v7, %v2716_v12  ;;  %v10735_v27 = vxor.u32 2147483648, %v9072_v55  ;;  %vm3068_vm15 = vcmp.eq.s32.totalorder %v3066_v41, 0  ;;  %v2633_v10 = vor.u32 %v2632_v29, %v2631_v45  ;;  %v9535_v8 = vpop.eup %7626 }
 0x22c   : > { %v2966_v60 = vsel %vm2964_vm10, %v9072_v55, %v10734_v39  ;;  %v2636_v9 = vshll.u32 %v2635_v56, 23  ;;  %vm2663_vm1 = vcmp.lt.s32.totalorder %v8880_v26, 0  ;;  %vm2963_vm4 = vcmp.lt.s32.totalorder %v2962_v58, 2 }
 0x22d   : > { %v2969_v62 = vsel %vm2967_vm11, %v10735_v27, %v9133_v23  ;;  %v10736_v33 = vxor.u32 2147483648, %v9245_v54  ;;  %vm2547_vm3 = vweird.f32 %v8872_v63  ;;  %v2554_v43 = vxor.u32 2147483648, %v9529_v19 }
 0x22e   : > { %v2722_v55 = vadd.s32 536870912, %v2721_v49  ;;  %vm3067_vm10 = vcmp.lt.s32.totalorder %v3066_v41, 2  ;;  %vm3071_vm11 = vcmp.eq.s32.totalorder %v3066_v41, 2  ;;  %v2551_v23 = vxor.u32 2147483648, %v9535_v8 }
 0x22f   : > { %v3070_v17 = vsel %vm3068_vm15, %v9211_v6, %v10736_v33  ;;  %v2637_v0 = vor.u32 4788187, %v2636_v9  ;;  %v2970_v30 = vsel %vm2963_vm4, %v2966_v60, %v2969_v62  ;;  %v10737_v28 = vxor.u32 2147483648, %v9211_v6 }
 0x230   : > { %v2555_v47 = vsel %vm2553_vm8, %v2554_v43, %v9535_v8  ;;  %v2640_v4 = vcvt.s32.f32 %v2633_v10  ;;  %v10738_v59 = vand.u32 2147483647, %v8880_v26  ;;  %v2723_v61 = vshrl.u32 %v2722_v55, 30  ;;  %v10743_v55 = vld [vmem:[#allocation6_spill] sm:$0xff] }
 0x231   : > { %v3073_v14 = vsel %vm3071_vm11, %v10737_v28, %v9245_v54  ;;  %v2552_v6 = vsel %vm2550_vm6, %v9529_v19, %v2551_v23  ;;  %v2638_v54 = vand.u32 2147483647, %v2637_v0  ;;  %v3170_v58 = vand.u32 3, %v3169_v38 }
 0x232   : > { %vm9550_vm15 = vcmp.le.f32.partialorder %v10738_v59, 0.7853982  ;;  %v3074_v37 = vsel %vm3067_vm10, %v3070_v17, %v3073_v14  ;;  %v3273_v44 = vadd.s32 3, %v9285_v18  ;;  %v9560_v32 = vsel %vm2444_vm5, nan, %v2453_v21 }
 0x233   : > { %vm2549_vm8 = vcmp.lt.s32.totalorder %v9423_v22, 2  ;;  %v2724_v41 = vshll.u32 %v2723_v61, 30  ;;  %v2747_v13 = vsub.s32 4, %v2723_v61  ;;  %v2641_v40 = vmul.f32 %v2640_v4, %v2638_v54 }
 0x234   : > { %v9564_v12 = vand.u32 3, %v9511_v35  ;;  %v2717_v45 = vadd.s32 %v9487_v46, %v9495_v36  ;;  %v9570_v38 = vsel %vm2032_vm12, nan, %v2866_v25  ;;  %v2556_v18 = vsel %vm2549_vm8, %v2552_v6, %v2555_v47 }
 0x235   : > { %v9572_v29 = vsub.s32 %v2721_v49, %v2724_v41  ;;  %v9576_v21 = vsel %vm2135_vm9, nan, %v2970_v30  ;;  %v9580_v22 = vsel %vm2238_vm7, nan, %v3074_v37  ;;  %v2642_v56 = vxor.u32 2147483648, %v2641_v40 }
 0x236   : > { %vm3171_vm6 = vcmp.lt.s32.totalorder %v3170_v58, 2  ;;  %vm3172_vm4 = vcmp.eq.s32.totalorder %v3170_v58, 0  ;;  %v3274_v7 = vand.u32 3, %v3273_v44  ;;  %v2748_v42 = vsel %vm2663_vm1, %v2747_v13, %v2723_v61 }
 0x237   : > { %v2727_v46 = vsub.s32 0, %v9572_v29  ;;  %vm3175_vm12 = vcmp.eq.s32.totalorder %v3170_v58, 2  ;;  %v3377_v36 = vadd.s32 3, %v9398_v24  ;;  %v9588_v3 = vsel %vm2547_vm3, nan, %v2556_v18 }
 0x238   : > { %v2643_v52 = vsel %vm2560_vm2, %v2642_v56, %v2641_v40  ;;  %v10741_v25 = vxor.u32 2147483648, %v9325_v15  ;;  %v10742_v39 = vxor.u32 2147483648, %v9318_v57  ;;  %vm3276_vm9 = vcmp.eq.s32.totalorder %v3274_v7, 0 }
 0x239   : > { %v2646_v27 = vsel %vm9472_vm0, %v8876_v2, %v2643_v52  ;;  %v6899_v24 = vmin.u32 %v2727_v46, %v9572_v29  ;;  %vm3279_vm7 = vcmp.eq.s32.totalorder %v3274_v7, 2  ;;  %v2750_v62 = vsel %vm9550_vm15, 0, %v2748_v42 }
 0x23a   : > { %v3174_v49 = vsel %vm3172_vm4, %v9318_v57, %v10741_v25  ;;  %v3177_v60 = vsel %vm3175_vm12, %v10742_v39, %v9325_v15  ;;  %7628 = vcosq.f32 %v2646_v27  ;;  %v3278_v10 = vsel %vm3276_vm9, %v9414_v5, %v2448_v48  ;;  %v10747_v25 = vld [vmem:[#allocation17_spill] sm:$0xff] }
 0x23b   : > { %v3281_v57 = vsel %vm3279_vm7, %v2451_v31, %v9425_v11  ;;  %7630 = vsinq.f32 %v2646_v27  ;;  %v2729_v15 = vclz %v6899_v24  ;;  %vm3275_vm2 = vcmp.lt.s32.totalorder %v3274_v7, 2 }
 0x23c   : > { %v3378_v20 = vand.u32 3, %v3377_v36  ;;  %v3178_v9 = vsel %vm3171_vm6, %v3174_v49, %v3177_v60  ;;  %v3282_v33 = vsel %vm3275_vm2, %v3278_v10, %v3281_v57  ;;  %v3481_v17 = vadd.s32 3, %v9511_v35  ;;  %v10746_v36 = vld [vmem:[#allocation13_spill] sm:$0xff] }
 0x23d   : > { %v9613_v0 = vsub.s32 7, %v10743_v55  ;;  %v6900_v30 = vadd.s32 4294967294, %v2729_v15  ;;  %v3585_v48 = vadd.s32 3, %v2750_v62  ;;  %v9621_v28 = vand.u32 3, %v2750_v62 }
 0x23e   : > { %vm3380_vm0 = vcmp.eq.s32.totalorder %v3378_v20, 0  ;;  %vm3383_vm10 = vcmp.eq.s32.totalorder %v3378_v20, 2  ;;  %vm3379_vm11 = vcmp.lt.s32.totalorder %v3378_v20, 2  ;;  %v9619_v31 = vand.u32 3, %v3481_v17  ;;  %v10748_v20 = vld [vmem:[#allocation27_spill] sm:$0xff] }
 0x23f   : > { %v3382_v5 = vsel %vm3380_vm0, %v9529_v19, %v2551_v23  ;;  %v3385_v11 = vsel %vm3383_vm10, %v2554_v43, %v9535_v8  ;;  %vm6901_vm8 = vcmp.lt.s32.totalorder %v6900_v30, 0  ;;  %v4555_v14 = vrot.slane %v8438_v16, %v9613_v0  ;;  %v10744_v19 = vld [vmem:[#allocation18_spill] sm:$0xff] }
 0x240   : > { %v3386_v35 = vsel %vm3379_vm11, %v3382_v5, %v3385_v11  ;;  %v2732_v47 = vsel %vm6901_vm8, 0, %v6900_v30  ;;  %v9627_v4 = vsel %vm2341_vm14, nan, %v3178_v9  ;;  %v9631_v23 = vsel %vm2444_vm5, nan, %v3282_v33 }
 0x241   : > { %v4571_v8 = vrot.slane %v10744_v19, %v9613_v0  ;;  %vm2656_vm6 = vcmp.eq.s32.totalorder %v9564_v12, 2  ;;  %v2733_v43 = vsub.s32 32, %v2732_v47  ;;  %v2737_v59 = vsub.s32 4294967266, %v2732_v47 }
 0x242   : > { %v9638_v61 = vsel %vm2547_vm3, nan, %v3386_v35  ;;  %v9640_v37 = vand.u32 3, %v3585_v48  ;;  %vm2653_vm14 = vcmp.eq.s32.totalorder %v9564_v12, 0  ;;  %v2734_v53 = vshll.u32 %v9572_v29, %v2732_v47 }
 0x243   : > { %vm3484_vm5 = vcmp.eq.s32.totalorder %v9619_v31, 0  ;;  %vm3487_vm4 = vcmp.eq.s32.totalorder %v9619_v31, 2  ;;  %v4581_v6 = vmul.f32 %v4555_v14, %v10745_v51  ;;  %vm2652_vm12 = vcmp.lt.s32.totalorder %v9564_v12, 2 }
 0x244   : > { %v2735_v54 = vshrl.u32 %v2717_v45, %v2733_v43  ;;  %v2738_v58 = vadd.s32 127, %v2737_v59  ;;  %v4585_v63 = vmul.f32 %v4555_v14, %v9588_v3  ;;  %v4589_v44 = vmul.f32 %v4571_v8, %v9576_v21 }
 0x245   : > { %vm2650_vm3 = vweird.f32 %v8876_v2  ;;  %v4593_v41 = vmul.f32 %v4571_v8, %v9638_v61  ;;  %v4605_v13 = vmul.f32 %v4571_v8, %v10745_v51  ;;  %v4609_v40 = vmul.f32 %v4571_v8, %v9588_v3 }
 0x246   : > { %v4613_v18 = vmul.f32 %v4555_v14, %v9576_v21  ;;  %v2736_v29 = vor.u32 %v2735_v54, %v2734_v53  ;;  %v2739_v56 = vshll.u32 %v2738_v58, 23  ;;  %v4597_v7 = vsub.f32 %v4581_v6, %v4589_v44 }
 0x247   : > { %v4617_v45 = vmul.f32 %v4555_v14, %v9638_v61  ;;  %v4601_v46 = vsub.f32 %v4585_v63, %v4593_v41  ;;  %v4551_v52 = vrot.slane %v10746_v36, %v9613_v0  ;;  %v4567_v49 = vrot.slane %v10747_v25, %v9613_v0  ;;  %v7629_v39 = vpop.eup %7628 }
 0x248   : > { %v4621_v42 = vadd.f32 %v4613_v18, %v4605_v13  ;;  %v2740_v60 = vor.u32 4788187, %v2739_v56  ;;  %v2743_v27 = vcvt.s32.f32 %v2736_v29  ;;  %v9661_v62 = vsub.s32 6, %v10743_v55  ;;  %v7631_v10 = vpop.eup %7630 }
 0x249   : > { %v4625_v24 = vadd.f32 %v4617_v45, %v4609_v40  ;;  %v2657_v57 = vxor.u32 2147483648, %v7629_v39  ;;  %v7357_v15 = vpack.c.bf16 %v4601_v46, %v4597_v7  ;;  %v4580_v9 = vmul.f32 %v4551_v52, %v10748_v20 }
 0x24a   : > { %v4584_v33 = vmul.f32 %v4551_v52, %v9560_v32  ;;  %v2654_v17 = vxor.u32 2147483648, %v7631_v10  ;;  %v2741_v30 = vand.u32 2147483647, %v2740_v60  ;;  %v4588_v5 = vmul.f32 %v4567_v49, %v9570_v38 }
 0x24b   : > { %v7421_v48 = vpack.c.bf16 %v4625_v24, %v4621_v42  ;;  %v2658_v11 = vsel %vm2656_vm6, %v2657_v57, %v7631_v10  ;;  %v3489_v35 = vsel %vm3487_vm4, %v2657_v57, %v7631_v10  ;;  %6556 = vmatprep.subr.bf16.mxu0 %v7357_v15  ;;  %v4592_v14 = vmul.f32 %v4567_v49, %v9631_v23 }
 0x24c   : > { %v4604_v47 = vmul.f32 %v4567_v49, %v10748_v20  ;;  %v2655_v8 = vsel %vm2653_vm14, %v7629_v39, %v2654_v17  ;;  %v2744_v43 = vmul.f32 %v2743_v27, %v2741_v30  ;;  %v3486_v59 = vsel %vm3484_vm5, %v7629_v39, %v2654_v17 }
 0x24d   : > { %6597 = vmatprep.subr.bf16.mxu1 %v7421_v48  ;;  %v4596_v53 = vsub.f32 %v4580_v9, %v4588_v5  ;;  %v2659_v6 = vsel %vm2652_vm12, %v2655_v8, %v2658_v11  ;;  %vm3483_vm9 = vcmp.lt.s32.totalorder %v9619_v31, 2  ;;  %v4600_v54 = vsub.f32 %v4584_v33, %v4592_v14 }
 0x24e   : > { %v4608_v58 = vmul.f32 %v4567_v49, %v9560_v32  ;;  %v9682_v63 = vsel %vm2650_vm3, nan, %v2659_v6  ;;  %v2745_v44 = vxor.u32 2147483648, %v2744_v43  ;;  %v9684_v41 = vsel %vm3483_vm9, %v3486_v59, %v3489_v35 }
 0x24f   : > { %v4612_v13 = vmul.f32 %v4551_v52, %v9570_v38  ;;  %v7356_v40 = vpack.c.bf16 %v4600_v54, %v4596_v53  ;;  %v4616_v18 = vmul.f32 %v4551_v52, %v9631_v23  ;;  %v4419_v12 = vrot.slane %v8438_v16, %v9661_v62 }
 0x250   : > { %v4435_v31 = vrot.slane %v10744_v19, %v9661_v62  ;;  %v2746_v29 = vsel %vm2663_vm1, %v2745_v44, %v2744_v43  ;;  %v4415_v7 = vrot.slane %v10746_v36, %v9661_v62  ;;  %v4431_v45 = vrot.slane %v10747_v25, %v9661_v62  ;;  %v10749_v44 = vld [vmem:[#allocation10_spill] sm:$0xff] }
 0x251   : > { %v4620_v56 = vadd.f32 %v4612_v13, %v4604_v47  ;;  %v2749_v46 = vsel %vm9550_vm15, %v8880_v26, %v2746_v29  ;;  %6557 = vmatpush1.bf16.msra.mxu0 %v7356_v40  ;;  %v4624_v42 = vadd.f32 %v4616_v18, %v4608_v58  ;;  %v4445_v52 = vmul.f32 %v4419_v12, %v10745_v51 }
 0x252   : > { %v4449_v49 = vmul.f32 %v4419_v12, %v9588_v3  ;;  %7632 = vcosq.f32 %v2749_v46  ;;  %v4453_v39 = vmul.f32 %v4435_v31, %v9576_v21  ;;  %v4457_v60 = vmul.f32 %v4435_v31, %v9638_v61 }
 0x253   : > { %v4469_v27 = vmul.f32 %v4435_v31, %v10745_v51  ;;  %7634 = vsinq.f32 %v2749_v46  ;;  %v7420_v24 = vpack.c.bf16 %v4624_v42, %v4620_v56  ;;  %v4473_v10 = vmul.f32 %v4435_v31, %v9588_v3 }
 0x254   : > { %v4477_v1 = vmul.f32 %v4419_v12, %v9576_v21  ;;  %v4461_v57 = vsub.f32 %v4445_v52, %v4453_v39  ;;  %v4465_v15 = vsub.f32 %v4449_v49, %v4457_v60  ;;  %v4481_v9 = vmul.f32 %v4419_v12, %v9638_v61 }
 0x255   : > { %v4444_v33 = vmul.f32 %v4415_v7, %v10748_v20  ;;  %6598 = vmatpush1.bf16.msra.mxu1 %v7420_v24  ;;  %v4448_v30 = vmul.f32 %v4415_v7, %v9560_v32  ;;  %v4452_v48 = vmul.f32 %v4431_v45, %v9570_v38  ;;  %v4456_v5 = vmul.f32 %v4431_v45, %v9631_v23 }
 0x256   : > { %v4485_v17 = vadd.f32 %v4477_v1, %v4469_v27  ;;  %v7353_v11 = vpack.c.bf16 %v4465_v15, %v4461_v57  ;;  %v4489_v35 = vadd.f32 %v4481_v9, %v4473_v10  ;;  %v4468_v14 = vmul.f32 %v4431_v45, %v10748_v20 }
 0x257   : > { %v4472_v47 = vmul.f32 %v4431_v45, %v9560_v32  ;;  %v4460_v8 = vsub.f32 %v4444_v33, %v4452_v48  ;;  %v4464_v43 = vsub.f32 %v4448_v30, %v4456_v5  ;;  %v4476_v59 = vmul.f32 %v4415_v7, %v9570_v38 }
 0x258   : > { %v4480_v53 = vmul.f32 %v4415_v7, %v9631_v23  ;;  %6558 = vmatprep.subr.bf16.mxu0 %v7353_v11  ;;  %v7417_v6 = vpack.c.bf16 %v4489_v35, %v4485_v17  ;;  %v9718_v54 = vsub.s32 5, %v10743_v55  ;;  %v9721_v58 = vsub.s32 4, %v10743_v55 }
 0x259   : > { %v9725_v13 = vrot.slane %v8438_v16, %v10749_v44  ;;  %vm2759_vm1 = vcmp.eq.s32.totalorder %v9621_v28, 2  ;;  %vm3591_vm15 = vcmp.eq.s32.totalorder %v9640_v37, 2  ;;  %v7352_v40 = vpack.c.bf16 %v4464_v43, %v4460_v8 }
 0x25a   : > { %v4484_v18 = vadd.f32 %v4476_v59, %v4468_v14  ;;  %v4488_v12 = vadd.f32 %v4480_v53, %v4472_v47  ;;  %v9731_v31 = vrot.slane %v10744_v19, %v10749_v44  ;;  %vm2756_vm7 = vcmp.eq.s32.totalorder %v9621_v28, 0  ;;  %6599 = vmatprep.subr.bf16.mxu1 %v7417_v6 }
 0x25b   : > { %vm3588_vm2 = vcmp.eq.s32.totalorder %v9640_v37, 0  ;;  %v4283_v55 = vrot.slane %v8438_v16, %v9718_v54  ;;  %v4299_v29 = vrot.slane %v10744_v19, %v9718_v54  ;;  %v4279_v56 = vrot.slane %v10746_v36, %v9718_v54  ;;  %6559 = vmatpush1.bf16.msra.mxu0 %v7352_v40 }
 0x25c   : > { %v4295_v7 = vrot.slane %v10747_v25, %v9718_v54  ;;  %vm2755_vm0 = vcmp.lt.s32.totalorder %v9621_v28, 2  ;;  %vm3587_vm10 = vcmp.lt.s32.totalorder %v9640_v37, 2  ;;  %v7416_v45 = vpack.c.bf16 %v4488_v12, %v4484_v18 }
 0x25d   : > { %v4147_v46 = vrot.slane %v8438_v16, %v9721_v58  ;;  %v4163_v42 = vrot.slane %v10744_v19, %v9721_v58  ;;  %v9751_v52 = vrot.slane %v10746_v36, %v9721_v58  ;;  %vm2753_vm11 = vweird.f32 %v8880_v26 }
 0x25e   : > { %v4309_v49 = vmul.f32 %v4283_v55, %v10745_v51  ;;  %v4313_v39 = vmul.f32 %v4283_v55, %v9588_v3  ;;  %v4317_v60 = vmul.f32 %v4299_v29, %v9576_v21  ;;  %v4321_v27 = vmul.f32 %v4299_v29, %v9638_v61  ;;  %6600 = vmatpush1.bf16.msra.mxu1 %v7416_v45 }
 0x25f   : > { %v4333_v24 = vmul.f32 %v4299_v29, %v10745_v51  ;;  %v4337_v10 = vmul.f32 %v4299_v29, %v9588_v3  ;;  %v4341_v1 = vmul.f32 %v4283_v55, %v9576_v21  ;;  %v4345_v57 = vmul.f32 %v4283_v55, %v9638_v61  ;;  %v7633_v30 = vpop.eup %7632 }
 0x260   : > { %v4325_v15 = vsub.f32 %v4309_v49, %v4317_v60  ;;  %v4329_v9 = vsub.f32 %v4313_v39, %v4321_v27  ;;  %v4308_v33 = vmul.f32 %v4279_v56, %v10748_v20  ;;  %v4312_v17 = vmul.f32 %v4279_v56, %v9560_v32  ;;  %v7635_v14 = vpop.eup %7634 }
 0x261   : > { %v4349_v48 = vadd.f32 %v4341_v1, %v4333_v24  ;;  %v4353_v5 = vadd.f32 %v4345_v57, %v4337_v10  ;;  %v4316_v11 = vmul.f32 %v4295_v7, %v9570_v38  ;;  %v4320_v35 = vmul.f32 %v4295_v7, %v9631_v23 }
 0x262   : > { %v2760_v47 = vxor.u32 2147483648, %v7633_v30  ;;  %v7349_v8 = vpack.c.bf16 %v4329_v9, %v4325_v15  ;;  %v4332_v43 = vmul.f32 %v4295_v7, %v10748_v20  ;;  %v4336_v59 = vmul.f32 %v4295_v7, %v9560_v32 }
 0x263   : > { %v2757_v53 = vxor.u32 2147483648, %v7635_v14  ;;  %v7413_v6 = vpack.c.bf16 %v4353_v5, %v4349_v48  ;;  %v4324_v40 = vsub.f32 %v4308_v33, %v4316_v11  ;;  %v4328_v18 = vsub.f32 %v4312_v17, %v4320_v35 }
 0x264   : > { %v2761_v12 = vsel %vm2759_vm1, %v2760_v47, %v7635_v14  ;;  %v3593_v55 = vsel %vm3591_vm15, %v2760_v47, %v7635_v14  ;;  %6560 = vmatprep.subr.bf16.mxu0 %v7349_v8  ;;  %v4340_v29 = vmul.f32 %v4279_v56, %v9570_v38  ;;  %v4344_v45 = vmul.f32 %v4279_v56, %v9631_v23 }
 0x265   : > { %v2758_v49 = vsel %vm2756_vm7, %v7633_v30, %v2757_v53  ;;  %v3590_v7 = vsel %vm3588_vm2, %v7633_v30, %v2757_v53  ;;  %6601 = vmatprep.subr.bf16.mxu1 %v7413_v6  ;;  %v7348_v39 = vpack.c.bf16 %v4328_v18, %v4324_v40  ;;  %v4173_v60 = vmul.f32 %v4147_v46, %v10745_v51 }
 0x266   : > { %v2762_v27 = vsel %vm2755_vm0, %v2758_v49, %v2761_v12  ;;  %v3594_v24 = vsel %vm3587_vm10, %v3590_v7, %v3593_v55  ;;  %v4348_v10 = vadd.f32 %v4340_v29, %v4332_v43  ;;  %v4352_v1 = vadd.f32 %v4344_v45, %v4336_v59 }
 0x267   : > { %v9785_v56 = vsel %vm2753_vm11, nan, %v2762_v27  ;;  %v9789_v57 = vsel %vm2753_vm11, nan, %v3594_v24  ;;  %6561 = vmatpush1.bf16.msra.mxu0 %v7348_v39  ;;  %v4177_v15 = vmul.f32 %v4147_v46, %v9588_v3  ;;  %v4181_v9 = vmul.f32 %v4163_v42, %v9576_v21 }
 0x268   : > { %v7412_v28 = vpack.c.bf16 %v4352_v1, %v4348_v10  ;;  %v4185_v33 = vmul.f32 %v4163_v42, %v9638_v61  ;;  %v4197_v37 = vmul.f32 %v4163_v42, %v10745_v51  ;;  %v4201_v17 = vmul.f32 %v4163_v42, %v9588_v3 }
 0x269   : > { %v4189_v30 = vsub.f32 %v4173_v60, %v4181_v9  ;;  %v4205_v48 = vmul.f32 %v4147_v46, %v9576_v21  ;;  %v4209_v5 = vmul.f32 %v4147_v46, %v9638_v61  ;;  %v4159_v26 = vrot.slane %v10747_v25, %v9721_v58 }
 0x26a   : > { %6602 = vmatpush1.bf16.msra.mxu1 %v7412_v28  ;;  %v4193_v11 = vsub.f32 %v4177_v15, %v4185_v33  ;;  %v4172_v35 = vmul.f32 %v9751_v52, %v10748_v20  ;;  %v4176_v14 = vmul.f32 %v9751_v52, %v9560_v32  ;;  %v4204_v47 = vmul.f32 %v9751_v52, %v9570_v38 }
 0x26b   : > { %v4213_v42 = vadd.f32 %v4205_v48, %v4197_v37  ;;  %v4217_v8 = vadd.f32 %v4209_v5, %v4201_v17  ;;  %v4180_v43 = vmul.f32 %v4159_v26, %v9570_v38  ;;  %v4184_v46 = vmul.f32 %v4159_v26, %v9631_v23  ;;  %v10750_v17 = vld [vmem:[#allocation9_spill] sm:$0xff] }
 0x26c   : > { %v7345_v59 = vpack.c.bf16 %v4193_v11, %v4189_v30  ;;  %v4196_v53 = vmul.f32 %v4159_v26, %v10748_v20  ;;  %v4200_v6 = vmul.f32 %v4159_v26, %v9560_v32  ;;  %v4208_v40 = vmul.f32 %v9751_v52, %v9631_v23 }
 0x26d   : > { %v7409_v18 = vpack.c.bf16 %v4217_v8, %v4213_v42  ;;  %v4188_v12 = vsub.f32 %v4172_v35, %v4180_v43  ;;  %v4192_v55 = vsub.f32 %v4176_v14, %v4184_v46  ;;  %v4037_v29 = vmul.f32 %v9725_v13, %v10745_v51 }
 0x26e   : > { %6562 = vmatprep.subr.bf16.mxu0 %v7345_v59  ;;  %v4212_v45 = vadd.f32 %v4204_v47, %v4196_v53  ;;  %v4216_v49 = vadd.f32 %v4208_v40, %v4200_v6  ;;  %v4041_v7 = vmul.f32 %v9725_v13, %v9588_v3  ;;  %v4045_v39 = vmul.f32 %v9731_v31, %v9576_v21 }
 0x26f   : > { %6603 = vmatprep.subr.bf16.mxu1 %v7409_v18  ;;  %v7344_v60 = vpack.c.bf16 %v4192_v55, %v4188_v12  ;;  %v4049_v52 = vmul.f32 %v9731_v31, %v9638_v61  ;;  %v4061_v27 = vmul.f32 %v9731_v31, %v10745_v51  ;;  %v4065_v24 = vmul.f32 %v9731_v31, %v9588_v3 }
 0x270   : > { %v7408_v10 = vpack.c.bf16 %v4216_v49, %v4212_v45  ;;  %v4053_v1 = vsub.f32 %v4037_v29, %v4045_v39  ;;  %v4069_v15 = vmul.f32 %v9725_v13, %v9576_v21  ;;  %v4073_v9 = vmul.f32 %v9725_v13, %v9638_v61 }
 0x271   : > { %6563 = vmatpush1.bf16.msra.mxu0 %v7344_v60  ;;  %v4057_v28 = vsub.f32 %v4041_v7, %v4049_v52  ;;  %v4007_v33 = vrot.slane %v10746_v36, %v10749_v44  ;;  %v4023_v37 = vrot.slane %v10747_v25, %v10749_v44  ;;  %v3875_v30 = vrot.slane %v8438_v16, %v10750_v17 }
 0x272   : > { %6604 = vmatpush1.bf16.msra.mxu1 %v7408_v10  ;;  %v4077_v31 = vadd.f32 %v4069_v15, %v4061_v27  ;;  %v4081_v48 = vadd.f32 %v4073_v9, %v4065_v24  ;;  %v3891_v5 = vrot.slane %v10744_v19, %v10750_v17  ;;  %v3871_v13 = vrot.slane %v10746_v36, %v10750_v17 }
 0x273   : > { %v7341_v26 = vpack.c.bf16 %v4057_v28, %v4053_v1  ;;  %v4036_v11 = vmul.f32 %v4007_v33, %v10748_v20  ;;  %v4040_v35 = vmul.f32 %v4007_v33, %v9560_v32  ;;  %v4044_v14 = vmul.f32 %v4023_v37, %v9570_v38 }
 0x274   : > { %v7405_v47 = vpack.c.bf16 %v4081_v48, %v4077_v31  ;;  %v4048_v42 = vmul.f32 %v4023_v37, %v9631_v23  ;;  %v4060_v8 = vmul.f32 %v4023_v37, %v10748_v20  ;;  %v4064_v43 = vmul.f32 %v4023_v37, %v9560_v32 }
 0x275   : > { %6564 = vmatprep.subr.bf16.mxu0 %v7341_v26  ;;  %v4052_v46 = vsub.f32 %v4036_v11, %v4044_v14  ;;  %v4068_v59 = vmul.f32 %v4007_v33, %v9570_v38  ;;  %v4072_v53 = vmul.f32 %v4007_v33, %v9631_v23  ;;  %v3901_v6 = vmul.f32 %v3875_v30, %v10745_v51 }
 0x276   : > { %6605 = vmatprep.subr.bf16.mxu1 %v7405_v47  ;;  %v4056_v40 = vsub.f32 %v4040_v35, %v4048_v42  ;;  %v3905_v18 = vmul.f32 %v3875_v30, %v9588_v3  ;;  %v3909_v12 = vmul.f32 %v3891_v5, %v9576_v21  ;;  %v3913_v55 = vmul.f32 %v3891_v5, %v9638_v61  ;;  %v10751_v35 = vld [vmem:[#allocation8_spill] sm:$0xff] }
 0x277   : > { %v4076_v29 = vadd.f32 %v4068_v59, %v4060_v8  ;;  %v4080_v45 = vadd.f32 %v4072_v53, %v4064_v43  ;;  %v3925_v49 = vmul.f32 %v3891_v5, %v10745_v51  ;;  %v3929_v7 = vmul.f32 %v3891_v5, %v9588_v3 }
 0x278   : > { %v7340_v39 = vpack.c.bf16 %v4056_v40, %v4052_v46  ;;  %v3917_v60 = vsub.f32 %v3901_v6, %v3909_v12  ;;  %v3921_v52 = vsub.f32 %v3905_v18, %v3913_v55  ;;  %v3933_v27 = vmul.f32 %v3875_v30, %v9576_v21 }
 0x279   : > { %v7404_v24 = vpack.c.bf16 %v4080_v45, %v4076_v29  ;;  %v3937_v10 = vmul.f32 %v3875_v30, %v9638_v61  ;;  %v3887_v1 = vrot.slane %v10747_v25, %v10750_v17  ;;  %v3900_v15 = vmul.f32 %v3871_v13, %v10748_v20 }
 0x27a   : > { %6565 = vmatpush1.bf16.msra.mxu0 %v7340_v39  ;;  %v7337_v9 = vpack.c.bf16 %v3921_v52, %v3917_v60  ;;  %v3941_v28 = vadd.f32 %v3933_v27, %v3925_v49  ;;  %v3904_v33 = vmul.f32 %v3871_v13, %v9560_v32  ;;  %v3932_v37 = vmul.f32 %v3871_v13, %v9570_v38  ;;  %v10752_v27 = vld [vmem:[#allocation7_spill] sm:$0xff] }
 0x27b   : > { %6606 = vmatpush1.bf16.msra.mxu1 %v7404_v24  ;;  %v3945_v31 = vadd.f32 %v3937_v10, %v3929_v7  ;;  %v3908_v48 = vmul.f32 %v3887_v1, %v9570_v38  ;;  %v3912_v5 = vmul.f32 %v3887_v1, %v9631_v23  ;;  %v3924_v30 = vmul.f32 %v3887_v1, %v10748_v20 }
 0x27c   : > { %6566 = vmatprep.subr.bf16.mxu0 %v7337_v9  ;;  %v3928_v26 = vmul.f32 %v3887_v1, %v9560_v32  ;;  %v3936_v11 = vmul.f32 %v3871_v13, %v9631_v23  ;;  %v3739_v14 = vrot.slane %v8438_v16, %v10751_v35  ;;  %v3755_v47 = vrot.slane %v10744_v19, %v10751_v35 }
 0x27d   : > { %v7401_v42 = vpack.c.bf16 %v3945_v31, %v3941_v28  ;;  %v3916_v8 = vsub.f32 %v3900_v15, %v3908_v48  ;;  %v3920_v43 = vsub.f32 %v3904_v33, %v3912_v5  ;;  %v3940_v46 = vadd.f32 %v3932_v37, %v3924_v30 }
 0x27e   : > { %v3944_v59 = vadd.f32 %v3936_v11, %v3928_v26  ;;  %v3765_v53 = vmul.f32 %v3739_v14, %v10745_v51  ;;  %v3769_v6 = vmul.f32 %v3739_v14, %v9588_v3  ;;  %v3773_v40 = vmul.f32 %v3755_v47, %v9576_v21 }
 0x27f   : > { %6607 = vmatprep.subr.bf16.mxu1 %v7401_v42  ;;  %v7336_v18 = vpack.c.bf16 %v3920_v43, %v3916_v8  ;;  %v3777_v13 = vmul.f32 %v3755_v47, %v9638_v61  ;;  %v3789_v12 = vmul.f32 %v3755_v47, %v10745_v51  ;;  %v3793_v55 = vmul.f32 %v3755_v47, %v9588_v3 }
 0x280   : > { %v7400_v29 = vpack.c.bf16 %v3944_v59, %v3940_v46  ;;  %v3781_v45 = vsub.f32 %v3765_v53, %v3773_v40  ;;  %v3797_v49 = vmul.f32 %v3739_v14, %v9576_v21  ;;  %v3801_v7 = vmul.f32 %v3739_v14, %v9638_v61 }
 0x281   : > { %6567 = vmatpush1.bf16.msra.mxu0 %v7336_v18  ;;  %v3785_v39 = vsub.f32 %v3769_v6, %v3777_v13  ;;  %v3735_v60 = vrot.slane %v10746_v36, %v10751_v35  ;;  %v3751_v52 = vrot.slane %v10747_v25, %v10751_v35  ;;  %v3603_v24 = vrot.slane %v8438_v16, %v10752_v27 }
 0x282   : > { %6608 = vmatpush1.bf16.msra.mxu1 %v7400_v29  ;;  %v3805_v10 = vadd.f32 %v3797_v49, %v3789_v12  ;;  %v3809_v1 = vadd.f32 %v3801_v7, %v3793_v55  ;;  %v3619_v15 = vrot.slane %v10744_v19, %v10752_v27  ;;  %v3599_v9 = vrot.slane %v10746_v36, %v10752_v27 }
 0x283   : > { %v7333_v28 = vpack.c.bf16 %v3785_v39, %v3781_v45  ;;  %v3764_v33 = vmul.f32 %v3735_v60, %v10748_v20  ;;  %v3768_v37 = vmul.f32 %v3735_v60, %v9560_v32  ;;  %v3772_v31 = vmul.f32 %v3751_v52, %v9570_v38 }
 0x284   : > { %v7397_v48 = vpack.c.bf16 %v3809_v1, %v3805_v10  ;;  %v3776_v5 = vmul.f32 %v3751_v52, %v9631_v23  ;;  %v3788_v16 = vmul.f32 %v3751_v52, %v10748_v20  ;;  %v3792_v30 = vmul.f32 %v3751_v52, %v9560_v32 }
 0x285   : > { %6568 = vmatprep.subr.bf16.mxu0 %v7333_v28  ;;  %v3780_v26 = vsub.f32 %v3764_v33, %v3772_v31  ;;  %v3796_v19 = vmul.f32 %v3735_v60, %v9570_v38  ;;  %v3800_v36 = vmul.f32 %v3735_v60, %v9631_v23  ;;  %v3629_v11 = vmul.f32 %v3603_v24, %v10745_v51  ;;  %v10753_v28 = vld [vmem:[#allocation20_spill] sm:$0xff] }
 0x286   : > { %6609 = vmatprep.subr.bf16.mxu1 %v7397_v48  ;;  %v3784_v14 = vsub.f32 %v3768_v37, %v3776_v5  ;;  %v3633_v47 = vmul.f32 %v3603_v24, %v9588_v3  ;;  %v3637_v42 = vmul.f32 %v3619_v15, %v9576_v21  ;;  %v3641_v8 = vmul.f32 %v3619_v15, %v9638_v61  ;;  %v10754_v37 = vld [vmem:[#allocation23_spill] sm:$0xff] }
 0x287   : > { %v3804_v43 = vadd.f32 %v3796_v19, %v3788_v16  ;;  %v3808_v46 = vadd.f32 %v3800_v36, %v3792_v30  ;;  %v3653_v59 = vmul.f32 %v3619_v15, %v10745_v51  ;;  %v3657_v53 = vmul.f32 %v3619_v15, %v9588_v3 }
 0x288   : > { %v7332_v6 = vpack.c.bf16 %v3784_v14, %v3780_v26  ;;  %v3645_v40 = vsub.f32 %v3629_v11, %v3637_v42  ;;  %v3649_v18 = vsub.f32 %v3633_v47, %v3641_v8  ;;  %v3661_v13 = vmul.f32 %v3603_v24, %v9576_v21 }
 0x289   : > { %v7396_v12 = vpack.c.bf16 %v3808_v46, %v3804_v43  ;;  %v3665_v55 = vmul.f32 %v3603_v24, %v9638_v61  ;;  %v3615_v29 = vrot.slane %v10747_v25, %v10752_v27  ;;  %v3628_v45 = vmul.f32 %v3599_v9, %v10748_v20 }
 0x28a   : > { %6569 = vmatpush1.bf16.msra.mxu0 %v7332_v6  ;;  %v7329_v49 = vpack.c.bf16 %v3649_v18, %v3645_v40  ;;  %v3669_v7 = vadd.f32 %v3661_v13, %v3653_v59  ;;  %v3632_v39 = vmul.f32 %v3599_v9, %v9560_v32  ;;  %v3660_v60 = vmul.f32 %v3599_v9, %v9570_v38  ;;  %v10755_v6 = vld [vmem:[#allocation16_spill] sm:$0xff]  ;;  %v10756_v18 = vld [vmem:[#allocation22_spill] sm:$0xff] }
 0x28b   : > { %6610 = vmatpush1.bf16.msra.mxu1 %v7396_v12  ;;  %v3673_v52 = vadd.f32 %v3665_v55, %v3657_v53  ;;  %v3636_v10 = vmul.f32 %v3615_v29, %v9570_v38  ;;  %v3640_v1 = vmul.f32 %v3615_v29, %v9631_v23  ;;  %v3652_v24 = vmul.f32 %v3615_v29, %v10748_v20 }
 0x28c   : > { %6570 = vmatprep.subr.bf16.mxu0 %v7329_v49  ;;  %v3656_v25 = vmul.f32 %v3615_v29, %v9560_v32  ;;  %v3664_v15 = vmul.f32 %v3599_v9, %v9631_v23  ;;  %v5643_v33 = vrot.slane %v10753_v28, %v9613_v0  ;;  %v5659_v31 = vrot.slane %v10754_v37, %v9613_v0 }
 0x28d   : > { %v7393_v48 = vpack.c.bf16 %v3673_v52, %v3669_v7  ;;  %v3644_v5 = vsub.f32 %v3628_v45, %v3636_v10  ;;  %v3648_v16 = vsub.f32 %v3632_v39, %v3640_v1  ;;  %v3668_v30 = vadd.f32 %v3660_v60, %v3652_v24 }
 0x28e   : > { %v3672_v26 = vadd.f32 %v3664_v15, %v3656_v25  ;;  %v5669_v19 = vmul.f32 %v5643_v33, %v10745_v51  ;;  %v5673_v36 = vmul.f32 %v5643_v33, %v9588_v3  ;;  %v5677_v11 = vmul.f32 %v5659_v31, %v9576_v21 }
 0x28f   : > { %6611 = vmatprep.subr.bf16.mxu1 %v7393_v48  ;;  %v7328_v14 = vpack.c.bf16 %v3648_v16, %v3644_v5  ;;  %v5681_v9 = vmul.f32 %v5659_v31, %v9638_v61  ;;  %v5693_v47 = vmul.f32 %v5659_v31, %v10745_v51  ;;  %v5697_v42 = vmul.f32 %v5659_v31, %v9588_v3 }
 0x290   : > { %v7392_v8 = vpack.c.bf16 %v3672_v26, %v3668_v30  ;;  %v5685_v43 = vsub.f32 %v5669_v19, %v5677_v11  ;;  %v5701_v46 = vmul.f32 %v5643_v33, %v9576_v21  ;;  %v5705_v59 = vmul.f32 %v5643_v33, %v9638_v61 }
 0x291   : > { %6571 = vmatpush1.bf16.msra.mxu0 %v7328_v14  ;;  %v5689_v53 = vsub.f32 %v5673_v36, %v5681_v9  ;;  %v5639_v40 = vrot.slane %v10755_v6, %v9613_v0  ;;  %v5655_v13 = vrot.slane %v10756_v18, %v9613_v0  ;;  %v5507_v12 = vrot.slane %v10753_v28, %v9661_v62 }
 0x292   : > { %6612 = vmatpush1.bf16.msra.mxu1 %v7392_v8  ;;  %v5709_v55 = vadd.f32 %v5701_v46, %v5693_v47  ;;  %v5713_v29 = vadd.f32 %v5705_v59, %v5697_v42  ;;  %v5523_v45 = vrot.slane %v10754_v37, %v9661_v62  ;;  %v5503_v49 = vrot.slane %v10755_v6, %v9661_v62 }
 0x293   : > { %v7389_v7 = vpack.c.bf16 %v5689_v53, %v5685_v43  ;;  %v5668_v39 = vmul.f32 %v5639_v40, %v10748_v20  ;;  %v5672_v60 = vmul.f32 %v5639_v40, %v9560_v32  ;;  %v5676_v52 = vmul.f32 %v5655_v13, %v9570_v38 }
 0x294   : > { %v7453_v10 = vpack.c.bf16 %v5713_v29, %v5709_v55  ;;  %v5680_v1 = vmul.f32 %v5655_v13, %v9631_v23  ;;  %v5692_v24 = vmul.f32 %v5655_v13, %v10748_v20  ;;  %v5696_v25 = vmul.f32 %v5655_v13, %v9560_v32 }
 0x295   : > { %6572 = vmatprep.subr.bf16.mxu0 %v7389_v7  ;;  %v5684_v15 = vsub.f32 %v5668_v39, %v5676_v52  ;;  %v5700_v33 = vmul.f32 %v5639_v40, %v9570_v38  ;;  %v5704_v31 = vmul.f32 %v5639_v40, %v9631_v23  ;;  %v5533_v48 = vmul.f32 %v5507_v12, %v10745_v51 }
 0x296   : > { %6613 = vmatprep.subr.bf16.mxu1 %v7453_v10  ;;  %v5688_v5 = vsub.f32 %v5672_v60, %v5680_v1  ;;  %v5537_v16 = vmul.f32 %v5507_v12, %v9588_v3  ;;  %v5541_v30 = vmul.f32 %v5523_v45, %v9576_v21  ;;  %v5545_v26 = vmul.f32 %v5523_v45, %v9638_v61 }
 0x297   : > { %v5708_v19 = vadd.f32 %v5700_v33, %v5692_v24  ;;  %v5712_v36 = vadd.f32 %v5704_v31, %v5696_v25  ;;  %v5557_v11 = vmul.f32 %v5523_v45, %v10745_v51  ;;  %v5561_v14 = vmul.f32 %v5523_v45, %v9588_v3 }
 0x298   : > { %v7388_v9 = vpack.c.bf16 %v5688_v5, %v5684_v15  ;;  %v5549_v47 = vsub.f32 %v5533_v48, %v5541_v30  ;;  %v5553_v42 = vsub.f32 %v5537_v16, %v5545_v26  ;;  %v5565_v8 = vmul.f32 %v5507_v12, %v9576_v21 }
 0x299   : > { %v7452_v43 = vpack.c.bf16 %v5712_v36, %v5708_v19  ;;  %v5569_v46 = vmul.f32 %v5507_v12, %v9638_v61  ;;  %v5519_v59 = vrot.slane %v10756_v18, %v9661_v62  ;;  %v5532_v53 = vmul.f32 %v5503_v49, %v10748_v20 }
 0x29a   : > { %6573 = vmatpush2.bf16.msra.mxu0 %v7388_v9  ;;  %v7385_v40 = vpack.c.bf16 %v5553_v42, %v5549_v47  ;;  %v5573_v13 = vadd.f32 %v5565_v8, %v5557_v11  ;;  %v5536_v55 = vmul.f32 %v5503_v49, %v9560_v32  ;;  %v5564_v29 = vmul.f32 %v5503_v49, %v9570_v38 }
 0x29b   : > { %6614 = vmatpush2.bf16.msra.mxu1 %v7452_v43  ;;  %v5577_v45 = vadd.f32 %v5569_v46, %v5561_v14  ;;  %v5540_v7 = vmul.f32 %v5519_v59, %v9570_v38  ;;  %v5544_v39 = vmul.f32 %v5519_v59, %v9631_v23  ;;  %v5556_v12 = vmul.f32 %v5519_v59, %v10748_v20 }
 0x29c   : > { %6574 = vmatprep.subr.bf16.mxu0 %v7385_v40  ;;  %v5560_v60 = vmul.f32 %v5519_v59, %v9560_v32  ;;  %v5568_v52 = vmul.f32 %v5503_v49, %v9631_v23  ;;  %v5371_v10 = vrot.slane %v10753_v28, %v9718_v54  ;;  %v5387_v1 = vrot.slane %v10754_v37, %v9718_v54 }
 0x29d   : > { %v7449_v24 = vpack.c.bf16 %v5577_v45, %v5573_v13  ;;  %v5548_v25 = vsub.f32 %v5532_v53, %v5540_v7  ;;  %v5552_v15 = vsub.f32 %v5536_v55, %v5544_v39  ;;  %v5572_v33 = vadd.f32 %v5564_v29, %v5556_v12 }
 0x29e   : > { %v5576_v31 = vadd.f32 %v5568_v52, %v5560_v60  ;;  %v5397_v48 = vmul.f32 %v5371_v10, %v10745_v51  ;;  %v5401_v5 = vmul.f32 %v5371_v10, %v9588_v3  ;;  %v5405_v16 = vmul.f32 %v5387_v1, %v9576_v21 }
 0x29f   : > { %6615 = vmatprep.subr.bf16.mxu1 %v7449_v24  ;;  %v7384_v30 = vpack.c.bf16 %v5552_v15, %v5548_v25  ;;  %v5409_v49 = vmul.f32 %v5387_v1, %v9638_v61  ;;  %v5421_v26 = vmul.f32 %v5387_v1, %v10745_v51  ;;  %v5425_v19 = vmul.f32 %v5387_v1, %v9588_v3 }
 0x2a0   : > { %v7448_v36 = vpack.c.bf16 %v5576_v31, %v5572_v33  ;;  %v5413_v11 = vsub.f32 %v5397_v48, %v5405_v16  ;;  %v5429_v14 = vmul.f32 %v5371_v10, %v9576_v21  ;;  %v5433_v9 = vmul.f32 %v5371_v10, %v9638_v61 }
 0x2a1   : > { %6575 = vmatpush2.bf16.msra.mxu0 %v7384_v30  ;;  %v5417_v47 = vsub.f32 %v5401_v5, %v5409_v49  ;;  %v5367_v42 = vrot.slane %v10755_v6, %v9718_v54  ;;  %v5383_v8 = vrot.slane %v10756_v18, %v9718_v54  ;;  %v5235_v43 = vrot.slane %v10753_v28, %v9721_v58 }
 0x2a2   : > { %6616 = vmatpush2.bf16.msra.mxu1 %v7448_v36  ;;  %v5437_v46 = vadd.f32 %v5429_v14, %v5421_v26  ;;  %v5441_v59 = vadd.f32 %v5433_v9, %v5425_v19  ;;  %v5251_v53 = vrot.slane %v10754_v37, %v9721_v58  ;;  %v5231_v40 = vrot.slane %v10755_v6, %v9721_v58 }
 0x2a3   : > { %v7381_v13 = vpack.c.bf16 %v5417_v47, %v5413_v11  ;;  %v5396_v55 = vmul.f32 %v5367_v42, %v10748_v20  ;;  %v5400_v29 = vmul.f32 %v5367_v42, %v9560_v32  ;;  %v5404_v45 = vmul.f32 %v5383_v8, %v9570_v38 }
 0x2a4   : > { %v7445_v7 = vpack.c.bf16 %v5441_v59, %v5437_v46  ;;  %v5408_v39 = vmul.f32 %v5383_v8, %v9631_v23  ;;  %v5420_v12 = vmul.f32 %v5383_v8, %v10748_v20  ;;  %v5424_v60 = vmul.f32 %v5383_v8, %v9560_v32 }
 0x2a5   : > { %6576 = vmatprep.subr.bf16.mxu0 %v7381_v13  ;;  %v5412_v52 = vsub.f32 %v5396_v55, %v5404_v45  ;;  %v5428_v10 = vmul.f32 %v5367_v42, %v9570_v38  ;;  %v5432_v1 = vmul.f32 %v5367_v42, %v9631_v23  ;;  %v5261_v24 = vmul.f32 %v5235_v43, %v10745_v51 }
 0x2a6   : > { %6617 = vmatprep.subr.bf16.mxu1 %v7445_v7  ;;  %v5416_v25 = vsub.f32 %v5400_v29, %v5408_v39  ;;  %v5265_v15 = vmul.f32 %v5235_v43, %v9588_v3  ;;  %v5269_v33 = vmul.f32 %v5251_v53, %v9576_v21  ;;  %v5273_v31 = vmul.f32 %v5251_v53, %v9638_v61 }
 0x2a7   : > { %v5436_v48 = vadd.f32 %v5428_v10, %v5420_v12  ;;  %v5440_v5 = vadd.f32 %v5432_v1, %v5424_v60  ;;  %v5285_v16 = vmul.f32 %v5251_v53, %v10745_v51  ;;  %v5289_v30 = vmul.f32 %v5251_v53, %v9588_v3 }
 0x2a8   : > { %v7380_v49 = vpack.c.bf16 %v5416_v25, %v5412_v52  ;;  %v5277_v26 = vsub.f32 %v5261_v24, %v5269_v33  ;;  %v5281_v19 = vsub.f32 %v5265_v15, %v5273_v31  ;;  %v5293_v36 = vmul.f32 %v5235_v43, %v9576_v21 }
 0x2a9   : > { %v7444_v11 = vpack.c.bf16 %v5440_v5, %v5436_v48  ;;  %v5297_v14 = vmul.f32 %v5235_v43, %v9638_v61  ;;  %v5247_v9 = vrot.slane %v10756_v18, %v9721_v58  ;;  %v5260_v47 = vmul.f32 %v5231_v40, %v10748_v20 }
 0x2aa   : > { %6577 = vmatpush2.bf16.msra.mxu0 %v7380_v49  ;;  %v7377_v42 = vpack.c.bf16 %v5281_v19, %v5277_v26  ;;  %v5301_v8 = vadd.f32 %v5293_v36, %v5285_v16  ;;  %v5264_v46 = vmul.f32 %v5231_v40, %v9560_v32  ;;  %v5292_v59 = vmul.f32 %v5231_v40, %v9570_v38 }
 0x2ab   : > { %6618 = vmatpush2.bf16.msra.mxu1 %v7444_v11  ;;  %v5305_v53 = vadd.f32 %v5297_v14, %v5289_v30  ;;  %v5268_v13 = vmul.f32 %v5247_v9, %v9570_v38  ;;  %v5272_v55 = vmul.f32 %v5247_v9, %v9631_v23  ;;  %v5284_v43 = vmul.f32 %v5247_v9, %v10748_v20 }
 0x2ac   : > { %6578 = vmatprep.subr.bf16.mxu0 %v7377_v42  ;;  %v5288_v29 = vmul.f32 %v5247_v9, %v9560_v32  ;;  %v5296_v45 = vmul.f32 %v5231_v40, %v9631_v23  ;;  %v5099_v7 = vrot.slane %v10753_v28, %v10749_v44  ;;  %v5115_v39 = vrot.slane %v10754_v37, %v10749_v44 }
 0x2ad   : > { %v7441_v12 = vpack.c.bf16 %v5305_v53, %v5301_v8  ;;  %v5276_v60 = vsub.f32 %v5260_v47, %v5268_v13  ;;  %v5280_v52 = vsub.f32 %v5264_v46, %v5272_v55  ;;  %v5300_v10 = vadd.f32 %v5292_v59, %v5284_v43 }
 0x2ae   : > { %v5304_v1 = vadd.f32 %v5296_v45, %v5288_v29  ;;  %v5125_v24 = vmul.f32 %v5099_v7, %v10745_v51  ;;  %v5129_v25 = vmul.f32 %v5099_v7, %v9588_v3  ;;  %v5133_v15 = vmul.f32 %v5115_v39, %v9576_v21 }
 0x2af   : > { %6619 = vmatprep.subr.bf16.mxu1 %v7441_v12  ;;  %v7376_v33 = vpack.c.bf16 %v5280_v52, %v5276_v60  ;;  %v5137_v40 = vmul.f32 %v5115_v39, %v9638_v61  ;;  %v5149_v31 = vmul.f32 %v5115_v39, %v10745_v51  ;;  %v5153_v48 = vmul.f32 %v5115_v39, %v9588_v3 }
 0x2b0   : > { %v7440_v5 = vpack.c.bf16 %v5304_v1, %v5300_v10  ;;  %v5141_v16 = vsub.f32 %v5125_v24, %v5133_v15  ;;  %v5157_v30 = vmul.f32 %v5099_v7, %v9576_v21  ;;  %v5161_v49 = vmul.f32 %v5099_v7, %v9638_v61 }
 0x2b1   : > { %6579 = vmatpush2.bf16.msra.mxu0 %v7376_v33  ;;  %v5145_v26 = vsub.f32 %v5129_v25, %v5137_v40  ;;  %v5095_v19 = vrot.slane %v10755_v6, %v10749_v44  ;;  %v5111_v36 = vrot.slane %v10756_v18, %v10749_v44  ;;  %v4963_v11 = vrot.slane %v10753_v28, %v10750_v17 }
 0x2b2   : > { %6620 = vmatpush2.bf16.msra.mxu1 %v7440_v5  ;;  %v5165_v14 = vadd.f32 %v5157_v30, %v5149_v31  ;;  %v5169_v9 = vadd.f32 %v5161_v49, %v5153_v48  ;;  %v4979_v47 = vrot.slane %v10754_v37, %v10750_v17  ;;  %v4959_v42 = vrot.slane %v10755_v6, %v10750_v17 }
 0x2b3   : > { %v7373_v8 = vpack.c.bf16 %v5145_v26, %v5141_v16  ;;  %v5124_v46 = vmul.f32 %v5095_v19, %v10748_v20  ;;  %v5128_v59 = vmul.f32 %v5095_v19, %v9560_v32  ;;  %v5132_v53 = vmul.f32 %v5111_v36, %v9570_v38 }
 0x2b4   : > { %v7437_v13 = vpack.c.bf16 %v5169_v9, %v5165_v14  ;;  %v5136_v55 = vmul.f32 %v5111_v36, %v9631_v23  ;;  %v5148_v43 = vmul.f32 %v5111_v36, %v10748_v20  ;;  %v5152_v29 = vmul.f32 %v5111_v36, %v9560_v32 }
 0x2b5   : > { %6580 = vmatprep.subr.bf16.mxu0 %v7373_v8  ;;  %v5140_v45 = vsub.f32 %v5124_v46, %v5132_v53  ;;  %v5156_v7 = vmul.f32 %v5095_v19, %v9570_v38  ;;  %v5160_v39 = vmul.f32 %v5095_v19, %v9631_v23  ;;  %v4989_v12 = vmul.f32 %v4963_v11, %v10745_v51 }
 0x2b6   : > { %6621 = vmatprep.subr.bf16.mxu1 %v7437_v13  ;;  %v5144_v60 = vsub.f32 %v5128_v59, %v5136_v55  ;;  %v4993_v52 = vmul.f32 %v4963_v11, %v9588_v3  ;;  %v4997_v10 = vmul.f32 %v4979_v47, %v9576_v21  ;;  %v5001_v1 = vmul.f32 %v4979_v47, %v9638_v61 }
 0x2b7   : > { %v5164_v24 = vadd.f32 %v5156_v7, %v5148_v43  ;;  %v5168_v25 = vadd.f32 %v5160_v39, %v5152_v29  ;;  %v5013_v15 = vmul.f32 %v4979_v47, %v10745_v51  ;;  %v5017_v33 = vmul.f32 %v4979_v47, %v9588_v3 }
 0x2b8   : > { %v7372_v40 = vpack.c.bf16 %v5144_v60, %v5140_v45  ;;  %v5005_v31 = vsub.f32 %v4989_v12, %v4997_v10  ;;  %v5009_v48 = vsub.f32 %v4993_v52, %v5001_v1  ;;  %v5021_v5 = vmul.f32 %v4963_v11, %v9576_v21 }
 0x2b9   : > { %v7436_v16 = vpack.c.bf16 %v5168_v25, %v5164_v24  ;;  %v5025_v30 = vmul.f32 %v4963_v11, %v9638_v61  ;;  %v4975_v49 = vrot.slane %v10756_v18, %v10750_v17  ;;  %v4988_v26 = vmul.f32 %v4959_v42, %v10748_v20 }
 0x2ba   : > { %6581 = vmatpush2.bf16.msra.mxu0 %v7372_v40  ;;  %v7369_v19 = vpack.c.bf16 %v5009_v48, %v5005_v31  ;;  %v5029_v36 = vadd.f32 %v5021_v5, %v5013_v15  ;;  %v4992_v14 = vmul.f32 %v4959_v42, %v9560_v32  ;;  %v5020_v9 = vmul.f32 %v4959_v42, %v9570_v38 }
 0x2bb   : > { %6622 = vmatpush2.bf16.msra.mxu1 %v7436_v16  ;;  %v5033_v47 = vadd.f32 %v5025_v30, %v5017_v33  ;;  %v4996_v8 = vmul.f32 %v4975_v49, %v9570_v38  ;;  %v5000_v46 = vmul.f32 %v4975_v49, %v9631_v23  ;;  %v5012_v11 = vmul.f32 %v4975_v49, %v10748_v20 }
 0x2bc   : > { %6582 = vmatprep.subr.bf16.mxu0 %v7369_v19  ;;  %v5016_v59 = vmul.f32 %v4975_v49, %v9560_v32  ;;  %v5024_v53 = vmul.f32 %v4959_v42, %v9631_v23  ;;  %v4827_v13 = vrot.slane %v10753_v28, %v10751_v35  ;;  %v4843_v55 = vrot.slane %v10754_v37, %v10751_v35 }
 0x2bd   : > { %v7433_v43 = vpack.c.bf16 %v5033_v47, %v5029_v36  ;;  %v5004_v29 = vsub.f32 %v4988_v26, %v4996_v8  ;;  %v5008_v45 = vsub.f32 %v4992_v14, %v5000_v46  ;;  %v5028_v7 = vadd.f32 %v5020_v9, %v5012_v11 }
 0x2be   : > { %v5032_v39 = vadd.f32 %v5024_v53, %v5016_v59  ;;  %v4853_v12 = vmul.f32 %v4827_v13, %v10745_v51  ;;  %v4857_v60 = vmul.f32 %v4827_v13, %v9588_v3  ;;  %v4861_v52 = vmul.f32 %v4843_v55, %v9576_v21 }
 0x2bf   : > { %6623 = vmatprep.subr.bf16.mxu1 %v7433_v43  ;;  %v7368_v10 = vpack.c.bf16 %v5008_v45, %v5004_v29  ;;  %v4865_v42 = vmul.f32 %v4843_v55, %v9638_v61  ;;  %v4877_v1 = vmul.f32 %v4843_v55, %v10745_v51  ;;  %v4881_v24 = vmul.f32 %v4843_v55, %v9588_v3 }
 0x2c0   : > { %v7432_v25 = vpack.c.bf16 %v5032_v39, %v5028_v7  ;;  %v4869_v15 = vsub.f32 %v4853_v12, %v4861_v52  ;;  %v4885_v33 = vmul.f32 %v4827_v13, %v9576_v21  ;;  %v4889_v40 = vmul.f32 %v4827_v13, %v9638_v61 }
 0x2c1   : > { %6583 = vmatpush2.bf16.msra.mxu0 %v7368_v10  ;;  %v4873_v31 = vsub.f32 %v4857_v60, %v4865_v42  ;;  %v4823_v48 = vrot.slane %v10755_v6, %v10751_v35  ;;  %v4839_v5 = vrot.slane %v10756_v18, %v10751_v35  ;;  %v4691_v16 = vrot.slane %v10753_v28, %v10752_v27 }
 0x2c2   : > { %6624 = vmatpush2.bf16.msra.mxu1 %v7432_v25  ;;  %v4893_v30 = vadd.f32 %v4885_v33, %v4877_v1  ;;  %v4897_v49 = vadd.f32 %v4889_v40, %v4881_v24  ;;  %v4707_v26 = vrot.slane %v10754_v37, %v10752_v27  ;;  %v4687_v19 = vrot.slane %v10755_v6, %v10752_v27 }
 0x2c3   : > { %v7365_v36 = vpack.c.bf16 %v4873_v31, %v4869_v15  ;;  %v4852_v14 = vmul.f32 %v4823_v48, %v10748_v20  ;;  %v4856_v9 = vmul.f32 %v4823_v48, %v9560_v32  ;;  %v4860_v47 = vmul.f32 %v4839_v5, %v9570_v38 }
 0x2c4   : > { %v7429_v8 = vpack.c.bf16 %v4897_v49, %v4893_v30  ;;  %v4864_v46 = vmul.f32 %v4839_v5, %v9631_v23  ;;  %v4876_v28 = vmul.f32 %v4839_v5, %v10748_v20  ;;  %v4880_v11 = vmul.f32 %v4839_v5, %v9560_v32  ;;  %v10758_v49 = vld [vmem:[#allocation21_spill] sm:$0xff] }
 0x2c5   : > { %6584 = vmatprep.subr.bf16.mxu0 %v7365_v36  ;;  %v4868_v59 = vsub.f32 %v4852_v14, %v4860_v47  ;;  %v4884_v37 = vmul.f32 %v4823_v48, %v9570_v38  ;;  %v4888_v6 = vmul.f32 %v4823_v48, %v9631_v23  ;;  %v4717_v53 = vmul.f32 %v4691_v16, %v10745_v51 }
 0x2c6   : > { %6625 = vmatprep.subr.bf16.mxu1 %v7429_v8  ;;  %v4872_v13 = vsub.f32 %v4856_v9, %v4864_v46  ;;  %v4721_v55 = vmul.f32 %v4691_v16, %v9588_v3  ;;  %v4725_v43 = vmul.f32 %v4707_v26, %v9576_v21  ;;  %v4729_v29 = vmul.f32 %v4707_v26, %v9638_v61 }
 0x2c7   : > { %v4892_v45 = vadd.f32 %v4884_v37, %v4876_v28  ;;  %v4896_v7 = vadd.f32 %v4888_v6, %v4880_v11  ;;  %v4741_v39 = vmul.f32 %v4707_v26, %v10745_v51  ;;  %v4745_v12 = vmul.f32 %v4707_v26, %v9588_v3 }
 0x2c8   : > { %v7364_v60 = vpack.c.bf16 %v4872_v13, %v4868_v59  ;;  %v4733_v52 = vsub.f32 %v4717_v53, %v4725_v43  ;;  %v4737_v10 = vsub.f32 %v4721_v55, %v4729_v29  ;;  %v4749_v42 = vmul.f32 %v4691_v16, %v9576_v21 }
 0x2c9   : > { %v7428_v1 = vpack.c.bf16 %v4896_v7, %v4892_v45  ;;  %v4753_v24 = vmul.f32 %v4691_v16, %v9638_v61  ;;  %v4703_v25 = vrot.slane %v10756_v18, %v10752_v27  ;;  %v4716_v15 = vmul.f32 %v4687_v19, %v10748_v20  ;;  %v10757_v16 = vld [vmem:[#allocation15_spill] sm:$0xff] }
 0x2ca   : > { %6585 = vmatpush2.bf16.msra.mxu0 %v7364_v60  ;;  %v7361_v33 = vpack.c.bf16 %v4737_v10, %v4733_v52  ;;  %v4757_v40 = vadd.f32 %v4749_v42, %v4741_v39  ;;  %v4720_v51 = vmul.f32 %v4687_v19, %v9560_v32  ;;  %v4748_v3 = vmul.f32 %v4687_v19, %v9570_v38  ;;  %v10759_v60 = vld [vmem:[#allocation14_spill] sm:$0xff]  ;;  %v10760_v42 = vld [vmem:[#allocation19_spill] sm:$0xff] }
 0x2cb   : > { %6626 = vmatpush2.bf16.msra.mxu1 %v7428_v1  ;;  %v4761_v31 = vadd.f32 %v4753_v24, %v4745_v12  ;;  %v4724_v48 = vmul.f32 %v4703_v25, %v9570_v38  ;;  %v4728_v21 = vmul.f32 %v4703_v25, %v9631_v23  ;;  %v4740_v61 = vmul.f32 %v4703_v25, %v10748_v20 }
 0x2cc   : > { %6586 = vmatprep.subr.bf16.mxu0 %v7361_v33  ;;  %v4744_v18 = vmul.f32 %v4703_v25, %v9560_v32  ;;  %v4752_v5 = vmul.f32 %v4687_v19, %v9631_v23  ;;  %v4563_v30 = vrot.slane %v10757_v16, %v9613_v0  ;;  %v4579_v26 = vrot.slane %v10758_v49, %v9613_v0  ;;  %v5772_v32 = vld [vmem:[%s10565_s3] sm:$0xff]  ;;  %v5773_v23 = vld [vmem:[%s10565_s3 + $0x8] sm:$0xff] }
 0x2cd   : > { %v7425_v36 = vpack.c.bf16 %v4761_v31, %v4757_v40  ;;  %v4732_v14 = vsub.f32 %v4716_v15, %v4724_v48  ;;  %v4736_v9 = vsub.f32 %v4720_v51, %v4728_v21  ;;  %v4756_v47 = vadd.f32 %v4748_v3, %v4740_v61  ;;  %v10761_v3 = vld [vmem:[#allocation25_spill] sm:$0xff] }
 0x2ce   : > { %v4760_v38 = vadd.f32 %v4752_v5, %v4744_v18  ;;  %v4583_v8 = vmul.f32 %v4563_v30, %v9418_v50  ;;  %v4587_v20 = vmul.f32 %v4563_v30, %v9785_v56  ;;  %v4591_v46 = vmul.f32 %v4579_v26, %v9627_v4 }
 0x2cf   : > { %6627 = vmatprep.subr.bf16.mxu1 %v7425_v36  ;;  %v7360_v19 = vpack.c.bf16 %v4736_v9, %v4732_v14  ;;  %v4595_v28 = vmul.f32 %v4579_v26, %v9789_v57  ;;  %v4607_v11 = vmul.f32 %v4579_v26, %v9418_v50  ;;  %v4611_v59 = vmul.f32 %v4579_v26, %v9785_v56 }
 0x2d0   : > { %v7424_v37 = vpack.c.bf16 %v4760_v38, %v4756_v47  ;;  %v4599_v6 = vsub.f32 %v4583_v8, %v4591_v46  ;;  %v4615_v53 = vmul.f32 %v4563_v30, %v9627_v4  ;;  %v4619_v13 = vmul.f32 %v4563_v30, %v9789_v57 }
 0x2d1   : > { %6587 = vmatpush2.bf16.msra.mxu0 %v7360_v19  ;;  %v4603_v55 = vsub.f32 %v4587_v20, %v4595_v28  ;;  %v10122_v43 = vcombine.low %v5772_v32, %v5772_v32  ;;  %v7063_v29 = vcombine.high %v5772_v32, %v5772_v32  ;;  %v10124_v45 = vcombine.low %v5773_v23, %v5773_v23 }
 0x2d2   : > { %6628 = vmatpush2.bf16.msra.mxu1 %v7424_v37  ;;  %v4623_v7 = vadd.f32 %v4615_v53, %v4607_v11  ;;  %v4627_v39 = vadd.f32 %v4619_v13, %v4611_v59  ;;  %v7065_v12 = vcombine.high %v5773_v23, %v5773_v23  ;;  %v4559_v52 = vrot.slane %v10759_v60, %v9613_v0 }
 0x2d3   : > { %v7359_v10 = vpack.c.bf16 %v4603_v55, %v4599_v6  ;;  %6588 = vmatprep.mubr.bf16.mxu0 %v7063_v29  ;;  %v4575_v1 = vrot.slane %v10760_v42, %v9613_v0  ;;  %v4427_v24 = vrot.slane %v10757_v16, %v9661_v62  ;;  %v4443_v25 = vrot.slane %v10758_v49, %v9661_v62 }
 0x2d4   : > { %v10137_v15 = vsel %vm2650_vm3, nan, %v9684_v41  ;;  %v7423_v33 = vpack.c.bf16 %v4627_v39, %v4623_v7  ;;  %6629 = vmatprep.mubr.bf16.mxu1 %v7065_v12  ;;  %6589 = vmatmul.mubr.bf16.vlgmr.msra.gmra.mxu0 %v10122_v43  ;;  %v4582_v40 = vmul.f32 %v4559_v52, %v9407_v34  ;;  %v4586_v51 = vmul.f32 %v4559_v52, %v9682_v63 }
 0x2d5   : > { %v10145_v48 = vsel %vm1097_vm13, nan, %v10761_v3  ;;  %6638 = vmatprep.subr.bf16.mxu0 %v7359_v10  ;;  %6630 = vmatmul.mubr.bf16.vlgmr.msra.gmra.mxu1 %v10124_v45  ;;  %v4590_v2 = vmul.f32 %v4575_v1, %v9580_v22  ;;  %v4594_v41 = vmul.f32 %v4575_v1, %v10137_v15  ;;  %v4606_v21 = vmul.f32 %v4575_v1, %v9407_v34 }
 0x2d6   : > { %6679 = vmatprep.subr.bf16.mxu1 %v7423_v33  ;;  %v4610_v61 = vmul.f32 %v4575_v1, %v9682_v63  ;;  %v4614_v18 = vmul.f32 %v4559_v52, %v9580_v22  ;;  %v4618_v5 = vmul.f32 %v4559_v52, %v10137_v15  ;;  %v4447_v30 = vmul.f32 %v4427_v24, %v9418_v50 }
 0x2d7   : > { %v4598_v26 = vsub.f32 %v4582_v40, %v4590_v2  ;;  %v4602_v36 = vsub.f32 %v4586_v51, %v4594_v41  ;;  %v4451_v14 = vmul.f32 %v4427_v24, %v9785_v56  ;;  %v4455_v9 = vmul.f32 %v4443_v25, %v9627_v4  ;;  %6670 = vmatprep.mubr.bf16.mxu0 %v7063_v29 }
 0x2d8   : > { %v4622_v47 = vadd.f32 %v4614_v18, %v4606_v21  ;;  %v4626_v38 = vadd.f32 %v4618_v5, %v4610_v61  ;;  %v4459_v8 = vmul.f32 %v4443_v25, %v9789_v57  ;;  %v4471_v20 = vmul.f32 %v4443_v25, %v9418_v50  ;;  %6711 = vmatprep.mubr.bf16.mxu1 %v7065_v12 }
 0x2d9   : > { %v7358_v46 = vpack.c.bf16 %v4602_v36, %v4598_v26  ;;  %v4463_v32 = vsub.f32 %v4447_v30, %v4455_v9  ;;  %v4475_v23 = vmul.f32 %v4443_v25, %v9785_v56  ;;  %v4479_v19 = vmul.f32 %v4427_v24, %v9627_v4 }
 0x2da   : > { %v7422_v28 = vpack.c.bf16 %v4626_v38, %v4622_v47  ;;  %v4467_v11 = vsub.f32 %v4451_v14, %v4459_v8  ;;  %v4483_v59 = vmul.f32 %v4427_v24, %v9789_v57  ;;  %v4423_v37 = vrot.slane %v10759_v60, %v9661_v62 }
 0x2db   : > { %6639 = vmatpush1.bf16.msra.mxu0 %v7358_v46  ;;  %v4487_v6 = vadd.f32 %v4479_v19, %v4471_v20  ;;  %v4439_v53 = vrot.slane %v10760_v42, %v9661_v62  ;;  %v4291_v13 = vrot.slane %v10757_v16, %v9718_v54  ;;  %v4307_v55 = vrot.slane %v10758_v49, %v9718_v54 }
 0x2dc   : > { %6680 = vmatpush1.bf16.msra.mxu1 %v7422_v28  ;;  %v7355_v29 = vpack.c.bf16 %v4467_v11, %v4463_v32  ;;  %v4491_v7 = vadd.f32 %v4483_v59, %v4475_v23  ;;  %v4446_v39 = vmul.f32 %v4423_v37, %v9407_v34  ;;  %v4450_v12 = vmul.f32 %v4423_v37, %v9682_v63 }
 0x2dd   : > { %v4454_v52 = vmul.f32 %v4439_v53, %v9580_v22  ;;  %v4458_v10 = vmul.f32 %v4439_v53, %v10137_v15  ;;  %v4470_v1 = vmul.f32 %v4439_v53, %v9407_v34  ;;  %v4474_v24 = vmul.f32 %v4439_v53, %v9682_v63 }
 0x2de   : > { %6640 = vmatprep.subr.bf16.mxu0 %v7355_v29  ;;  %v7419_v25 = vpack.c.bf16 %v4491_v7, %v4487_v6  ;;  %v4478_v33 = vmul.f32 %v4423_v37, %v9580_v22  ;;  %v4482_v40 = vmul.f32 %v4423_v37, %v10137_v15  ;;  %v4311_v51 = vmul.f32 %v4291_v13, %v9418_v50 }
 0x2df   : > { %v4462_v3 = vsub.f32 %v4446_v39, %v4454_v52  ;;  %v4466_v31 = vsub.f32 %v4450_v12, %v4458_v10  ;;  %v4315_v2 = vmul.f32 %v4291_v13, %v9785_v56  ;;  %v4319_v41 = vmul.f32 %v4307_v55, %v9627_v4 }
 0x2e0   : > { %6681 = vmatprep.subr.bf16.mxu1 %v7419_v25  ;;  %v4486_v21 = vadd.f32 %v4478_v33, %v4470_v1  ;;  %v4490_v61 = vadd.f32 %v4482_v40, %v4474_v24  ;;  %v4323_v18 = vmul.f32 %v4307_v55, %v9789_v57  ;;  %v4335_v5 = vmul.f32 %v4307_v55, %v9418_v50 }
 0x2e1   : > { %v7354_v30 = vpack.c.bf16 %v4466_v31, %v4462_v3  ;;  %v4327_v26 = vsub.f32 %v4311_v51, %v4319_v41  ;;  %v4339_v36 = vmul.f32 %v4307_v55, %v9785_v56  ;;  %v4343_v14 = vmul.f32 %v4291_v13, %v9627_v4 }
 0x2e2   : > { %v7418_v9 = vpack.c.bf16 %v4490_v61, %v4486_v21  ;;  %v4331_v47 = vsub.f32 %v4315_v2, %v4323_v18  ;;  %v4347_v38 = vmul.f32 %v4291_v13, %v9789_v57  ;;  %v4287_v8 = vrot.slane %v10759_v60, %v9718_v54 }
 0x2e3   : > { %6641 = vmatpush1.bf16.msra.mxu0 %v7354_v30  ;;  %v4351_v20 = vadd.f32 %v4343_v14, %v4335_v5  ;;  %v4303_v46 = vrot.slane %v10760_v42, %v9718_v54  ;;  %v4155_v32 = vrot.slane %v10757_v16, %v9721_v58  ;;  %v4171_v23 = vrot.slane %v10758_v49, %v9721_v58 }
 0x2e4   : > { %6682 = vmatpush1.bf16.msra.mxu1 %v7418_v9  ;;  %v7351_v19 = vpack.c.bf16 %v4331_v47, %v4327_v26  ;;  %v4355_v28 = vadd.f32 %v4347_v38, %v4339_v36  ;;  %v4310_v11 = vmul.f32 %v4287_v8, %v9407_v34  ;;  %v4314_v59 = vmul.f32 %v4287_v8, %v9682_v63 }
 0x2e5   : > { %v4318_v37 = vmul.f32 %v4303_v46, %v9580_v22  ;;  %v4322_v6 = vmul.f32 %v4303_v46, %v10137_v15  ;;  %v4334_v53 = vmul.f32 %v4303_v46, %v9407_v34  ;;  %v4338_v13 = vmul.f32 %v4303_v46, %v9682_v63 }
 0x2e6   : > { %6642 = vmatprep.subr.bf16.mxu0 %v7351_v19  ;;  %v7415_v55 = vpack.c.bf16 %v4355_v28, %v4351_v20  ;;  %v4342_v29 = vmul.f32 %v4287_v8, %v9580_v22  ;;  %v4346_v7 = vmul.f32 %v4287_v8, %v10137_v15  ;;  %v4175_v39 = vmul.f32 %v4155_v32, %v9418_v50 }
 0x2e7   : > { %v4326_v12 = vsub.f32 %v4310_v11, %v4318_v37  ;;  %v4330_v52 = vsub.f32 %v4314_v59, %v4322_v6  ;;  %v4179_v10 = vmul.f32 %v4155_v32, %v9785_v56  ;;  %v4183_v1 = vmul.f32 %v4171_v23, %v9627_v4 }
 0x2e8   : > { %6683 = vmatprep.subr.bf16.mxu1 %v7415_v55  ;;  %v4350_v24 = vadd.f32 %v4342_v29, %v4334_v53  ;;  %v4354_v25 = vadd.f32 %v4346_v7, %v4338_v13  ;;  %v4187_v33 = vmul.f32 %v4171_v23, %v9789_v57  ;;  %v4199_v40 = vmul.f32 %v4171_v23, %v9418_v50 }
 0x2e9   : > { %v7350_v51 = vpack.c.bf16 %v4330_v52, %v4326_v12  ;;  %v4191_v3 = vsub.f32 %v4175_v39, %v4183_v1  ;;  %v4203_v31 = vmul.f32 %v4171_v23, %v9785_v56  ;;  %v4207_v2 = vmul.f32 %v4155_v32, %v9627_v4 }
 0x2ea   : > { %v7414_v41 = vpack.c.bf16 %v4354_v25, %v4350_v24  ;;  %v4195_v21 = vsub.f32 %v4179_v10, %v4187_v33  ;;  %v4211_v61 = vmul.f32 %v4155_v32, %v9789_v57  ;;  %v4151_v18 = vrot.slane %v10759_v60, %v9721_v58 }
 0x2eb   : > { %6643 = vmatpush1.bf16.msra.mxu0 %v7350_v51  ;;  %v4215_v5 = vadd.f32 %v4207_v2, %v4199_v40  ;;  %v4167_v30 = vrot.slane %v10760_v42, %v9721_v58  ;;  %v4019_v26 = vrot.slane %v10757_v16, %v10749_v44  ;;  %v4035_v36 = vrot.slane %v10758_v49, %v10749_v44 }
 0x2ec   : > { %6684 = vmatpush1.bf16.msra.mxu1 %v7414_v41  ;;  %v7347_v14 = vpack.c.bf16 %v4195_v21, %v4191_v3  ;;  %v4219_v9 = vadd.f32 %v4211_v61, %v4203_v31  ;;  %v4174_v47 = vmul.f32 %v4151_v18, %v9407_v34  ;;  %v4178_v38 = vmul.f32 %v4151_v18, %v9682_v63 }
 0x2ed   : > { %v4182_v8 = vmul.f32 %v4167_v30, %v9580_v22  ;;  %v4186_v20 = vmul.f32 %v4167_v30, %v10137_v15  ;;  %v4198_v46 = vmul.f32 %v4167_v30, %v9407_v34  ;;  %v4202_v32 = vmul.f32 %v4167_v30, %v9682_v63 }
 0x2ee   : > { %6644 = vmatprep.subr.bf16.mxu0 %v7347_v14  ;;  %v7411_v23 = vpack.c.bf16 %v4219_v9, %v4215_v5  ;;  %v4206_v19 = vmul.f32 %v4151_v18, %v9580_v22  ;;  %v4210_v28 = vmul.f32 %v4151_v18, %v10137_v15  ;;  %v4039_v11 = vmul.f32 %v4019_v26, %v9418_v50 }
 0x2ef   : > { %v4190_v59 = vsub.f32 %v4174_v47, %v4182_v8  ;;  %v4194_v37 = vsub.f32 %v4178_v38, %v4186_v20  ;;  %v4043_v6 = vmul.f32 %v4019_v26, %v9785_v56  ;;  %v4047_v53 = vmul.f32 %v4035_v36, %v9627_v4 }
 0x2f0   : > { %6685 = vmatprep.subr.bf16.mxu1 %v7411_v23  ;;  %v4214_v13 = vadd.f32 %v4206_v19, %v4198_v46  ;;  %v4218_v55 = vadd.f32 %v4210_v28, %v4202_v32  ;;  %v4051_v29 = vmul.f32 %v4035_v36, %v9789_v57  ;;  %v4063_v7 = vmul.f32 %v4035_v36, %v9418_v50 }
 0x2f1   : > { %v7346_v39 = vpack.c.bf16 %v4194_v37, %v4190_v59  ;;  %v4055_v12 = vsub.f32 %v4039_v11, %v4047_v53  ;;  %v4067_v52 = vmul.f32 %v4035_v36, %v9785_v56  ;;  %v4071_v10 = vmul.f32 %v4019_v26, %v9627_v4 }
 0x2f2   : > { %v7410_v1 = vpack.c.bf16 %v4218_v55, %v4214_v13  ;;  %v4059_v24 = vsub.f32 %v4043_v6, %v4051_v29  ;;  %v4075_v25 = vmul.f32 %v4019_v26, %v9789_v57  ;;  %v4015_v33 = vrot.slane %v10759_v60, %v10749_v44 }
 0x2f3   : > { %6645 = vmatpush1.bf16.msra.mxu0 %v7346_v39  ;;  %v4079_v40 = vadd.f32 %v4071_v10, %v4063_v7  ;;  %v4031_v51 = vrot.slane %v10760_v42, %v10749_v44  ;;  %v3883_v3 = vrot.slane %v10757_v16, %v10750_v17  ;;  %v3899_v31 = vrot.slane %v10758_v49, %v10750_v17 }
 0x2f4   : > { %6686 = vmatpush1.bf16.msra.mxu1 %v7410_v1  ;;  %v7343_v2 = vpack.c.bf16 %v4059_v24, %v4055_v12  ;;  %v4083_v41 = vadd.f32 %v4075_v25, %v4067_v52  ;;  %v4038_v21 = vmul.f32 %v4015_v33, %v9407_v34  ;;  %v4042_v61 = vmul.f32 %v4015_v33, %v9682_v63 }
 0x2f5   : > { %v4046_v18 = vmul.f32 %v4031_v51, %v9580_v22  ;;  %v4050_v5 = vmul.f32 %v4031_v51, %v10137_v15  ;;  %v4062_v30 = vmul.f32 %v4031_v51, %v9407_v34  ;;  %v4066_v26 = vmul.f32 %v4031_v51, %v9682_v63 }
 0x2f6   : > { %6646 = vmatprep.subr.bf16.mxu0 %v7343_v2  ;;  %v7407_v36 = vpack.c.bf16 %v4083_v41, %v4079_v40  ;;  %v4070_v14 = vmul.f32 %v4015_v33, %v9580_v22  ;;  %v4074_v9 = vmul.f32 %v4015_v33, %v10137_v15  ;;  %v3903_v47 = vmul.f32 %v3883_v3, %v9418_v50 }
 0x2f7   : > { %v4054_v38 = vsub.f32 %v4038_v21, %v4046_v18  ;;  %v4058_v8 = vsub.f32 %v4042_v61, %v4050_v5  ;;  %v3907_v20 = vmul.f32 %v3883_v3, %v9785_v56  ;;  %v3911_v46 = vmul.f32 %v3899_v31, %v9627_v4 }
 0x2f8   : > { %6687 = vmatprep.subr.bf16.mxu1 %v7407_v36  ;;  %v4078_v32 = vadd.f32 %v4070_v14, %v4062_v30  ;;  %v4082_v23 = vadd.f32 %v4074_v9, %v4066_v26  ;;  %v3915_v19 = vmul.f32 %v3899_v31, %v9789_v57  ;;  %v3927_v28 = vmul.f32 %v3899_v31, %v9418_v50 }
 0x2f9   : > { %v7342_v11 = vpack.c.bf16 %v4058_v8, %v4054_v38  ;;  %v3919_v59 = vsub.f32 %v3903_v47, %v3911_v46  ;;  %v3931_v37 = vmul.f32 %v3899_v31, %v9785_v56  ;;  %v3935_v6 = vmul.f32 %v3883_v3, %v9627_v4 }
 0x2fa   : > { %v7406_v53 = vpack.c.bf16 %v4082_v23, %v4078_v32  ;;  %v3923_v13 = vsub.f32 %v3907_v20, %v3915_v19  ;;  %v3939_v55 = vmul.f32 %v3883_v3, %v9789_v57  ;;  %v3879_v29 = vrot.slane %v10759_v60, %v10750_v17 }
 0x2fb   : > { %6647 = vmatpush1.bf16.msra.mxu0 %v7342_v11  ;;  %v3943_v7 = vadd.f32 %v3935_v6, %v3927_v28  ;;  %v3895_v39 = vrot.slane %v10760_v42, %v10750_v17  ;;  %v3747_v12 = vrot.slane %v10757_v16, %v10751_v35  ;;  %v3763_v52 = vrot.slane %v10758_v49, %v10751_v35 }
 0x2fc   : > { %6688 = vmatpush1.bf16.msra.mxu1 %v7406_v53  ;;  %v7339_v10 = vpack.c.bf16 %v3923_v13, %v3919_v59  ;;  %v3947_v1 = vadd.f32 %v3939_v55, %v3931_v37  ;;  %v3902_v24 = vmul.f32 %v3879_v29, %v9407_v34  ;;  %v3906_v25 = vmul.f32 %v3879_v29, %v9682_v63 }
 0x2fd   : > { %v3910_v33 = vmul.f32 %v3895_v39, %v9580_v22  ;;  %v3914_v40 = vmul.f32 %v3895_v39, %v10137_v15  ;;  %v3926_v51 = vmul.f32 %v3895_v39, %v9407_v34  ;;  %v3930_v3 = vmul.f32 %v3895_v39, %v9682_v63 }
 0x2fe   : > { %6648 = vmatprep.subr.bf16.mxu0 %v7339_v10  ;;  %v7403_v31 = vpack.c.bf16 %v3947_v1, %v3943_v7  ;;  %v3934_v2 = vmul.f32 %v3879_v29, %v9580_v22  ;;  %v3938_v41 = vmul.f32 %v3879_v29, %v10137_v15  ;;  %v3767_v21 = vmul.f32 %v3747_v12, %v9418_v50 }
 0x2ff   : > { %v3918_v61 = vsub.f32 %v3902_v24, %v3910_v33  ;;  %v3922_v18 = vsub.f32 %v3906_v25, %v3914_v40  ;;  %v3771_v5 = vmul.f32 %v3747_v12, %v9785_v56  ;;  %v3775_v30 = vmul.f32 %v3763_v52, %v9627_v4 }
 0x300   : > { %6689 = vmatprep.subr.bf16.mxu1 %v7403_v31  ;;  %v3942_v26 = vadd.f32 %v3934_v2, %v3926_v51  ;;  %v3946_v36 = vadd.f32 %v3938_v41, %v3930_v3  ;;  %v3779_v14 = vmul.f32 %v3763_v52, %v9789_v57  ;;  %v3791_v9 = vmul.f32 %v3763_v52, %v9418_v50 }
 0x301   : > { %v7338_v47 = vpack.c.bf16 %v3922_v18, %v3918_v61  ;;  %v3783_v38 = vsub.f32 %v3767_v21, %v3775_v30  ;;  %v3795_v8 = vmul.f32 %v3763_v52, %v9785_v56  ;;  %v3799_v20 = vmul.f32 %v3747_v12, %v9627_v4 }
 0x302   : > { %v7402_v46 = vpack.c.bf16 %v3946_v36, %v3942_v26  ;;  %v3787_v32 = vsub.f32 %v3771_v5, %v3779_v14  ;;  %v3803_v23 = vmul.f32 %v3747_v12, %v9789_v57  ;;  %v3743_v19 = vrot.slane %v10759_v60, %v10751_v35 }
 0x303   : > { %6649 = vmatpush1.bf16.msra.mxu0 %v7338_v47  ;;  %v3807_v28 = vadd.f32 %v3799_v20, %v3791_v9  ;;  %v3759_v11 = vrot.slane %v10760_v42, %v10751_v35  ;;  %v3611_v59 = vrot.slane %v10757_v16, %v10752_v27  ;;  %v3627_v37 = vrot.slane %v10758_v49, %v10752_v27  ;;  %v10763_v9 = vld [vmem:[#allocation26_spill] sm:$0xff] }
 0x304   : > { %6690 = vmatpush1.bf16.msra.mxu1 %v7402_v46  ;;  %v7335_v6 = vpack.c.bf16 %v3787_v32, %v3783_v38  ;;  %v3811_v53 = vadd.f32 %v3803_v23, %v3795_v8  ;;  %v3766_v13 = vmul.f32 %v3743_v19, %v9407_v34  ;;  %v3770_v55 = vmul.f32 %v3743_v19, %v9682_v63 }
 0x305   : > { %v3774_v29 = vmul.f32 %v3759_v11, %v9580_v22  ;;  %v3778_v7 = vmul.f32 %v3759_v11, %v10137_v15  ;;  %v3790_v39 = vmul.f32 %v3759_v11, %v9407_v34  ;;  %v3794_v12 = vmul.f32 %v3759_v11, %v9682_v63 }
 0x306   : > { %6650 = vmatprep.subr.bf16.mxu0 %v7335_v6  ;;  %v7399_v16 = vpack.c.bf16 %v3811_v53, %v3807_v28  ;;  %v3798_v52 = vmul.f32 %v3743_v19, %v9580_v22  ;;  %v3802_v49 = vmul.f32 %v3743_v19, %v10137_v15  ;;  %v3631_v10 = vmul.f32 %v3611_v59, %v9418_v50 }
 0x307   : > { %v3782_v1 = vsub.f32 %v3766_v13, %v3774_v29  ;;  %v3786_v24 = vsub.f32 %v3770_v55, %v3778_v7  ;;  %v3635_v25 = vmul.f32 %v3611_v59, %v9785_v56  ;;  %v3639_v33 = vmul.f32 %v3627_v37, %v9627_v4 }
 0x308   : > { %6691 = vmatprep.subr.bf16.mxu1 %v7399_v16  ;;  %v3806_v40 = vadd.f32 %v3798_v52, %v3790_v39  ;;  %v3810_v51 = vadd.f32 %v3802_v49, %v3794_v12  ;;  %v3643_v3 = vmul.f32 %v3627_v37, %v9789_v57  ;;  %v3655_v31 = vmul.f32 %v3627_v37, %v9418_v50 }
 0x309   : > { %v7334_v2 = vpack.c.bf16 %v3786_v24, %v3782_v1  ;;  %v3647_v41 = vsub.f32 %v3631_v10, %v3639_v33  ;;  %v3659_v21 = vmul.f32 %v3627_v37, %v9785_v56  ;;  %v3663_v61 = vmul.f32 %v3611_v59, %v9627_v4  ;;  %v10764_v33 = vld [vmem:[#allocation11_spill] sm:$0xff] }
 0x30a   : > { %v7398_v18 = vpack.c.bf16 %v3810_v51, %v3806_v40  ;;  %v3651_v5 = vsub.f32 %v3635_v25, %v3643_v3  ;;  %v3667_v30 = vmul.f32 %v3611_v59, %v9789_v57  ;;  %v3607_v26 = vrot.slane %v10759_v60, %v10752_v27  ;;  %v10765_v3 = vld [vmem:[#allocation24_spill] sm:$0xff] }
 0x30b   : > { %6651 = vmatpush1.bf16.msra.mxu0 %v7334_v2  ;;  %v3671_v36 = vadd.f32 %v3663_v61, %v3655_v31  ;;  %v3623_v14 = vrot.slane %v10760_v42, %v10752_v27  ;;  %v5651_v47 = vrot.slane %v10763_v9, %v9613_v0  ;;  %v5667_v38 = vrot.slane %v10145_v48, %v9613_v0 }
 0x30c   : > { %6692 = vmatpush1.bf16.msra.mxu1 %v7398_v18  ;;  %v7331_v8 = vpack.c.bf16 %v3651_v5, %v3647_v41  ;;  %v3675_v20 = vadd.f32 %v3667_v30, %v3659_v21  ;;  %v3630_v46 = vmul.f32 %v3607_v26, %v9407_v34  ;;  %v3634_v32 = vmul.f32 %v3607_v26, %v9682_v63 }
 0x30d   : > { %v3638_v60 = vmul.f32 %v3623_v14, %v9580_v22  ;;  %v3642_v23 = vmul.f32 %v3623_v14, %v10137_v15  ;;  %v3654_v19 = vmul.f32 %v3623_v14, %v9407_v34  ;;  %v3658_v42 = vmul.f32 %v3623_v14, %v9682_v63 }
 0x30e   : > { %6652 = vmatprep.subr.bf16.mxu0 %v7331_v8  ;;  %v7395_v28 = vpack.c.bf16 %v3675_v20, %v3671_v36  ;;  %v3662_v11 = vmul.f32 %v3607_v26, %v9580_v22  ;;  %v3666_v59 = vmul.f32 %v3607_v26, %v10137_v15  ;;  %v5671_v37 = vmul.f32 %v5651_v47, %v9418_v50 }
 0x30f   : > { %v3646_v6 = vsub.f32 %v3630_v46, %v3638_v60  ;;  %v3650_v53 = vsub.f32 %v3634_v32, %v3642_v23  ;;  %v5675_v13 = vmul.f32 %v5651_v47, %v9785_v56  ;;  %v5679_v55 = vmul.f32 %v5667_v38, %v9627_v4 }
 0x310   : > { %6693 = vmatprep.subr.bf16.mxu1 %v7395_v28  ;;  %v3670_v29 = vadd.f32 %v3662_v11, %v3654_v19  ;;  %v3674_v7 = vadd.f32 %v3666_v59, %v3658_v42  ;;  %v5683_v39 = vmul.f32 %v5667_v38, %v9789_v57  ;;  %v5695_v12 = vmul.f32 %v5667_v38, %v9418_v50 }
 0x311   : > { %v7330_v16 = vpack.c.bf16 %v3650_v53, %v3646_v6  ;;  %v5687_v52 = vsub.f32 %v5671_v37, %v5679_v55  ;;  %v5699_v49 = vmul.f32 %v5667_v38, %v9785_v56  ;;  %v5703_v10 = vmul.f32 %v5651_v47, %v9627_v4 }
 0x312   : > { %v7394_v1 = vpack.c.bf16 %v3674_v7, %v3670_v29  ;;  %v5691_v24 = vsub.f32 %v5675_v13, %v5683_v39  ;;  %v5707_v25 = vmul.f32 %v5651_v47, %v9789_v57  ;;  %v5647_v40 = vrot.slane %v10764_v33, %v9613_v0 }
 0x313   : > { %6653 = vmatpush1.bf16.msra.mxu0 %v7330_v16  ;;  %v5711_v51 = vadd.f32 %v5703_v10, %v5695_v12  ;;  %v5663_v31 = vrot.slane %v10765_v3, %v9613_v0  ;;  %v5515_v2 = vrot.slane %v10763_v9, %v9661_v62  ;;  %v5531_v41 = vrot.slane %v10145_v48, %v9661_v62 }
 0x314   : > { %6694 = vmatpush1.bf16.msra.mxu1 %v7394_v1  ;;  %v7391_v21 = vpack.c.bf16 %v5691_v24, %v5687_v52  ;;  %v5715_v61 = vadd.f32 %v5707_v25, %v5699_v49  ;;  %v5670_v18 = vmul.f32 %v5647_v40, %v9407_v34  ;;  %v5674_v5 = vmul.f32 %v5647_v40, %v9682_v63 }
 0x315   : > { %v5678_v30 = vmul.f32 %v5663_v31, %v9580_v22  ;;  %v5682_v26 = vmul.f32 %v5663_v31, %v10137_v15  ;;  %v5694_v36 = vmul.f32 %v5663_v31, %v9407_v34  ;;  %v5698_v0 = vmul.f32 %v5663_v31, %v9682_v63 }
 0x316   : > { %6654 = vmatprep.subr.bf16.mxu0 %v7391_v21  ;;  %v7455_v14 = vpack.c.bf16 %v5715_v61, %v5711_v51  ;;  %v5702_v47 = vmul.f32 %v5647_v40, %v9580_v22  ;;  %v5706_v38 = vmul.f32 %v5647_v40, %v10137_v15  ;;  %v5535_v8 = vmul.f32 %v5515_v2, %v9418_v50 }
 0x317   : > { %v5686_v20 = vsub.f32 %v5670_v18, %v5678_v30  ;;  %v5690_v46 = vsub.f32 %v5674_v5, %v5682_v26  ;;  %v5539_v32 = vmul.f32 %v5515_v2, %v9785_v56  ;;  %v5543_v60 = vmul.f32 %v5531_v41, %v9627_v4 }
 0x318   : > { %6695 = vmatprep.subr.bf16.mxu1 %v7455_v14  ;;  %v5710_v23 = vadd.f32 %v5702_v47, %v5694_v36  ;;  %v5714_v19 = vadd.f32 %v5706_v38, %v5698_v0  ;;  %v5547_v42 = vmul.f32 %v5531_v41, %v9789_v57  ;;  %v5559_v28 = vmul.f32 %v5531_v41, %v9418_v50 }
 0x319   : > { %v7390_v11 = vpack.c.bf16 %v5690_v46, %v5686_v20  ;;  %v5551_v59 = vsub.f32 %v5535_v8, %v5543_v60  ;;  %v5563_v37 = vmul.f32 %v5531_v41, %v9785_v56  ;;  %v5567_v6 = vmul.f32 %v5515_v2, %v9627_v4 }
 0x31a   : > { %v7454_v53 = vpack.c.bf16 %v5714_v19, %v5710_v23  ;;  %v5555_v13 = vsub.f32 %v5539_v32, %v5547_v42  ;;  %v5571_v55 = vmul.f32 %v5515_v2, %v9789_v57  ;;  %v5511_v29 = vrot.slane %v10764_v33, %v9661_v62 }
 0x31b   : > { %6655 = vmatpush2.bf16.msra.mxu0 %v7390_v11  ;;  %v5575_v7 = vadd.f32 %v5567_v6, %v5559_v28  ;;  %v5527_v39 = vrot.slane %v10765_v3, %v9661_v62  ;;  %v5379_v12 = vrot.slane %v10763_v9, %v9718_v54  ;;  %v5395_v16 = vrot.slane %v10145_v48, %v9718_v54 }
 0x31c   : > { %6696 = vmatpush2.bf16.msra.mxu1 %v7454_v53  ;;  %v7387_v52 = vpack.c.bf16 %v5555_v13, %v5551_v59  ;;  %v5579_v49 = vadd.f32 %v5571_v55, %v5563_v37  ;;  %v5534_v10 = vmul.f32 %v5511_v29, %v9407_v34  ;;  %v5538_v1 = vmul.f32 %v5511_v29, %v9682_v63 }
 0x31d   : > { %v5542_v24 = vmul.f32 %v5527_v39, %v9580_v22  ;;  %v5546_v25 = vmul.f32 %v5527_v39, %v10137_v15  ;;  %v5558_v40 = vmul.f32 %v5527_v39, %v9407_v34  ;;  %v5562_v62 = vmul.f32 %v5527_v39, %v9682_v63 }
 0x31e   : > { %6656 = vmatprep.subr.bf16.mxu0 %v7387_v52  ;;  %v7451_v51 = vpack.c.bf16 %v5579_v49, %v5575_v7  ;;  %v5566_v31 = vmul.f32 %v5511_v29, %v9580_v22  ;;  %v5570_v2 = vmul.f32 %v5511_v29, %v10137_v15  ;;  %v5399_v41 = vmul.f32 %v5379_v12, %v9418_v50 }
 0x31f   : > { %v5550_v21 = vsub.f32 %v5534_v10, %v5542_v24  ;;  %v5554_v61 = vsub.f32 %v5538_v1, %v5546_v25  ;;  %v5403_v18 = vmul.f32 %v5379_v12, %v9785_v56  ;;  %v5407_v5 = vmul.f32 %v5395_v16, %v9627_v4 }
 0x320   : > { %6697 = vmatprep.subr.bf16.mxu1 %v7451_v51  ;;  %v5574_v30 = vadd.f32 %v5566_v31, %v5558_v40  ;;  %v5578_v26 = vadd.f32 %v5570_v2, %v5562_v62  ;;  %v5411_v36 = vmul.f32 %v5395_v16, %v9789_v57  ;;  %v5423_v0 = vmul.f32 %v5395_v16, %v9418_v50 }
 0x321   : > { %v7386_v14 = vpack.c.bf16 %v5554_v61, %v5550_v21  ;;  %v5415_v47 = vsub.f32 %v5399_v41, %v5407_v5  ;;  %v5427_v38 = vmul.f32 %v5395_v16, %v9785_v56  ;;  %v5431_v8 = vmul.f32 %v5379_v12, %v9627_v4 }
 0x322   : > { %v7450_v20 = vpack.c.bf16 %v5578_v26, %v5574_v30  ;;  %v5419_v46 = vsub.f32 %v5403_v18, %v5411_v36  ;;  %v5435_v32 = vmul.f32 %v5379_v12, %v9789_v57  ;;  %v5375_v60 = vrot.slane %v10764_v33, %v9718_v54 }
 0x323   : > { %6657 = vmatpush2.bf16.msra.mxu0 %v7386_v14  ;;  %v5439_v23 = vadd.f32 %v5431_v8, %v5423_v0  ;;  %v5391_v19 = vrot.slane %v10765_v3, %v9718_v54  ;;  %v5243_v42 = vrot.slane %v10763_v9, %v9721_v58  ;;  %v5259_v28 = vrot.slane %v10145_v48, %v9721_v58 }
 0x324   : > { %6698 = vmatpush2.bf16.msra.mxu1 %v7450_v20  ;;  %v7383_v11 = vpack.c.bf16 %v5419_v46, %v5415_v47  ;;  %v5443_v59 = vadd.f32 %v5435_v32, %v5427_v38  ;;  %v5398_v37 = vmul.f32 %v5375_v60, %v9407_v34  ;;  %v5402_v6 = vmul.f32 %v5375_v60, %v9682_v63 }
 0x325   : > { %v5406_v53 = vmul.f32 %v5391_v19, %v9580_v22  ;;  %v5410_v13 = vmul.f32 %v5391_v19, %v10137_v15  ;;  %v5422_v55 = vmul.f32 %v5391_v19, %v9407_v34  ;;  %v5426_v54 = vmul.f32 %v5391_v19, %v9682_v63 }
 0x326   : > { %6658 = vmatprep.subr.bf16.mxu0 %v7383_v11  ;;  %v7447_v29 = vpack.c.bf16 %v5443_v59, %v5439_v23  ;;  %v5430_v7 = vmul.f32 %v5375_v60, %v9580_v22  ;;  %v5434_v39 = vmul.f32 %v5375_v60, %v10137_v15  ;;  %v5263_v12 = vmul.f32 %v5243_v42, %v9418_v50 }
 0x327   : > { %v5414_v16 = vsub.f32 %v5398_v37, %v5406_v53  ;;  %v5418_v52 = vsub.f32 %v5402_v6, %v5410_v13  ;;  %v5267_v49 = vmul.f32 %v5243_v42, %v9785_v56  ;;  %v5271_v10 = vmul.f32 %v5259_v28, %v9627_v4 }
 0x328   : > { %6699 = vmatprep.subr.bf16.mxu1 %v7447_v29  ;;  %v5438_v1 = vadd.f32 %v5430_v7, %v5422_v55  ;;  %v5442_v24 = vadd.f32 %v5434_v39, %v5426_v54  ;;  %v5275_v25 = vmul.f32 %v5259_v28, %v9789_v57  ;;  %v5287_v40 = vmul.f32 %v5259_v28, %v9418_v50 }
 0x329   : > { %v7382_v62 = vpack.c.bf16 %v5418_v52, %v5414_v16  ;;  %v5279_v51 = vsub.f32 %v5263_v12, %v5271_v10  ;;  %v5291_v31 = vmul.f32 %v5259_v28, %v9785_v56  ;;  %v5295_v2 = vmul.f32 %v5243_v42, %v9627_v4 }
 0x32a   : > { %v7446_v41 = vpack.c.bf16 %v5442_v24, %v5438_v1  ;;  %v5283_v21 = vsub.f32 %v5267_v49, %v5275_v25  ;;  %v5299_v61 = vmul.f32 %v5243_v42, %v9789_v57  ;;  %v5239_v18 = vrot.slane %v10764_v33, %v9721_v58 }
 0x32b   : > { %6659 = vmatpush2.bf16.msra.mxu0 %v7382_v62  ;;  %v5303_v5 = vadd.f32 %v5295_v2, %v5287_v40  ;;  %v5255_v30 = vrot.slane %v10765_v3, %v9721_v58  ;;  %v5107_v26 = vrot.slane %v10763_v9, %v10749_v44  ;;  %v5123_v36 = vrot.slane %v10145_v48, %v10749_v44 }
 0x32c   : > { %6700 = vmatpush2.bf16.msra.mxu1 %v7446_v41  ;;  %v7379_v0 = vpack.c.bf16 %v5283_v21, %v5279_v51  ;;  %v5307_v14 = vadd.f32 %v5299_v61, %v5291_v31  ;;  %v5262_v47 = vmul.f32 %v5239_v18, %v9407_v34  ;;  %v5266_v38 = vmul.f32 %v5239_v18, %v9682_v63 }
 0x32d   : > { %v5270_v8 = vmul.f32 %v5255_v30, %v9580_v22  ;;  %v5274_v20 = vmul.f32 %v5255_v30, %v10137_v15  ;;  %v5286_v46 = vmul.f32 %v5255_v30, %v9407_v34  ;;  %v5290_v58 = vmul.f32 %v5255_v30, %v9682_v63 }
 0x32e   : > { %6660 = vmatprep.subr.bf16.mxu0 %v7379_v0  ;;  %v7443_v32 = vpack.c.bf16 %v5307_v14, %v5303_v5  ;;  %v5294_v60 = vmul.f32 %v5239_v18, %v9580_v22  ;;  %v5298_v23 = vmul.f32 %v5239_v18, %v10137_v15  ;;  %v5127_v19 = vmul.f32 %v5107_v26, %v9418_v50 }
 0x32f   : > { %v5278_v42 = vsub.f32 %v5262_v47, %v5270_v8  ;;  %v5282_v28 = vsub.f32 %v5266_v38, %v5274_v20  ;;  %v5131_v11 = vmul.f32 %v5107_v26, %v9785_v56  ;;  %v5135_v59 = vmul.f32 %v5123_v36, %v9627_v4 }
 0x330   : > { %6701 = vmatprep.subr.bf16.mxu1 %v7443_v32  ;;  %v5302_v37 = vadd.f32 %v5294_v60, %v5286_v46  ;;  %v5306_v6 = vadd.f32 %v5298_v23, %v5290_v58  ;;  %v5139_v53 = vmul.f32 %v5123_v36, %v9789_v57  ;;  %v5151_v13 = vmul.f32 %v5123_v36, %v9418_v50 }
 0x331   : > { %v7378_v55 = vpack.c.bf16 %v5282_v28, %v5278_v42  ;;  %v5143_v54 = vsub.f32 %v5127_v19, %v5135_v59  ;;  %v5155_v29 = vmul.f32 %v5123_v36, %v9785_v56  ;;  %v5159_v7 = vmul.f32 %v5107_v26, %v9627_v4 }
 0x332   : > { %v7442_v39 = vpack.c.bf16 %v5306_v6, %v5302_v37  ;;  %v5147_v12 = vsub.f32 %v5131_v11, %v5139_v53  ;;  %v5163_v16 = vmul.f32 %v5107_v26, %v9789_v57  ;;  %v5103_v52 = vrot.slane %v10764_v33, %v10749_v44 }
 0x333   : > { %6661 = vmatpush2.bf16.msra.mxu0 %v7378_v55  ;;  %v5167_v49 = vadd.f32 %v5159_v7, %v5151_v13  ;;  %v5119_v10 = vrot.slane %v10765_v3, %v10749_v44  ;;  %v4971_v1 = vrot.slane %v10763_v9, %v10750_v17  ;;  %v4987_v24 = vrot.slane %v10145_v48, %v10750_v17 }
 0x334   : > { %6702 = vmatpush2.bf16.msra.mxu1 %v7442_v39  ;;  %v7375_v25 = vpack.c.bf16 %v5147_v12, %v5143_v54  ;;  %v5171_v40 = vadd.f32 %v5163_v16, %v5155_v29  ;;  %v5126_v62 = vmul.f32 %v5103_v52, %v9407_v34  ;;  %v5130_v51 = vmul.f32 %v5103_v52, %v9682_v63 }
 0x335   : > { %v5134_v31 = vmul.f32 %v5119_v10, %v9580_v22  ;;  %v5138_v2 = vmul.f32 %v5119_v10, %v10137_v15  ;;  %v5150_v41 = vmul.f32 %v5119_v10, %v9407_v34  ;;  %v5154_v44 = vmul.f32 %v5119_v10, %v9682_v63 }
 0x336   : > { %6662 = vmatprep.subr.bf16.mxu0 %v7375_v25  ;;  %v7439_v21 = vpack.c.bf16 %v5171_v40, %v5167_v49  ;;  %v5158_v61 = vmul.f32 %v5103_v52, %v9580_v22  ;;  %v5162_v18 = vmul.f32 %v5103_v52, %v10137_v15  ;;  %v4991_v5 = vmul.f32 %v4971_v1, %v9418_v50 }
 0x337   : > { %v5142_v30 = vsub.f32 %v5126_v62, %v5134_v31  ;;  %v5146_v26 = vsub.f32 %v5130_v51, %v5138_v2  ;;  %v4995_v36 = vmul.f32 %v4971_v1, %v9785_v56  ;;  %v4999_v0 = vmul.f32 %v4987_v24, %v9627_v4 }
 0x338   : > { %6703 = vmatprep.subr.bf16.mxu1 %v7439_v21  ;;  %v5166_v14 = vadd.f32 %v5158_v61, %v5150_v41  ;;  %v5170_v47 = vadd.f32 %v5162_v18, %v5154_v44  ;;  %v5003_v38 = vmul.f32 %v4987_v24, %v9789_v57  ;;  %v5015_v8 = vmul.f32 %v4987_v24, %v9418_v50 }
 0x339   : > { %v7374_v20 = vpack.c.bf16 %v5146_v26, %v5142_v30  ;;  %v5007_v46 = vsub.f32 %v4991_v5, %v4999_v0  ;;  %v5019_v58 = vmul.f32 %v4987_v24, %v9785_v56  ;;  %v5023_v32 = vmul.f32 %v4971_v1, %v9627_v4 }
 0x33a   : > { %v7438_v60 = vpack.c.bf16 %v5170_v47, %v5166_v14  ;;  %v5011_v23 = vsub.f32 %v4995_v36, %v5003_v38  ;;  %v5027_v19 = vmul.f32 %v4971_v1, %v9789_v57  ;;  %v4967_v42 = vrot.slane %v10764_v33, %v10750_v17 }
 0x33b   : > { %6663 = vmatpush2.bf16.msra.mxu0 %v7374_v20  ;;  %v5031_v28 = vadd.f32 %v5023_v32, %v5015_v8  ;;  %v4983_v11 = vrot.slane %v10765_v3, %v10750_v17  ;;  %v4835_v59 = vrot.slane %v10763_v9, %v10751_v35  ;;  %v4851_v37 = vrot.slane %v10145_v48, %v10751_v35 }
 0x33c   : > { %6704 = vmatpush2.bf16.msra.mxu1 %v7438_v60  ;;  %v7371_v6 = vpack.c.bf16 %v5011_v23, %v5007_v46  ;;  %v5035_v53 = vadd.f32 %v5027_v19, %v5019_v58  ;;  %v4990_v13 = vmul.f32 %v4967_v42, %v9407_v34  ;;  %v4994_v55 = vmul.f32 %v4967_v42, %v9682_v63 }
 0x33d   : > { %v4998_v54 = vmul.f32 %v4983_v11, %v9580_v22  ;;  %v5002_v29 = vmul.f32 %v4983_v11, %v10137_v15  ;;  %v5014_v7 = vmul.f32 %v4983_v11, %v9407_v34  ;;  %v5018_v17 = vmul.f32 %v4983_v11, %v9682_v63 }
 0x33e   : > { %6664 = vmatprep.subr.bf16.mxu0 %v7371_v6  ;;  %v7435_v39 = vpack.c.bf16 %v5035_v53, %v5031_v28  ;;  %v5022_v12 = vmul.f32 %v4967_v42, %v9580_v22  ;;  %v5026_v16 = vmul.f32 %v4967_v42, %v10137_v15  ;;  %v4855_v52 = vmul.f32 %v4835_v59, %v9418_v50 }
 0x33f   : > { %v5006_v49 = vsub.f32 %v4990_v13, %v4998_v54  ;;  %v5010_v10 = vsub.f32 %v4994_v55, %v5002_v29  ;;  %v4859_v1 = vmul.f32 %v4835_v59, %v9785_v56  ;;  %v4863_v24 = vmul.f32 %v4851_v37, %v9627_v4 }
 0x340   : > { %6705 = vmatprep.subr.bf16.mxu1 %v7435_v39  ;;  %v5030_v25 = vadd.f32 %v5022_v12, %v5014_v7  ;;  %v5034_v40 = vadd.f32 %v5026_v16, %v5018_v17  ;;  %v4867_v62 = vmul.f32 %v4851_v37, %v9789_v57  ;;  %v4879_v51 = vmul.f32 %v4851_v37, %v9418_v50 }
 0x341   : > { %v7370_v31 = vpack.c.bf16 %v5010_v10, %v5006_v49  ;;  %v4871_v2 = vsub.f32 %v4855_v52, %v4863_v24  ;;  %v4883_v41 = vmul.f32 %v4851_v37, %v9785_v56  ;;  %v4887_v44 = vmul.f32 %v4835_v59, %v9627_v4 }
 0x342   : > { %v7434_v21 = vpack.c.bf16 %v5034_v40, %v5030_v25  ;;  %v4875_v61 = vsub.f32 %v4859_v1, %v4867_v62  ;;  %v4891_v18 = vmul.f32 %v4835_v59, %v9789_v57  ;;  %v4831_v5 = vrot.slane %v10764_v33, %v10751_v35 }
 0x343   : > { %6665 = vmatpush2.bf16.msra.mxu0 %v7370_v31  ;;  %v4895_v30 = vadd.f32 %v4887_v44, %v4879_v51  ;;  %v4847_v26 = vrot.slane %v10765_v3, %v10751_v35  ;;  %v4699_v36 = vrot.slane %v10763_v9, %v10752_v27  ;;  %v4715_v0 = vrot.slane %v10145_v48, %v10752_v27 }
 0x344   : > { %6706 = vmatpush2.bf16.msra.mxu1 %v7434_v21  ;;  %v7367_v14 = vpack.c.bf16 %v4875_v61, %v4871_v2  ;;  %v4899_v47 = vadd.f32 %v4891_v18, %v4883_v41  ;;  %v4854_v38 = vmul.f32 %v4831_v5, %v9407_v34  ;;  %v4858_v8 = vmul.f32 %v4831_v5, %v9682_v63 }
 0x345   : > { %v4862_v20 = vmul.f32 %v4847_v26, %v9580_v22  ;;  %v4866_v46 = vmul.f32 %v4847_v26, %v10137_v15  ;;  %v4878_v58 = vmul.f32 %v4847_v26, %v9407_v34  ;;  %v4882_v35 = vmul.f32 %v4847_v26, %v9682_v63 }
 0x346   : > { %6666 = vmatprep.subr.bf16.mxu0 %v7367_v14  ;;  %v7431_v9 = vpack.c.bf16 %v4899_v47, %v4895_v30  ;;  %v4886_v32 = vmul.f32 %v4831_v5, %v9580_v22  ;;  %v4890_v48 = vmul.f32 %v4831_v5, %v10137_v15  ;;  %v4719_v60 = vmul.f32 %v4699_v36, %v9418_v50 }
 0x347   : > { %v4870_v23 = vsub.f32 %v4854_v38, %v4862_v20  ;;  %v4874_v19 = vsub.f32 %v4858_v8, %v4866_v46  ;;  %v4723_v42 = vmul.f32 %v4699_v36, %v9785_v56  ;;  %v4727_v28 = vmul.f32 %v4715_v0, %v9627_v4 }
 0x348   : > { %6707 = vmatprep.subr.bf16.mxu1 %v7431_v9  ;;  %v4894_v11 = vadd.f32 %v4886_v32, %v4878_v58  ;;  %v4898_v59 = vadd.f32 %v4890_v48, %v4882_v35  ;;  %v4731_v37 = vmul.f32 %v4715_v0, %v9789_v57  ;;  %v4743_v6 = vmul.f32 %v4715_v0, %v9418_v50 }
 0x349   : > { %v7366_v53 = vpack.c.bf16 %v4874_v19, %v4870_v23  ;;  %v4735_v13 = vsub.f32 %v4719_v60, %v4727_v28  ;;  %v4747_v55 = vmul.f32 %v4715_v0, %v9785_v56  ;;  %v4751_v54 = vmul.f32 %v4699_v36, %v9627_v4 }
 0x34a   : > { %v7430_v29 = vpack.c.bf16 %v4898_v59, %v4894_v11  ;;  %v4739_v7 = vsub.f32 %v4723_v42, %v4731_v37  ;;  %v4755_v17 = vmul.f32 %v4699_v36, %v9789_v57  ;;  %v4695_v39 = vrot.slane %v10764_v33, %v10752_v27 }
 0x34b   : > { %6667 = vmatpush2.bf16.msra.mxu0 %v7366_v53  ;;  %v4759_v12 = vadd.f32 %v4751_v54, %v4743_v6  ;;  %v4711_v16 = vrot.slane %v10765_v3, %v10752_v27 }
 0x34c   : > { %6708 = vmatpush2.bf16.msra.mxu1 %v7430_v29  ;;  %v7363_v50 = vpack.c.bf16 %v4739_v7, %v4735_v13  ;;  %v4763_v52 = vadd.f32 %v4755_v17, %v4747_v55  ;;  %v4718_v49 = vmul.f32 %v4695_v39, %v9407_v34  ;;  %v4722_v56 = vmul.f32 %v4695_v39, %v9682_v63 }
 0x34d   : > { %v4726_v4 = vmul.f32 %v4711_v16, %v9580_v22  ;;  %v4730_v10 = vmul.f32 %v4711_v16, %v10137_v15  ;;  %v4742_v57 = vmul.f32 %v4711_v16, %v9407_v34  ;;  %v4746_v33 = vmul.f32 %v4711_v16, %v9682_v63 }
 0x34e   : > { %6668 = vmatprep.subr.bf16.mxu0 %v7363_v50  ;;  %v7427_v1 = vpack.c.bf16 %v4763_v52, %v4759_v12  ;;  %v4750_v27 = vmul.f32 %v4695_v39, %v9580_v22  ;;  %v4754_v3 = vmul.f32 %v4695_v39, %v10137_v15 }
 0x34f   : > { %v4734_v24 = vsub.f32 %v4718_v49, %v4726_v4  ;;  %v4738_v25 = vsub.f32 %v4722_v56, %v4730_v10 }
 0x350   : > { %6709 = vmatprep.subr.bf16.mxu1 %v7427_v1  ;;  %v4758_v40 = vadd.f32 %v4750_v27, %v4742_v57  ;;  %v4762_v62 = vadd.f32 %v4754_v3, %v4746_v33 }
 0x351   : > { %v7362_v51 = vpack.c.bf16 %v4738_v25, %v4734_v24 }
 0x352   : > { %v7426_v31 = vpack.c.bf16 %v4762_v62, %v4758_v40 }
 0x353   : > { %6669 = vmatpush2.bf16.msra.mxu0 %v7362_v51 }
 0x354   : > { %6710 = vmatpush2.bf16.msra.mxu1 %v7426_v31 }
 0x356   : > { %6671 = vmatmul.mubr.bf16.vlgmr.msra.gmra.mxu0 %v10122_v43 }
 0x357   : > { %6712 = vmatmul.mubr.bf16.vlgmr.msra.gmra.mxu1 %v10124_v45 }
 0x394   : > { %v6590_v34 = vpop.f32.mrf.mxu0 }
 0x395   : > { %v6631_v22 = vpop.f32.mrf.mxu1 }
 0x396   : > { %v6632_v63 = vadd.f32 %v6631_v22, %v6590_v34  ;;  %v6592_v15 = vpop.f32.mrf.mxu0 }
 0x397   : > { %v6633_v2 = vpop.f32.mrf.mxu1 }
 0x398   : > { %6720 = vst [vmem:[%s191_s29] sm:$0xff] %v6632_v63  ;;  %v6634_v41 = vadd.f32 %v6633_v2, %v6592_v15  ;;  %v6594_v44 = vpop.f32.mrf.mxu0 }
 0x399   : > { %v6635_v21 = vpop.f32.mrf.mxu1 }
 0x39a   : > { %6721 = vst [vmem:[%s191_s29 + $0x8] sm:$0xff] %v6634_v41  ;;  %v6595_v61 = vpop.f32.mrf.mxu0 }
 0x39b   : > { %v6636_v18 = vpop.f32.mrf.mxu1 }
 0x416   : > { %v6672_v43 = vpop.f32.mrf.mxu0 }
 0x417   : > { %v6713_v45 = vpop.f32.mrf.mxu1 }
 0x418   : > { %v6714_v5 = vadd.f32 %v6713_v45, %v6672_v43  ;;  %v6674_v30 = vpop.f32.mrf.mxu0 }
 0x419   : > { %v6715_v26 = vpop.f32.mrf.mxu1 }
 0x41a   : > { %6722 = vst [vmem:[%s191_s29 + $0x10] sm:$0xff] %v6714_v5  ;;  %v6716_v36 = vadd.f32 %v6715_v26, %v6674_v30  ;;  %v6676_v0 = vpop.f32.mrf.mxu0 }
 0x41b   : > { %v6717_v14 = vpop.f32.mrf.mxu1 }
 0x41c   : > { %6723 = vst [vmem:[%s191_s29 + $0x18] sm:$0xff] %v6716_v36  ;;  %v6677_v47 = vpop.f32.mrf.mxu0 }
 0x41d   : > { %v6718_v38 = vpop.f32.mrf.mxu1 }
 0x41e   : > { %7649 = shalt.err (!%p7646_p3)
}
 0x41f   : > { %s7650_s13 = scalar_lea.hbm %s10519_s8, 512  ;;  %s7654_s22 = scalar_lea.hbm %s10566_s4, 1024 }
 0x420   : > { %p7651_p4 = scmp.ne.s32.totalorder %s10519_s8, %s7650_s13  ;;  %p7655_p9 = scmp.lt.s32.totalorder %s10519_s8, %s10566_s4 }
 0x421   : > { %p7656_p10 = scmp.lt.s32.totalorder %s7654_s22, %s7650_s13 }
 0x422   : > { %p7652_p7 = pnand %p7651_p4, %p7769_p5 }
 0x423   : > { %p7657_p11 = por %p7656_p10, %p7655_p9 }
 0x424   : > { %p7653_p8 = pneg %p7652_p7 }
 0x426   : > { %p7658_p12 = pnand %p7657_p11, %p7653_p8 }
 0x428   : > { %7661 = shalt.err (!%p7658_p12)
}
 0x429   : > { %7520 = dma.vmem_to_hbm [thread:$0]  (%p7769_p5), %s10521_s5, 512, %s10519_s8, %s6725_s19  }
 0x42a PF: > { %p7526_p13 = scmp.ge.s32.totalorder %s7696_s18, 2  ;;  %s6751_s28 = sand.u32 1, %s7684_s15  }
 0x42b   : > { %s6752_s29 = scalar_lea.sflag [#allocation4], %s6751_s28 }
 0x42c   : > { %p7523_p0 = pnand %p7526_p13, %p7773_p6 }
 0x42e   : > { %p7524_p1 = pneg %p7523_p0 }
 0x430   : > { %7679 = dma.done.wait (%p7524_p1), %s6752_s29, 512  }
 0x431   : > { %7681 = vsyncadd (%p7524_p1), %s6752_s29, 4294966784  ;;  %p14_p2 = scmp.ge.s32.totalorder %s7756_s21, 4   ;;  %s10766_s15 = smov %s7688_s16 }
 0x432   : > { %s10767_s16 = smov %s7692_s17  ;;  %s10768_s17 = smov %s7767_s24 }
 0x433   : > { %s10769_s18 = smov %s7756_s21  ;;  %16 = sbr.rel (!%p14_p2) target bundleno = 3 (0x3), region = 72 }
 0x438   :  { %6757 = vsyncpa [#allocation4], 1 }
 0x439   :  { %6759 = vsyncpa [#allocation4 + $0x1], 1 }

</bundles_post_ra>
